<compile_context>
chip_gen: v6e
topology: v6e:2x2x1
jax: 0.10.0
libtpu: 0.0.40
codegen_flags: <defaults>
</compile_context>

<pallas_src>
import math
import jax
import jax.numpy as jnp
from jax.experimental import pallas as pl
from jax.experimental.pallas import tpu as pltpu


# -----------------------------------------------------------------------------
# Fused BRITS kernel: both directions lane-stacked, everything resident in VMEM.
# -----------------------------------------------------------------------------
def brits_kernel(x_ref, m_ref, dl_ref, sel_ref,
                 wg_blk, bg_cat, whcat, br_cat, wix_blk, wim_blk, bgates,
                 imp_ref, loss_ref,
                 gam_s, gm_s, xh_s, imp_r):
    T, B, D2 = x_ref.shape            # D2 = 2*D  (fwd | bwd lanes)
    D = D2 // 2
    H2 = wg_blk.shape[1]              # 2*H : stacked hidden width
    H8 = wim_blk.shape[1]             # 8*H : stacked gate width
    H6 = (H8 // 4) * 3                # 6*H : sigmoid gates (i | f | o)
    TB = T * B

    # ---------------- prologue: batched, state-independent work --------------
    dl2 = dl_ref[...].reshape(TB, D2)                 # layout-trivial reshapes
    m2 = m_ref[...].reshape(TB, D2)

    # gamma = exp(-relu(delta @ Wg + bg)) for all timesteps / both directions
    gam_s[...] = jnp.exp(-jnp.maximum(
        jnp.dot(dl2, wg_blk[...], preferred_element_type=jnp.float32)
        + bg_cat[...], 0.0)).reshape(T, B, H2)

    # m @ Wim + (bih + bhh): state-independent part of the LSTM gates
    gm_s[...] = (jnp.dot(m2, wim_blk[...], preferred_element_type=jnp.float32)
                 + bgates[...]).reshape(T, B, H8)

    # ---------------- serial recurrence: both directions lane-stacked --------
    h = jnp.zeros((B, H2), jnp.float32)
    c = jnp.zeros((B, H2), jnp.float32)

    for t in range(T):                                # fully unrolled (T small)
        x_t = x_ref[t]                                # (B, 2D) aligned load
        m_t = m_ref[t]

        h = h * gam_s[t]                              # temporal decay

        # one fused h matmul: columns = [hh gate contrib (8H) | hist-reg (2D)]
        hr = jnp.dot(h, whcat[...], preferred_element_type=jnp.float32)
        gate_h = hr[:, :H8]
        x_h = hr[:, H8:] + br_cat[...]                # history regression
        x_c = m_t * x_t + (1.0 - m_t) * x_h           # masked complement

        # gates = x_c @ W_ix + h @ W_hh + (m @ W_im + biases)
        gates = (jnp.dot(x_c, wix_blk[...], preferred_element_type=jnp.float32)
                 + gate_h + gm_s[t])
        sig = jax.nn.sigmoid(gates[:, :H6])           # i | f | o in one pass
        i_g = sig[:, 0:H2]
        f_g = sig[:, H2:2 * H2]
        o_g = sig[:, 2 * H2:3 * H2]
        g_g = jnp.tanh(gates[:, H6:])
        c = f_g * c + i_g * g_g
        h = o_g * jnp.tanh(c)

        xh_s[t] = x_h                 # for the batched loss epilogue
        imp_r[T - 1 - t] = x_c        # backward imputations stored pre-reversed

    # ---------------- epilogue: batched merge + losses (all 2D views) --------
    x2 = x_ref[...].reshape(TB, D2)
    m2e = m_ref[...].reshape(TB, D2)
    xh2 = xh_s[...].reshape(TB, D2)
    xr2 = imp_r[...].reshape(TB, D2)
    sel = sel_ref[...]                                # (T, T*B) segment-sum mat

    # masked-MAE imputation loss, normalised per timestep and per direction
    err2 = jnp.abs(x2 - xh2) * m2e                                     # (TB,2D)
    num_td = jnp.dot(sel, err2, preferred_element_type=jnp.float32)    # (T, 2D)
    den_td = jnp.dot(sel, m2e, preferred_element_type=jnp.float32)     # (T, 2D)
    num_f = jnp.sum(num_td[:, :D], axis=1, keepdims=True)              # (T, 1)
    num_b = jnp.sum(num_td[:, D:], axis=1, keepdims=True)
    den_f = jnp.sum(den_td[:, :D], axis=1, keepdims=True)
    den_b = jnp.sum(den_td[:, D:], axis=1, keepdims=True)
    loss_f = jnp.sum(num_f / (den_f + 1e-5), keepdims=True)            # (1, 1)
    loss_b = jnp.sum(num_b / (den_b + 1e-5), keepdims=True)

    # merged imputations + consistency loss (Model.merge_ret)
    xc2 = m2e * x2 + (1.0 - m2e) * xh2        # forward-time-order x_c, both dirs
    imp_fwd = xc2[:, :D]                      # forward RITS imputations
    imp_bwd = xr2[:, D:]                      # backward RITS imputations, reversed
    imp_ref[...] = (0.5 * (imp_fwd + imp_bwd)).reshape(T, B, D)

    diff = imp_fwd - imp_bwd
    loss_c = jnp.sum(diff * diff, keepdims=True) * (1.0 / float(TB * D))
    loss_ref[...] = loss_f + loss_b + loss_c


# -----------------------------------------------------------------------------
# Wrapper: one pallas_call; inputs presented time-major and direction-stacked.
# -----------------------------------------------------------------------------
def brits_forward(data, sp):
    fwd, bwd = data["forward"], data["backward"]
    B, T, D = fwd["values"].shape
    H2 = sp["wg_blk"].shape[1]        # 2H
    H8 = sp["bgates"].shape[1]        # 8H

    def tmajor_stack(name):
        # (B, T, D) fwd & bwd -> (T, B, 2D): one cheap XLA concat + transpose.
        return jnp.concatenate(
            [fwd[name].astype(jnp.float32), bwd[name].astype(jnp.float32)],
            axis=-1).transpose(1, 0, 2)

    x_all = tmajor_stack("values")
    m_all = tmajor_stack("masks")
    d_all = tmajor_stack("deltas")

    # Segment-sum selector: one epilogue MXU dot replaces per-timestep reductions.
    sel = (jnp.arange(T)[:, None] == (jnp.arange(T * B)[None, :] // B)
           ).astype(jnp.float32)

    imp_tbd, loss = pl.pallas_call(
        brits_kernel,
        out_shape=[
            jax.ShapeDtypeStruct((T, B, D), jnp.float32),   # merged imputations
            jax.ShapeDtypeStruct((1, 1), jnp.float32),      # total loss
        ],
        scratch_shapes=[
            pltpu.VMEM((T, B, H2), jnp.float32),       # gamma, all t, both dirs
            pltpu.VMEM((T, B, H8), jnp.float32),       # m@Wim + biases, all t
            pltpu.VMEM((T, B, 2 * D), jnp.float32),    # x_h per step (loss epilogue)
            pltpu.VMEM((T, B, 2 * D), jnp.float32),    # x_c stored time-reversed
        ],
    )(x_all, m_all, d_all, sel,
      sp["wg_blk"], sp["bg_cat"], sp["whcat"], sp["br_cat"],
      sp["wix_blk"], sp["wim_blk"], sp["bgates"])

    return {
        "loss": loss[0, 0],
        "imputations": imp_tbd.transpose(1, 0, 2),     # (B, T, D); 4 KB, free
    }


# -----------------------------------------------------------------------------
# Parameter init (PyTorch-shaped, deterministic) and block-diagonal stacking.
# -----------------------------------------------------------------------------
def init_rits_params(key, D, H):
    ks = jax.random.split(key, 8)
    s = 1.0 / math.sqrt(H)
    u = lambda k, shape: jax.random.uniform(k, shape, jnp.float32, -s, s)
    return {
        "wg": u(ks[0], (H, D)),            # TemporalDecay.W
        "bg": u(ks[1], (H,)),              # TemporalDecay.b
        "wr": u(ks[2], (D, H)),            # hist_reg: Linear(H, D).weight
        "br": u(ks[3], (D,)),
        "wih": u(ks[4], (4 * H, 2 * D)),   # LSTMCell([x_c, m]) weight_ih [i;f;g;o]
        "whh": u(ks[5], (4 * H, H)),       # LSTMCell weight_hh
        "bih": u(ks[6], (4 * H,)),
        "bhh": u(ks[7], (4 * H,)),
    }


def _blockdiag(a, b):
    ra, ca = a.shape
    rb, cb = b.shape
    return jnp.concatenate(
        [jnp.concatenate([a, jnp.zeros((ra, cb), jnp.float32)], axis=1),
         jnp.concatenate([jnp.zeros((rb, ca), jnp.float32), b], axis=1)], axis=0)


_GATE_ORDER = ("i", "f", "o", "g")     # sigmoid gates first, tanh (cell) gate last


def _gate_cols(w_t, H):
    # w_t: (K, 4H) with columns in PyTorch LSTM order [i, f, g, o]
    return {"i": w_t[:, 0:H], "f": w_t[:, H:2 * H],
            "g": w_t[:, 2 * H:3 * H], "o": w_t[:, 3 * H:4 * H]}


def stack_brits_params(pf, pb, D, H):
    def stacked_gate_mat(wf_t, wb_t):
        gf, gb = _gate_cols(wf_t, H), _gate_cols(wb_t, H)
        return jnp.concatenate([_blockdiag(gf[g], gb[g]) for g in _GATE_ORDER],
                               axis=1)

    wix_blk = stacked_gate_mat(pf["wih"][:, :D].T, pb["wih"][:, :D].T)   # (2D, 8H)
    wim_blk = stacked_gate_mat(pf["wih"][:, D:].T, pb["wih"][:, D:].T)   # (2D, 8H)
    whh_blk = stacked_gate_mat(pf["whh"].T, pb["whh"].T)                 # (2H, 8H)
    wr_blk = _blockdiag(pf["wr"].T, pb["wr"].T)                          # (2H, 2D)
    whcat = jnp.concatenate([whh_blk, wr_blk], axis=1)                   # (2H, 8H+2D)

    wg_blk = _blockdiag(pf["wg"].T, pb["wg"].T)                          # (2D, 2H)
    bg_cat = jnp.concatenate([pf["bg"], pb["bg"]]).reshape(1, 2 * H)
    br_cat = jnp.concatenate([pf["br"], pb["br"]]).reshape(1, 2 * D)

    def gate_bias(p):
        b = p["bih"] + p["bhh"]
        return {"i": b[0:H], "f": b[H:2 * H], "g": b[2 * H:3 * H], "o": b[3 * H:4 * H]}
    bf, bb = gate_bias(pf), gate_bias(pb)
    bgates = jnp.concatenate(
        [jnp.concatenate([bf[g], bb[g]]) for g in _GATE_ORDER]).reshape(1, 8 * H)

    return {"wg_blk": wg_blk, "bg_cat": bg_cat, "whcat": whcat, "br_cat": br_cat,
            "wix_blk": wix_blk, "wim_blk": wim_blk, "bgates": bgates}


def compute_deltas(masks_btd):
    """Standard BRITS delta recursion (unit time step). masks: [B, T, D]."""
    B, T, D = masks_btd.shape
    deltas = [jnp.zeros((B, D), jnp.float32)]
    for t in range(1, T):
        deltas.append(jnp.ones((B, D), jnp.float32)
                      + (1.0 - masks_btd[:, t - 1]) * deltas[-1])
    return jnp.stack(deltas, axis=1)


if __name__ == "__main__":
    B, T, D, H = 8, 8, 16, 32

    key = jax.random.PRNGKey(0)
    k_val, k_msk, k_pf, k_pb = jax.random.split(key, 4)

    values = jax.random.normal(k_val, (B, T, D), dtype=jnp.float32)
    masks = (jax.random.uniform(k_msk, (B, T, D)) < 0.8).astype(jnp.float32)
    values = values * masks                      # missing entries zeroed, as in BRITS
    deltas_f = compute_deltas(masks)

    values_b = jnp.flip(values, axis=1)
    masks_b = jnp.flip(masks, axis=1)
    deltas_b = compute_deltas(masks_b)

    data = {
        "forward": {"values": values, "masks": masks, "deltas": deltas_f},
        "backward": {"values": values_b, "masks": masks_b, "deltas": deltas_b},
    }

    params_f = init_rits_params(k_pf, D, H)
    params_b = init_rits_params(k_pb, D, H)
    stacked = stack_brits_params(params_f, params_b, D, H)

    out = brits_forward(data, stacked)
    jax.block_until_ready(out)

    assert out["imputations"].shape == (B, T, D)
    assert out["loss"].shape == ()
    assert bool(jnp.isfinite(out["loss"]))
    print("KERNEL_OK")
</pallas_src>

<mosaic_0001>
module attributes {stable_mosaic.version = 11 : i64} {
  func.func @brits_kernel(%arg0: memref<8x8x32xf32, #tpu.memory_space<vmem>>, %arg1: memref<8x8x32xf32, #tpu.memory_space<vmem>>, %arg2: memref<8x8x32xf32, #tpu.memory_space<vmem>>, %arg3: memref<8x64xf32, #tpu.memory_space<vmem>>, %arg4: memref<32x64xf32, #tpu.memory_space<vmem>>, %arg5: memref<1x64xf32, #tpu.memory_space<vmem>>, %arg6: memref<64x288xf32, #tpu.memory_space<vmem>>, %arg7: memref<1x32xf32, #tpu.memory_space<vmem>>, %arg8: memref<32x256xf32, #tpu.memory_space<vmem>>, %arg9: memref<32x256xf32, #tpu.memory_space<vmem>>, %arg10: memref<1x256xf32, #tpu.memory_space<vmem>>, %arg11: memref<8x8x16xf32, #tpu.memory_space<vmem>>, %arg12: memref<1x1xf32, #tpu.memory_space<vmem>>, %arg13: memref<8x8x64xf32, #tpu.memory_space<vmem>>, %arg14: memref<8x8x256xf32, #tpu.memory_space<vmem>>, %arg15: memref<8x8x32xf32, #tpu.memory_space<vmem>>, %arg16: memref<8x8x32xf32, #tpu.memory_space<vmem>>) attributes {dimension_semantics = [], scalar_prefetch = 0 : i64, scratch_operands = 4 : i64, tpu.core_type = #tpu.core_type<tc>} {
    %c0 = arith.constant 0 : index
    %c0_0 = arith.constant 0 : index
    %c0_1 = arith.constant 0 : index
    %0 = vector.load %arg2[%c0, %c0_0, %c0_1] : memref<8x8x32xf32, #tpu.memory_space<vmem>>, vector<8x8x32xf32>
    %1 = vector.shape_cast %0 : vector<8x8x32xf32> to vector<64x32xf32>
    %c0_2 = arith.constant 0 : index
    %c0_3 = arith.constant 0 : index
    %c0_4 = arith.constant 0 : index
    %2 = vector.load %arg1[%c0_2, %c0_3, %c0_4] : memref<8x8x32xf32, #tpu.memory_space<vmem>>, vector<8x8x32xf32>
    %3 = vector.shape_cast %2 : vector<8x8x32xf32> to vector<64x32xf32>
    %c0_5 = arith.constant 0 : index
    %c0_6 = arith.constant 0 : index
    %4 = vector.load %arg4[%c0_5, %c0_6] : memref<32x64xf32, #tpu.memory_space<vmem>>, vector<32x64xf32>
    %cst = arith.constant dense<0.000000e+00> : vector<64x64xf32>
    %5 = tpu.matmul %1, %4, %cst {dimension_numbers = #tpu.dot_dimension_numbers<[1], [0], [0], [1], [0, 0, 1, 1], [], []>} : vector<64x32xf32>, vector<32x64xf32>, vector<64x64xf32> -> vector<64x64xf32>
    %c0_7 = arith.constant 0 : index
    %c0_8 = arith.constant 0 : index
    %6 = vector.load %arg5[%c0_7, %c0_8] : memref<1x64xf32, #tpu.memory_space<vmem>>, vector<1x64xf32>
    %7 = vector.broadcast %6 : vector<1x64xf32> to vector<64x64xf32>
    %8 = arith.addf %5, %7 : vector<64x64xf32>
    %cst_9 = arith.constant 0.000000e+00 : f32
    %9 = vector.broadcast %cst_9 : f32 to vector<64x64xf32>
    %10 = arith.maximumf %8, %9 : vector<64x64xf32>
    %cst_10 = arith.constant 0.000000e+00 : f32
    %11 = vector.broadcast %cst_10 : f32 to vector<64x64xf32>
    %12 = arith.subf %11, %10 : vector<64x64xf32>
    %13 = math.exp %12 : vector<64x64xf32>
    %14 = vector.shape_cast %13 : vector<64x64xf32> to vector<8x8x64xf32>
    %c0_11 = arith.constant 0 : index
    %c0_12 = arith.constant 0 : index
    %c0_13 = arith.constant 0 : index
    %15 = vector.load %arg13[%c0_11, %c0_12, %c0_13] : memref<8x8x64xf32, #tpu.memory_space<vmem>>, vector<8x8x64xf32>
    tpu.vector_store %arg13[%c0_11, %c0_12, %c0_13], %14 {strides = array<i32>} : memref<8x8x64xf32, #tpu.memory_space<vmem>>, vector<8x8x64xf32>,
    %c0_14 = arith.constant 0 : index
    %c0_15 = arith.constant 0 : index
    %16 = vector.load %arg9[%c0_14, %c0_15] : memref<32x256xf32, #tpu.memory_space<vmem>>, vector<32x256xf32>
    %cst_16 = arith.constant dense<0.000000e+00> : vector<64x256xf32>
    %17 = tpu.matmul %3, %16, %cst_16 {dimension_numbers = #tpu.dot_dimension_numbers<[1], [0], [0], [1], [0, 0, 1, 1], [], []>} : vector<64x32xf32>, vector<32x256xf32>, vector<64x256xf32> -> vector<64x256xf32>
    %c0_17 = arith.constant 0 : index
    %c0_18 = arith.constant 0 : index
    %18 = vector.load %arg10[%c0_17, %c0_18] : memref<1x256xf32, #tpu.memory_space<vmem>>, vector<1x256xf32>
    %19 = vector.broadcast %18 : vector<1x256xf32> to vector<64x256xf32>
    %20 = arith.addf %17, %19 : vector<64x256xf32>
    %21 = vector.shape_cast %20 : vector<64x256xf32> to vector<8x8x256xf32>
    %c0_19 = arith.constant 0 : index
    %c0_20 = arith.constant 0 : index
    %c0_21 = arith.constant 0 : index
    %22 = vector.load %arg14[%c0_19, %c0_20, %c0_21] : memref<8x8x256xf32, #tpu.memory_space<vmem>>, vector<8x8x256xf32>
    tpu.vector_store %arg14[%c0_19, %c0_20, %c0_21], %21 {strides = array<i32>} : memref<8x8x256xf32, #tpu.memory_space<vmem>>, vector<8x8x256xf32>,
    %cst_22 = arith.constant 0.000000e+00 : f32
    %23 = vector.broadcast %cst_22 : f32 to vector<8x64xf32>
    %cst_23 = arith.constant 0.000000e+00 : f32
    %24 = vector.broadcast %cst_23 : f32 to vector<8x64xf32>
    %c0_24 = arith.constant 0 : index
    %c0_25 = arith.constant 0 : index
    %c0_26 = arith.constant 0 : index
    %25 = vector.load %arg0[%c0_24, %c0_25, %c0_26] : memref<8x8x32xf32, #tpu.memory_space<vmem>>, vector<1x8x32xf32>
    %26 = vector.shape_cast %25 : vector<1x8x32xf32> to vector<8x32xf32>
    %c0_27 = arith.constant 0 : index
    %c0_28 = arith.constant 0 : index
    %c0_29 = arith.constant 0 : index
    %27 = vector.load %arg1[%c0_27, %c0_28, %c0_29] : memref<8x8x32xf32, #tpu.memory_space<vmem>>, vector<1x8x32xf32>
    %28 = vector.shape_cast %27 : vector<1x8x32xf32> to vector<8x32xf32>
    %c0_30 = arith.constant 0 : index
    %c0_31 = arith.constant 0 : index
    %c0_32 = arith.constant 0 : index
    %29 = vector.load %arg13[%c0_30, %c0_31, %c0_32] : memref<8x8x64xf32, #tpu.memory_space<vmem>>, vector<1x8x64xf32>
    %30 = vector.shape_cast %29 : vector<1x8x64xf32> to vector<8x64xf32>
    %31 = arith.mulf %23, %30 : vector<8x64xf32>
    %c0_33 = arith.constant 0 : index
    %c0_34 = arith.constant 0 : index
    %32 = vector.load %arg6[%c0_33, %c0_34] : memref<64x288xf32, #tpu.memory_space<vmem>>, vector<64x288xf32>
    %cst_35 = arith.constant dense<0.000000e+00> : vector<8x288xf32>
    %33 = tpu.matmul %31, %32, %cst_35 {dimension_numbers = #tpu.dot_dimension_numbers<[1], [0], [0], [1], [0, 0, 1, 1], [], []>} : vector<8x64xf32>, vector<64x288xf32>, vector<8x288xf32> -> vector<8x288xf32>
    %34 = vector.extract_strided_slice %33 {offsets = [0, 0], sizes = [8, 256], strides = [1, 1]} : vector<8x288xf32> to vector<8x256xf32>
    %35 = vector.extract_strided_slice %33 {offsets = [0, 256], sizes = [8, 32], strides = [1, 1]} : vector<8x288xf32> to vector<8x32xf32>
    %c0_36 = arith.constant 0 : index
    %c0_37 = arith.constant 0 : index
    %36 = vector.load %arg7[%c0_36, %c0_37] : memref<1x32xf32, #tpu.memory_space<vmem>>, vector<1x32xf32>
    %37 = vector.broadcast %36 : vector<1x32xf32> to vector<8x32xf32>
    %38 = arith.addf %35, %37 : vector<8x32xf32>
    %39 = arith.mulf %28, %26 : vector<8x32xf32>
    %cst_38 = arith.constant 1.000000e+00 : f32
    %40 = vector.broadcast %cst_38 : f32 to vector<8x32xf32>
    %41 = arith.subf %40, %28 : vector<8x32xf32>
    %42 = arith.mulf %41, %38 : vector<8x32xf32>
    %43 = arith.addf %39, %42 : vector<8x32xf32>
    %c0_39 = arith.constant 0 : index
    %c0_40 = arith.constant 0 : index
    %44 = vector.load %arg8[%c0_39, %c0_40] : memref<32x256xf32, #tpu.memory_space<vmem>>, vector<32x256xf32>
    %cst_41 = arith.constant dense<0.000000e+00> : vector<8x256xf32>
    %45 = tpu.matmul %43, %44, %cst_41 {dimension_numbers = #tpu.dot_dimension_numbers<[1], [0], [0], [1], [0, 0, 1, 1], [], []>} : vector<8x32xf32>, vector<32x256xf32>, vector<8x256xf32> -> vector<8x256xf32>
    %46 = arith.addf %45, %34 : vector<8x256xf32>
    %c0_42 = arith.constant 0 : index
    %c0_43 = arith.constant 0 : index
    %c0_44 = arith.constant 0 : index
    %47 = vector.load %arg14[%c0_42, %c0_43, %c0_44] : memref<8x8x256xf32, #tpu.memory_space<vmem>>, vector<1x8x256xf32>
    %48 = vector.shape_cast %47 : vector<1x8x256xf32> to vector<8x256xf32>
    %49 = arith.addf %46, %48 : vector<8x256xf32>
    %50 = vector.extract_strided_slice %49 {offsets = [0, 0], sizes = [8, 192], strides = [1, 1]} : vector<8x256xf32> to vector<8x192xf32>
    %51 = arith.negf %50 : vector<8x192xf32>
    %52 = math.exp %51 : vector<8x192xf32>
    %cst_45 = arith.constant 1.000000e+00 : f32
    %53 = vector.broadcast %cst_45 : f32 to vector<8x192xf32>
    %54 = arith.addf %53, %52 : vector<8x192xf32>
    %55 = arith.divf %53, %54 : vector<8x192xf32>
    %56 = vector.extract_strided_slice %55 {offsets = [0, 0], sizes = [8, 64], strides = [1, 1]} : vector<8x192xf32> to vector<8x64xf32>
    %57 = vector.extract_strided_slice %55 {offsets = [0, 64], sizes = [8, 64], strides = [1, 1]} : vector<8x192xf32> to vector<8x64xf32>
    %58 = vector.extract_strided_slice %55 {offsets = [0, 128], sizes = [8, 64], strides = [1, 1]} : vector<8x192xf32> to vector<8x64xf32>
    %59 = vector.extract_strided_slice %49 {offsets = [0, 192], sizes = [8, 64], strides = [1, 1]} : vector<8x256xf32> to vector<8x64xf32>
    %60 = math.tanh %59 : vector<8x64xf32>
    %61 = arith.mulf %57, %24 : vector<8x64xf32>
    %62 = arith.mulf %56, %60 : vector<8x64xf32>
    %63 = arith.addf %61, %62 : vector<8x64xf32>
    %64 = math.tanh %63 : vector<8x64xf32>
    %65 = arith.mulf %58, %64 : vector<8x64xf32>
    %c0_46 = arith.constant 0 : index
    %c0_47 = arith.constant 0 : index
    %c0_48 = arith.constant 0 : index
    %66 = vector.load %arg15[%c0_46, %c0_47, %c0_48] : memref<8x8x32xf32, #tpu.memory_space<vmem>>, vector<1x8x32xf32>
    %67 = vector.shape_cast %66 : vector<1x8x32xf32> to vector<8x32xf32>
    %68 = vector.shape_cast %38 : vector<8x32xf32> to vector<1x8x32xf32>
    tpu.vector_store %arg15[%c0_46, %c0_47, %c0_48], %68 {strides = array<i32>} : memref<8x8x32xf32, #tpu.memory_space<vmem>>, vector<1x8x32xf32>,
    %c7 = arith.constant 7 : index
    %c0_49 = arith.constant 0 : index
    %c0_50 = arith.constant 0 : index
    %69 = vector.load %arg16[%c7, %c0_49, %c0_50] : memref<8x8x32xf32, #tpu.memory_space<vmem>>, vector<1x8x32xf32>
    %70 = vector.shape_cast %69 : vector<1x8x32xf32> to vector<8x32xf32>
    %71 = vector.shape_cast %43 : vector<8x32xf32> to vector<1x8x32xf32>
    tpu.vector_store %arg16[%c7, %c0_49, %c0_50], %71 {strides = array<i32>} : memref<8x8x32xf32, #tpu.memory_space<vmem>>, vector<1x8x32xf32>,
    %c1 = arith.constant 1 : index
    %c0_51 = arith.constant 0 : index
    %c0_52 = arith.constant 0 : index
    %72 = vector.load %arg0[%c1, %c0_51, %c0_52] : memref<8x8x32xf32, #tpu.memory_space<vmem>>, vector<1x8x32xf32>
    %73 = vector.shape_cast %72 : vector<1x8x32xf32> to vector<8x32xf32>
    %c1_53 = arith.constant 1 : index
    %c0_54 = arith.constant 0 : index
    %c0_55 = arith.constant 0 : index
    %74 = vector.load %arg1[%c1_53, %c0_54, %c0_55] : memref<8x8x32xf32, #tpu.memory_space<vmem>>, vector<1x8x32xf32>
    %75 = vector.shape_cast %74 : vector<1x8x32xf32> to vector<8x32xf32>
    %c1_56 = arith.constant 1 : index
    %c0_57 = arith.constant 0 : index
    %c0_58 = arith.constant 0 : index
    %76 = vector.load %arg13[%c1_56, %c0_57, %c0_58] : memref<8x8x64xf32, #tpu.memory_space<vmem>>, vector<1x8x64xf32>
    %77 = vector.shape_cast %76 : vector<1x8x64xf32> to vector<8x64xf32>
    %78 = arith.mulf %65, %77 : vector<8x64xf32>
    %c0_59 = arith.constant 0 : index
    %c0_60 = arith.constant 0 : index
    %79 = vector.load %arg6[%c0_59, %c0_60] : memref<64x288xf32, #tpu.memory_space<vmem>>, vector<64x288xf32>
    %cst_61 = arith.constant dense<0.000000e+00> : vector<8x288xf32>
    %80 = tpu.matmul %78, %79, %cst_61 {dimension_numbers = #tpu.dot_dimension_numbers<[1], [0], [0], [1], [0, 0, 1, 1], [], []>} : vector<8x64xf32>, vector<64x288xf32>, vector<8x288xf32> -> vector<8x288xf32>
    %81 = vector.extract_strided_slice %80 {offsets = [0, 0], sizes = [8, 256], strides = [1, 1]} : vector<8x288xf32> to vector<8x256xf32>
    %82 = vector.extract_strided_slice %80 {offsets = [0, 256], sizes = [8, 32], strides = [1, 1]} : vector<8x288xf32> to vector<8x32xf32>
    %c0_62 = arith.constant 0 : index
    %c0_63 = arith.constant 0 : index
    %83 = vector.load %arg7[%c0_62, %c0_63] : memref<1x32xf32, #tpu.memory_space<vmem>>, vector<1x32xf32>
    %84 = vector.broadcast %83 : vector<1x32xf32> to vector<8x32xf32>
    %85 = arith.addf %82, %84 : vector<8x32xf32>
    %86 = arith.mulf %75, %73 : vector<8x32xf32>
    %cst_64 = arith.constant 1.000000e+00 : f32
    %87 = vector.broadcast %cst_64 : f32 to vector<8x32xf32>
    %88 = arith.subf %87, %75 : vector<8x32xf32>
    %89 = arith.mulf %88, %85 : vector<8x32xf32>
    %90 = arith.addf %86, %89 : vector<8x32xf32>
    %c0_65 = arith.constant 0 : index
    %c0_66 = arith.constant 0 : index
    %91 = vector.load %arg8[%c0_65, %c0_66] : memref<32x256xf32, #tpu.memory_space<vmem>>, vector<32x256xf32>
    %cst_67 = arith.constant dense<0.000000e+00> : vector<8x256xf32>
    %92 = tpu.matmul %90, %91, %cst_67 {dimension_numbers = #tpu.dot_dimension_numbers<[1], [0], [0], [1], [0, 0, 1, 1], [], []>} : vector<8x32xf32>, vector<32x256xf32>, vector<8x256xf32> -> vector<8x256xf32>
    %93 = arith.addf %92, %81 : vector<8x256xf32>
    %c1_68 = arith.constant 1 : index
    %c0_69 = arith.constant 0 : index
    %c0_70 = arith.constant 0 : index
    %94 = vector.load %arg14[%c1_68, %c0_69, %c0_70] : memref<8x8x256xf32, #tpu.memory_space<vmem>>, vector<1x8x256xf32>
    %95 = vector.shape_cast %94 : vector<1x8x256xf32> to vector<8x256xf32>
    %96 = arith.addf %93, %95 : vector<8x256xf32>
    %97 = vector.extract_strided_slice %96 {offsets = [0, 0], sizes = [8, 192], strides = [1, 1]} : vector<8x256xf32> to vector<8x192xf32>
    %98 = arith.negf %97 : vector<8x192xf32>
    %99 = math.exp %98 : vector<8x192xf32>
    %cst_71 = arith.constant 1.000000e+00 : f32
    %100 = vector.broadcast %cst_71 : f32 to vector<8x192xf32>
    %101 = arith.addf %100, %99 : vector<8x192xf32>
    %102 = arith.divf %100, %101 : vector<8x192xf32>
    %103 = vector.extract_strided_slice %102 {offsets = [0, 0], sizes = [8, 64], strides = [1, 1]} : vector<8x192xf32> to vector<8x64xf32>
    %104 = vector.extract_strided_slice %102 {offsets = [0, 64], sizes = [8, 64], strides = [1, 1]} : vector<8x192xf32> to vector<8x64xf32>
    %105 = vector.extract_strided_slice %102 {offsets = [0, 128], sizes = [8, 64], strides = [1, 1]} : vector<8x192xf32> to vector<8x64xf32>
    %106 = vector.extract_strided_slice %96 {offsets = [0, 192], sizes = [8, 64], strides = [1, 1]} : vector<8x256xf32> to vector<8x64xf32>
    %107 = math.tanh %106 : vector<8x64xf32>
    %108 = arith.mulf %104, %63 : vector<8x64xf32>
    %109 = arith.mulf %103, %107 : vector<8x64xf32>
    %110 = arith.addf %108, %109 : vector<8x64xf32>
    %111 = math.tanh %110 : vector<8x64xf32>
    %112 = arith.mulf %105, %111 : vector<8x64xf32>
    %c1_72 = arith.constant 1 : index
    %c0_73 = arith.constant 0 : index
    %c0_74 = arith.constant 0 : index
    %113 = vector.load %arg15[%c1_72, %c0_73, %c0_74] : memref<8x8x32xf32, #tpu.memory_space<vmem>>, vector<1x8x32xf32>
    %114 = vector.shape_cast %113 : vector<1x8x32xf32> to vector<8x32xf32>
    %115 = vector.shape_cast %85 : vector<8x32xf32> to vector<1x8x32xf32>
    tpu.vector_store %arg15[%c1_72, %c0_73, %c0_74], %115 {strides = array<i32>} : memref<8x8x32xf32, #tpu.memory_space<vmem>>, vector<1x8x32xf32>,
    %c6 = arith.constant 6 : index
    %c0_75 = arith.constant 0 : index
    %c0_76 = arith.constant 0 : index
    %116 = vector.load %arg16[%c6, %c0_75, %c0_76] : memref<8x8x32xf32, #tpu.memory_space<vmem>>, vector<1x8x32xf32>
    %117 = vector.shape_cast %116 : vector<1x8x32xf32> to vector<8x32xf32>
    %118 = vector.shape_cast %90 : vector<8x32xf32> to vector<1x8x32xf32>
    tpu.vector_store %arg16[%c6, %c0_75, %c0_76], %118 {strides = array<i32>} : memref<8x8x32xf32, #tpu.memory_space<vmem>>, vector<1x8x32xf32>,
    %c2 = arith.constant 2 : index
    %c0_77 = arith.constant 0 : index
    %c0_78 = arith.constant 0 : index
    %119 = vector.load %arg0[%c2, %c0_77, %c0_78] : memref<8x8x32xf32, #tpu.memory_space<vmem>>, vector<1x8x32xf32>
    %120 = vector.shape_cast %119 : vector<1x8x32xf32> to vector<8x32xf32>
    %c2_79 = arith.constant 2 : index
    %c0_80 = arith.constant 0 : index
    %c0_81 = arith.constant 0 : index
    %121 = vector.load %arg1[%c2_79, %c0_80, %c0_81] : memref<8x8x32xf32, #tpu.memory_space<vmem>>, vector<1x8x32xf32>
    %122 = vector.shape_cast %121 : vector<1x8x32xf32> to vector<8x32xf32>
    %c2_82 = arith.constant 2 : index
    %c0_83 = arith.constant 0 : index
    %c0_84 = arith.constant 0 : index
    %123 = vector.load %arg13[%c2_82, %c0_83, %c0_84] : memref<8x8x64xf32, #tpu.memory_space<vmem>>, vector<1x8x64xf32>
    %124 = vector.shape_cast %123 : vector<1x8x64xf32> to vector<8x64xf32>
    %125 = arith.mulf %112, %124 : vector<8x64xf32>
    %c0_85 = arith.constant 0 : index
    %c0_86 = arith.constant 0 : index
    %126 = vector.load %arg6[%c0_85, %c0_86] : memref<64x288xf32, #tpu.memory_space<vmem>>, vector<64x288xf32>
    %cst_87 = arith.constant dense<0.000000e+00> : vector<8x288xf32>
    %127 = tpu.matmul %125, %126, %cst_87 {dimension_numbers = #tpu.dot_dimension_numbers<[1], [0], [0], [1], [0, 0, 1, 1], [], []>} : vector<8x64xf32>, vector<64x288xf32>, vector<8x288xf32> -> vector<8x288xf32>
    %128 = vector.extract_strided_slice %127 {offsets = [0, 0], sizes = [8, 256], strides = [1, 1]} : vector<8x288xf32> to vector<8x256xf32>
    %129 = vector.extract_strided_slice %127 {offsets = [0, 256], sizes = [8, 32], strides = [1, 1]} : vector<8x288xf32> to vector<8x32xf32>
    %c0_88 = arith.constant 0 : index
    %c0_89 = arith.constant 0 : index
    %130 = vector.load %arg7[%c0_88, %c0_89] : memref<1x32xf32, #tpu.memory_space<vmem>>, vector<1x32xf32>
    %131 = vector.broadcast %130 : vector<1x32xf32> to vector<8x32xf32>
    %132 = arith.addf %129, %131 : vector<8x32xf32>
    %133 = arith.mulf %122, %120 : vector<8x32xf32>
    %cst_90 = arith.constant 1.000000e+00 : f32
    %134 = vector.broadcast %cst_90 : f32 to vector<8x32xf32>
    %135 = arith.subf %134, %122 : vector<8x32xf32>
    %136 = arith.mulf %135, %132 : vector<8x32xf32>
    %137 = arith.addf %133, %136 : vector<8x32xf32>
    %c0_91 = arith.constant 0 : index
    %c0_92 = arith.constant 0 : index
    %138 = vector.load %arg8[%c0_91, %c0_92] : memref<32x256xf32, #tpu.memory_space<vmem>>, vector<32x256xf32>
    %cst_93 = arith.constant dense<0.000000e+00> : vector<8x256xf32>
    %139 = tpu.matmul %137, %138, %cst_93 {dimension_numbers = #tpu.dot_dimension_numbers<[1], [0], [0], [1], [0, 0, 1, 1], [], []>} : vector<8x32xf32>, vector<32x256xf32>, vector<8x256xf32> -> vector<8x256xf32>
    %140 = arith.addf %139, %128 : vector<8x256xf32>
    %c2_94 = arith.constant 2 : index
    %c0_95 = arith.constant 0 : index
    %c0_96 = arith.constant 0 : index
    %141 = vector.load %arg14[%c2_94, %c0_95, %c0_96] : memref<8x8x256xf32, #tpu.memory_space<vmem>>, vector<1x8x256xf32>
    %142 = vector.shape_cast %141 : vector<1x8x256xf32> to vector<8x256xf32>
    %143 = arith.addf %140, %142 : vector<8x256xf32>
    %144 = vector.extract_strided_slice %143 {offsets = [0, 0], sizes = [8, 192], strides = [1, 1]} : vector<8x256xf32> to vector<8x192xf32>
    %145 = arith.negf %144 : vector<8x192xf32>
    %146 = math.exp %145 : vector<8x192xf32>
    %cst_97 = arith.constant 1.000000e+00 : f32
    %147 = vector.broadcast %cst_97 : f32 to vector<8x192xf32>
    %148 = arith.addf %147, %146 : vector<8x192xf32>
    %149 = arith.divf %147, %148 : vector<8x192xf32>
    %150 = vector.extract_strided_slice %149 {offsets = [0, 0], sizes = [8, 64], strides = [1, 1]} : vector<8x192xf32> to vector<8x64xf32>
    %151 = vector.extract_strided_slice %149 {offsets = [0, 64], sizes = [8, 64], strides = [1, 1]} : vector<8x192xf32> to vector<8x64xf32>
    %152 = vector.extract_strided_slice %149 {offsets = [0, 128], sizes = [8, 64], strides = [1, 1]} : vector<8x192xf32> to vector<8x64xf32>
    %153 = vector.extract_strided_slice %143 {offsets = [0, 192], sizes = [8, 64], strides = [1, 1]} : vector<8x256xf32> to vector<8x64xf32>
    %154 = math.tanh %153 : vector<8x64xf32>
    %155 = arith.mulf %151, %110 : vector<8x64xf32>
    %156 = arith.mulf %150, %154 : vector<8x64xf32>
    %157 = arith.addf %155, %156 : vector<8x64xf32>
    %158 = math.tanh %157 : vector<8x64xf32>
    %159 = arith.mulf %152, %158 : vector<8x64xf32>
    %c2_98 = arith.constant 2 : index
    %c0_99 = arith.constant 0 : index
    %c0_100 = arith.constant 0 : index
    %160 = vector.load %arg15[%c2_98, %c0_99, %c0_100] : memref<8x8x32xf32, #tpu.memory_space<vmem>>, vector<1x8x32xf32>
    %161 = vector.shape_cast %160 : vector<1x8x32xf32> to vector<8x32xf32>
    %162 = vector.shape_cast %132 : vector<8x32xf32> to vector<1x8x32xf32>
    tpu.vector_store %arg15[%c2_98, %c0_99, %c0_100], %162 {strides = array<i32>} : memref<8x8x32xf32, #tpu.memory_space<vmem>>, vector<1x8x32xf32>,
    %c5 = arith.constant 5 : index
    %c0_101 = arith.constant 0 : index
    %c0_102 = arith.constant 0 : index
    %163 = vector.load %arg16[%c5, %c0_101, %c0_102] : memref<8x8x32xf32, #tpu.memory_space<vmem>>, vector<1x8x32xf32>
    %164 = vector.shape_cast %163 : vector<1x8x32xf32> to vector<8x32xf32>
    %165 = vector.shape_cast %137 : vector<8x32xf32> to vector<1x8x32xf32>
    tpu.vector_store %arg16[%c5, %c0_101, %c0_102], %165 {strides = array<i32>} : memref<8x8x32xf32, #tpu.memory_space<vmem>>, vector<1x8x32xf32>,
    %c3 = arith.constant 3 : index
    %c0_103 = arith.constant 0 : index
    %c0_104 = arith.constant 0 : index
    %166 = vector.load %arg0[%c3, %c0_103, %c0_104] : memref<8x8x32xf32, #tpu.memory_space<vmem>>, vector<1x8x32xf32>
    %167 = vector.shape_cast %166 : vector<1x8x32xf32> to vector<8x32xf32>
    %c3_105 = arith.constant 3 : index
    %c0_106 = arith.constant 0 : index
    %c0_107 = arith.constant 0 : index
    %168 = vector.load %arg1[%c3_105, %c0_106, %c0_107] : memref<8x8x32xf32, #tpu.memory_space<vmem>>, vector<1x8x32xf32>
    %169 = vector.shape_cast %168 : vector<1x8x32xf32> to vector<8x32xf32>
    %c3_108 = arith.constant 3 : index
    %c0_109 = arith.constant 0 : index
    %c0_110 = arith.constant 0 : index
    %170 = vector.load %arg13[%c3_108, %c0_109, %c0_110] : memref<8x8x64xf32, #tpu.memory_space<vmem>>, vector<1x8x64xf32>
    %171 = vector.shape_cast %170 : vector<1x8x64xf32> to vector<8x64xf32>
    %172 = arith.mulf %159, %171 : vector<8x64xf32>
    %c0_111 = arith.constant 0 : index
    %c0_112 = arith.constant 0 : index
    %173 = vector.load %arg6[%c0_111, %c0_112] : memref<64x288xf32, #tpu.memory_space<vmem>>, vector<64x288xf32>
    %cst_113 = arith.constant dense<0.000000e+00> : vector<8x288xf32>
    %174 = tpu.matmul %172, %173, %cst_113 {dimension_numbers = #tpu.dot_dimension_numbers<[1], [0], [0], [1], [0, 0, 1, 1], [], []>} : vector<8x64xf32>, vector<64x288xf32>, vector<8x288xf32> -> vector<8x288xf32>
    %175 = vector.extract_strided_slice %174 {offsets = [0, 0], sizes = [8, 256], strides = [1, 1]} : vector<8x288xf32> to vector<8x256xf32>
    %176 = vector.extract_strided_slice %174 {offsets = [0, 256], sizes = [8, 32], strides = [1, 1]} : vector<8x288xf32> to vector<8x32xf32>
    %c0_114 = arith.constant 0 : index
    %c0_115 = arith.constant 0 : index
    %177 = vector.load %arg7[%c0_114, %c0_115] : memref<1x32xf32, #tpu.memory_space<vmem>>, vector<1x32xf32>
    %178 = vector.broadcast %177 : vector<1x32xf32> to vector<8x32xf32>
    %179 = arith.addf %176, %178 : vector<8x32xf32>
    %180 = arith.mulf %169, %167 : vector<8x32xf32>
    %cst_116 = arith.constant 1.000000e+00 : f32
    %181 = vector.broadcast %cst_116 : f32 to vector<8x32xf32>
    %182 = arith.subf %181, %169 : vector<8x32xf32>
    %183 = arith.mulf %182, %179 : vector<8x32xf32>
    %184 = arith.addf %180, %183 : vector<8x32xf32>
    %c0_117 = arith.constant 0 : index
    %c0_118 = arith.constant 0 : index
    %185 = vector.load %arg8[%c0_117, %c0_118] : memref<32x256xf32, #tpu.memory_space<vmem>>, vector<32x256xf32>
    %cst_119 = arith.constant dense<0.000000e+00> : vector<8x256xf32>
    %186 = tpu.matmul %184, %185, %cst_119 {dimension_numbers = #tpu.dot_dimension_numbers<[1], [0], [0], [1], [0, 0, 1, 1], [], []>} : vector<8x32xf32>, vector<32x256xf32>, vector<8x256xf32> -> vector<8x256xf32>
    %187 = arith.addf %186, %175 : vector<8x256xf32>
    %c3_120 = arith.constant 3 : index
    %c0_121 = arith.constant 0 : index
    %c0_122 = arith.constant 0 : index
    %188 = vector.load %arg14[%c3_120, %c0_121, %c0_122] : memref<8x8x256xf32, #tpu.memory_space<vmem>>, vector<1x8x256xf32>
    %189 = vector.shape_cast %188 : vector<1x8x256xf32> to vector<8x256xf32>
    %190 = arith.addf %187, %189 : vector<8x256xf32>
    %191 = vector.extract_strided_slice %190 {offsets = [0, 0], sizes = [8, 192], strides = [1, 1]} : vector<8x256xf32> to vector<8x192xf32>
    %192 = arith.negf %191 : vector<8x192xf32>
    %193 = math.exp %192 : vector<8x192xf32>
    %cst_123 = arith.constant 1.000000e+00 : f32
    %194 = vector.broadcast %cst_123 : f32 to vector<8x192xf32>
    %195 = arith.addf %194, %193 : vector<8x192xf32>
    %196 = arith.divf %194, %195 : vector<8x192xf32>
    %197 = vector.extract_strided_slice %196 {offsets = [0, 0], sizes = [8, 64], strides = [1, 1]} : vector<8x192xf32> to vector<8x64xf32>
    %198 = vector.extract_strided_slice %196 {offsets = [0, 64], sizes = [8, 64], strides = [1, 1]} : vector<8x192xf32> to vector<8x64xf32>
    %199 = vector.extract_strided_slice %196 {offsets = [0, 128], sizes = [8, 64], strides = [1, 1]} : vector<8x192xf32> to vector<8x64xf32>
    %200 = vector.extract_strided_slice %190 {offsets = [0, 192], sizes = [8, 64], strides = [1, 1]} : vector<8x256xf32> to vector<8x64xf32>
    %201 = math.tanh %200 : vector<8x64xf32>
    %202 = arith.mulf %198, %157 : vector<8x64xf32>
    %203 = arith.mulf %197, %201 : vector<8x64xf32>
    %204 = arith.addf %202, %203 : vector<8x64xf32>
    %205 = math.tanh %204 : vector<8x64xf32>
    %206 = arith.mulf %199, %205 : vector<8x64xf32>
    %c3_124 = arith.constant 3 : index
    %c0_125 = arith.constant 0 : index
    %c0_126 = arith.constant 0 : index
    %207 = vector.load %arg15[%c3_124, %c0_125, %c0_126] : memref<8x8x32xf32, #tpu.memory_space<vmem>>, vector<1x8x32xf32>
    %208 = vector.shape_cast %207 : vector<1x8x32xf32> to vector<8x32xf32>
    %209 = vector.shape_cast %179 : vector<8x32xf32> to vector<1x8x32xf32>
    tpu.vector_store %arg15[%c3_124, %c0_125, %c0_126], %209 {strides = array<i32>} : memref<8x8x32xf32, #tpu.memory_space<vmem>>, vector<1x8x32xf32>,
    %c4 = arith.constant 4 : index
    %c0_127 = arith.constant 0 : index
    %c0_128 = arith.constant 0 : index
    %210 = vector.load %arg16[%c4, %c0_127, %c0_128] : memref<8x8x32xf32, #tpu.memory_space<vmem>>, vector<1x8x32xf32>
    %211 = vector.shape_cast %210 : vector<1x8x32xf32> to vector<8x32xf32>
    %212 = vector.shape_cast %184 : vector<8x32xf32> to vector<1x8x32xf32>
    tpu.vector_store %arg16[%c4, %c0_127, %c0_128], %212 {strides = array<i32>} : memref<8x8x32xf32, #tpu.memory_space<vmem>>, vector<1x8x32xf32>,
    %c4_129 = arith.constant 4 : index
    %c0_130 = arith.constant 0 : index
    %c0_131 = arith.constant 0 : index
    %213 = vector.load %arg0[%c4_129, %c0_130, %c0_131] : memref<8x8x32xf32, #tpu.memory_space<vmem>>, vector<1x8x32xf32>
    %214 = vector.shape_cast %213 : vector<1x8x32xf32> to vector<8x32xf32>
    %c4_132 = arith.constant 4 : index
    %c0_133 = arith.constant 0 : index
    %c0_134 = arith.constant 0 : index
    %215 = vector.load %arg1[%c4_132, %c0_133, %c0_134] : memref<8x8x32xf32, #tpu.memory_space<vmem>>, vector<1x8x32xf32>
    %216 = vector.shape_cast %215 : vector<1x8x32xf32> to vector<8x32xf32>
    %c4_135 = arith.constant 4 : index
    %c0_136 = arith.constant 0 : index
    %c0_137 = arith.constant 0 : index
    %217 = vector.load %arg13[%c4_135, %c0_136, %c0_137] : memref<8x8x64xf32, #tpu.memory_space<vmem>>, vector<1x8x64xf32>
    %218 = vector.shape_cast %217 : vector<1x8x64xf32> to vector<8x64xf32>
    %219 = arith.mulf %206, %218 : vector<8x64xf32>
    %c0_138 = arith.constant 0 : index
    %c0_139 = arith.constant 0 : index
    %220 = vector.load %arg6[%c0_138, %c0_139] : memref<64x288xf32, #tpu.memory_space<vmem>>, vector<64x288xf32>
    %cst_140 = arith.constant dense<0.000000e+00> : vector<8x288xf32>
    %221 = tpu.matmul %219, %220, %cst_140 {dimension_numbers = #tpu.dot_dimension_numbers<[1], [0], [0], [1], [0, 0, 1, 1], [], []>} : vector<8x64xf32>, vector<64x288xf32>, vector<8x288xf32> -> vector<8x288xf32>
    %222 = vector.extract_strided_slice %221 {offsets = [0, 0], sizes = [8, 256], strides = [1, 1]} : vector<8x288xf32> to vector<8x256xf32>
    %223 = vector.extract_strided_slice %221 {offsets = [0, 256], sizes = [8, 32], strides = [1, 1]} : vector<8x288xf32> to vector<8x32xf32>
    %c0_141 = arith.constant 0 : index
    %c0_142 = arith.constant 0 : index
    %224 = vector.load %arg7[%c0_141, %c0_142] : memref<1x32xf32, #tpu.memory_space<vmem>>, vector<1x32xf32>
    %225 = vector.broadcast %224 : vector<1x32xf32> to vector<8x32xf32>
    %226 = arith.addf %223, %225 : vector<8x32xf32>
    %227 = arith.mulf %216, %214 : vector<8x32xf32>
    %cst_143 = arith.constant 1.000000e+00 : f32
    %228 = vector.broadcast %cst_143 : f32 to vector<8x32xf32>
    %229 = arith.subf %228, %216 : vector<8x32xf32>
    %230 = arith.mulf %229, %226 : vector<8x32xf32>
    %231 = arith.addf %227, %230 : vector<8x32xf32>
    %c0_144 = arith.constant 0 : index
    %c0_145 = arith.constant 0 : index
    %232 = vector.load %arg8[%c0_144, %c0_145] : memref<32x256xf32, #tpu.memory_space<vmem>>, vector<32x256xf32>
    %cst_146 = arith.constant dense<0.000000e+00> : vector<8x256xf32>
    %233 = tpu.matmul %231, %232, %cst_146 {dimension_numbers = #tpu.dot_dimension_numbers<[1], [0], [0], [1], [0, 0, 1, 1], [], []>} : vector<8x32xf32>, vector<32x256xf32>, vector<8x256xf32> -> vector<8x256xf32>
    %234 = arith.addf %233, %222 : vector<8x256xf32>
    %c4_147 = arith.constant 4 : index
    %c0_148 = arith.constant 0 : index
    %c0_149 = arith.constant 0 : index
    %235 = vector.load %arg14[%c4_147, %c0_148, %c0_149] : memref<8x8x256xf32, #tpu.memory_space<vmem>>, vector<1x8x256xf32>
    %236 = vector.shape_cast %235 : vector<1x8x256xf32> to vector<8x256xf32>
    %237 = arith.addf %234, %236 : vector<8x256xf32>
    %238 = vector.extract_strided_slice %237 {offsets = [0, 0], sizes = [8, 192], strides = [1, 1]} : vector<8x256xf32> to vector<8x192xf32>
    %239 = arith.negf %238 : vector<8x192xf32>
    %240 = math.exp %239 : vector<8x192xf32>
    %cst_150 = arith.constant 1.000000e+00 : f32
    %241 = vector.broadcast %cst_150 : f32 to vector<8x192xf32>
    %242 = arith.addf %241, %240 : vector<8x192xf32>
    %243 = arith.divf %241, %242 : vector<8x192xf32>
    %244 = vector.extract_strided_slice %243 {offsets = [0, 0], sizes = [8, 64], strides = [1, 1]} : vector<8x192xf32> to vector<8x64xf32>
    %245 = vector.extract_strided_slice %243 {offsets = [0, 64], sizes = [8, 64], strides = [1, 1]} : vector<8x192xf32> to vector<8x64xf32>
    %246 = vector.extract_strided_slice %243 {offsets = [0, 128], sizes = [8, 64], strides = [1, 1]} : vector<8x192xf32> to vector<8x64xf32>
    %247 = vector.extract_strided_slice %237 {offsets = [0, 192], sizes = [8, 64], strides = [1, 1]} : vector<8x256xf32> to vector<8x64xf32>
    %248 = math.tanh %247 : vector<8x64xf32>
    %249 = arith.mulf %245, %204 : vector<8x64xf32>
    %250 = arith.mulf %244, %248 : vector<8x64xf32>
    %251 = arith.addf %249, %250 : vector<8x64xf32>
    %252 = math.tanh %251 : vector<8x64xf32>
    %253 = arith.mulf %246, %252 : vector<8x64xf32>
    %c4_151 = arith.constant 4 : index
    %c0_152 = arith.constant 0 : index
    %c0_153 = arith.constant 0 : index
    %254 = vector.load %arg15[%c4_151, %c0_152, %c0_153] : memref<8x8x32xf32, #tpu.memory_space<vmem>>, vector<1x8x32xf32>
    %255 = vector.shape_cast %254 : vector<1x8x32xf32> to vector<8x32xf32>
    %256 = vector.shape_cast %226 : vector<8x32xf32> to vector<1x8x32xf32>
    tpu.vector_store %arg15[%c4_151, %c0_152, %c0_153], %256 {strides = array<i32>} : memref<8x8x32xf32, #tpu.memory_space<vmem>>, vector<1x8x32xf32>,
    %c3_154 = arith.constant 3 : index
    %c0_155 = arith.constant 0 : index
    %c0_156 = arith.constant 0 : index
    %257 = vector.load %arg16[%c3_154, %c0_155, %c0_156] : memref<8x8x32xf32, #tpu.memory_space<vmem>>, vector<1x8x32xf32>
    %258 = vector.shape_cast %257 : vector<1x8x32xf32> to vector<8x32xf32>
    %259 = vector.shape_cast %231 : vector<8x32xf32> to vector<1x8x32xf32>
    tpu.vector_store %arg16[%c3_154, %c0_155, %c0_156], %259 {strides = array<i32>} : memref<8x8x32xf32, #tpu.memory_space<vmem>>, vector<1x8x32xf32>,
    %c5_157 = arith.constant 5 : index
    %c0_158 = arith.constant 0 : index
    %c0_159 = arith.constant 0 : index
    %260 = vector.load %arg0[%c5_157, %c0_158, %c0_159] : memref<8x8x32xf32, #tpu.memory_space<vmem>>, vector<1x8x32xf32>
    %261 = vector.shape_cast %260 : vector<1x8x32xf32> to vector<8x32xf32>
    %c5_160 = arith.constant 5 : index
    %c0_161 = arith.constant 0 : index
    %c0_162 = arith.constant 0 : index
    %262 = vector.load %arg1[%c5_160, %c0_161, %c0_162] : memref<8x8x32xf32, #tpu.memory_space<vmem>>, vector<1x8x32xf32>
    %263 = vector.shape_cast %262 : vector<1x8x32xf32> to vector<8x32xf32>
    %c5_163 = arith.constant 5 : index
    %c0_164 = arith.constant 0 : index
    %c0_165 = arith.constant 0 : index
    %264 = vector.load %arg13[%c5_163, %c0_164, %c0_165] : memref<8x8x64xf32, #tpu.memory_space<vmem>>, vector<1x8x64xf32>
    %265 = vector.shape_cast %264 : vector<1x8x64xf32> to vector<8x64xf32>
    %266 = arith.mulf %253, %265 : vector<8x64xf32>
    %c0_166 = arith.constant 0 : index
    %c0_167 = arith.constant 0 : index
    %267 = vector.load %arg6[%c0_166, %c0_167] : memref<64x288xf32, #tpu.memory_space<vmem>>, vector<64x288xf32>
    %cst_168 = arith.constant dense<0.000000e+00> : vector<8x288xf32>
    %268 = tpu.matmul %266, %267, %cst_168 {dimension_numbers = #tpu.dot_dimension_numbers<[1], [0], [0], [1], [0, 0, 1, 1], [], []>} : vector<8x64xf32>, vector<64x288xf32>, vector<8x288xf32> -> vector<8x288xf32>
    %269 = vector.extract_strided_slice %268 {offsets = [0, 0], sizes = [8, 256], strides = [1, 1]} : vector<8x288xf32> to vector<8x256xf32>
    %270 = vector.extract_strided_slice %268 {offsets = [0, 256], sizes = [8, 32], strides = [1, 1]} : vector<8x288xf32> to vector<8x32xf32>
    %c0_169 = arith.constant 0 : index
    %c0_170 = arith.constant 0 : index
    %271 = vector.load %arg7[%c0_169, %c0_170] : memref<1x32xf32, #tpu.memory_space<vmem>>, vector<1x32xf32>
    %272 = vector.broadcast %271 : vector<1x32xf32> to vector<8x32xf32>
    %273 = arith.addf %270, %272 : vector<8x32xf32>
    %274 = arith.mulf %263, %261 : vector<8x32xf32>
    %cst_171 = arith.constant 1.000000e+00 : f32
    %275 = vector.broadcast %cst_171 : f32 to vector<8x32xf32>
    %276 = arith.subf %275, %263 : vector<8x32xf32>
    %277 = arith.mulf %276, %273 : vector<8x32xf32>
    %278 = arith.addf %274, %277 : vector<8x32xf32>
    %c0_172 = arith.constant 0 : index
    %c0_173 = arith.constant 0 : index
    %279 = vector.load %arg8[%c0_172, %c0_173] : memref<32x256xf32, #tpu.memory_space<vmem>>, vector<32x256xf32>
    %cst_174 = arith.constant dense<0.000000e+00> : vector<8x256xf32>
    %280 = tpu.matmul %278, %279, %cst_174 {dimension_numbers = #tpu.dot_dimension_numbers<[1], [0], [0], [1], [0, 0, 1, 1], [], []>} : vector<8x32xf32>, vector<32x256xf32>, vector<8x256xf32> -> vector<8x256xf32>
    %281 = arith.addf %280, %269 : vector<8x256xf32>
    %c5_175 = arith.constant 5 : index
    %c0_176 = arith.constant 0 : index
    %c0_177 = arith.constant 0 : index
    %282 = vector.load %arg14[%c5_175, %c0_176, %c0_177] : memref<8x8x256xf32, #tpu.memory_space<vmem>>, vector<1x8x256xf32>
    %283 = vector.shape_cast %282 : vector<1x8x256xf32> to vector<8x256xf32>
    %284 = arith.addf %281, %283 : vector<8x256xf32>
    %285 = vector.extract_strided_slice %284 {offsets = [0, 0], sizes = [8, 192], strides = [1, 1]} : vector<8x256xf32> to vector<8x192xf32>
    %286 = arith.negf %285 : vector<8x192xf32>
    %287 = math.exp %286 : vector<8x192xf32>
    %cst_178 = arith.constant 1.000000e+00 : f32
    %288 = vector.broadcast %cst_178 : f32 to vector<8x192xf32>
    %289 = arith.addf %288, %287 : vector<8x192xf32>
    %290 = arith.divf %288, %289 : vector<8x192xf32>
    %291 = vector.extract_strided_slice %290 {offsets = [0, 0], sizes = [8, 64], strides = [1, 1]} : vector<8x192xf32> to vector<8x64xf32>
    %292 = vector.extract_strided_slice %290 {offsets = [0, 64], sizes = [8, 64], strides = [1, 1]} : vector<8x192xf32> to vector<8x64xf32>
    %293 = vector.extract_strided_slice %290 {offsets = [0, 128], sizes = [8, 64], strides = [1, 1]} : vector<8x192xf32> to vector<8x64xf32>
    %294 = vector.extract_strided_slice %284 {offsets = [0, 192], sizes = [8, 64], strides = [1, 1]} : vector<8x256xf32> to vector<8x64xf32>
    %295 = math.tanh %294 : vector<8x64xf32>
    %296 = arith.mulf %292, %251 : vector<8x64xf32>
    %297 = arith.mulf %291, %295 : vector<8x64xf32>
    %298 = arith.addf %296, %297 : vector<8x64xf32>
    %299 = math.tanh %298 : vector<8x64xf32>
    %300 = arith.mulf %293, %299 : vector<8x64xf32>
    %c5_179 = arith.constant 5 : index
    %c0_180 = arith.constant 0 : index
    %c0_181 = arith.constant 0 : index
    %301 = vector.load %arg15[%c5_179, %c0_180, %c0_181] : memref<8x8x32xf32, #tpu.memory_space<vmem>>, vector<1x8x32xf32>
    %302 = vector.shape_cast %301 : vector<1x8x32xf32> to vector<8x32xf32>
    %303 = vector.shape_cast %273 : vector<8x32xf32> to vector<1x8x32xf32>
    tpu.vector_store %arg15[%c5_179, %c0_180, %c0_181], %303 {strides = array<i32>} : memref<8x8x32xf32, #tpu.memory_space<vmem>>, vector<1x8x32xf32>,
    %c2_182 = arith.constant 2 : index
    %c0_183 = arith.constant 0 : index
    %c0_184 = arith.constant 0 : index
    %304 = vector.load %arg16[%c2_182, %c0_183, %c0_184] : memref<8x8x32xf32, #tpu.memory_space<vmem>>, vector<1x8x32xf32>
    %305 = vector.shape_cast %304 : vector<1x8x32xf32> to vector<8x32xf32>
    %306 = vector.shape_cast %278 : vector<8x32xf32> to vector<1x8x32xf32>
    tpu.vector_store %arg16[%c2_182, %c0_183, %c0_184], %306 {strides = array<i32>} : memref<8x8x32xf32, #tpu.memory_space<vmem>>, vector<1x8x32xf32>,
    %c6_185 = arith.constant 6 : index
    %c0_186 = arith.constant 0 : index
    %c0_187 = arith.constant 0 : index
    %307 = vector.load %arg0[%c6_185, %c0_186, %c0_187] : memref<8x8x32xf32, #tpu.memory_space<vmem>>, vector<1x8x32xf32>
    %308 = vector.shape_cast %307 : vector<1x8x32xf32> to vector<8x32xf32>
    %c6_188 = arith.constant 6 : index
    %c0_189 = arith.constant 0 : index
    %c0_190 = arith.constant 0 : index
    %309 = vector.load %arg1[%c6_188, %c0_189, %c0_190] : memref<8x8x32xf32, #tpu.memory_space<vmem>>, vector<1x8x32xf32>
    %310 = vector.shape_cast %309 : vector<1x8x32xf32> to vector<8x32xf32>
    %c6_191 = arith.constant 6 : index
    %c0_192 = arith.constant 0 : index
    %c0_193 = arith.constant 0 : index
    %311 = vector.load %arg13[%c6_191, %c0_192, %c0_193] : memref<8x8x64xf32, #tpu.memory_space<vmem>>, vector<1x8x64xf32>
    %312 = vector.shape_cast %311 : vector<1x8x64xf32> to vector<8x64xf32>
    %313 = arith.mulf %300, %312 : vector<8x64xf32>
    %c0_194 = arith.constant 0 : index
    %c0_195 = arith.constant 0 : index
    %314 = vector.load %arg6[%c0_194, %c0_195] : memref<64x288xf32, #tpu.memory_space<vmem>>, vector<64x288xf32>
    %cst_196 = arith.constant dense<0.000000e+00> : vector<8x288xf32>
    %315 = tpu.matmul %313, %314, %cst_196 {dimension_numbers = #tpu.dot_dimension_numbers<[1], [0], [0], [1], [0, 0, 1, 1], [], []>} : vector<8x64xf32>, vector<64x288xf32>, vector<8x288xf32> -> vector<8x288xf32>
    %316 = vector.extract_strided_slice %315 {offsets = [0, 0], sizes = [8, 256], strides = [1, 1]} : vector<8x288xf32> to vector<8x256xf32>
    %317 = vector.extract_strided_slice %315 {offsets = [0, 256], sizes = [8, 32], strides = [1, 1]} : vector<8x288xf32> to vector<8x32xf32>
    %c0_197 = arith.constant 0 : index
    %c0_198 = arith.constant 0 : index
    %318 = vector.load %arg7[%c0_197, %c0_198] : memref<1x32xf32, #tpu.memory_space<vmem>>, vector<1x32xf32>
    %319 = vector.broadcast %318 : vector<1x32xf32> to vector<8x32xf32>
    %320 = arith.addf %317, %319 : vector<8x32xf32>
    %321 = arith.mulf %310, %308 : vector<8x32xf32>
    %cst_199 = arith.constant 1.000000e+00 : f32
    %322 = vector.broadcast %cst_199 : f32 to vector<8x32xf32>
    %323 = arith.subf %322, %310 : vector<8x32xf32>
    %324 = arith.mulf %323, %320 : vector<8x32xf32>
    %325 = arith.addf %321, %324 : vector<8x32xf32>
    %c0_200 = arith.constant 0 : index
    %c0_201 = arith.constant 0 : index
    %326 = vector.load %arg8[%c0_200, %c0_201] : memref<32x256xf32, #tpu.memory_space<vmem>>, vector<32x256xf32>
    %cst_202 = arith.constant dense<0.000000e+00> : vector<8x256xf32>
    %327 = tpu.matmul %325, %326, %cst_202 {dimension_numbers = #tpu.dot_dimension_numbers<[1], [0], [0], [1], [0, 0, 1, 1], [], []>} : vector<8x32xf32>, vector<32x256xf32>, vector<8x256xf32> -> vector<8x256xf32>
    %328 = arith.addf %327, %316 : vector<8x256xf32>
    %c6_203 = arith.constant 6 : index
    %c0_204 = arith.constant 0 : index
    %c0_205 = arith.constant 0 : index
    %329 = vector.load %arg14[%c6_203, %c0_204, %c0_205] : memref<8x8x256xf32, #tpu.memory_space<vmem>>, vector<1x8x256xf32>
    %330 = vector.shape_cast %329 : vector<1x8x256xf32> to vector<8x256xf32>
    %331 = arith.addf %328, %330 : vector<8x256xf32>
    %332 = vector.extract_strided_slice %331 {offsets = [0, 0], sizes = [8, 192], strides = [1, 1]} : vector<8x256xf32> to vector<8x192xf32>
    %333 = arith.negf %332 : vector<8x192xf32>
    %334 = math.exp %333 : vector<8x192xf32>
    %cst_206 = arith.constant 1.000000e+00 : f32
    %335 = vector.broadcast %cst_206 : f32 to vector<8x192xf32>
    %336 = arith.addf %335, %334 : vector<8x192xf32>
    %337 = arith.divf %335, %336 : vector<8x192xf32>
    %338 = vector.extract_strided_slice %337 {offsets = [0, 0], sizes = [8, 64], strides = [1, 1]} : vector<8x192xf32> to vector<8x64xf32>
    %339 = vector.extract_strided_slice %337 {offsets = [0, 64], sizes = [8, 64], strides = [1, 1]} : vector<8x192xf32> to vector<8x64xf32>
    %340 = vector.extract_strided_slice %337 {offsets = [0, 128], sizes = [8, 64], strides = [1, 1]} : vector<8x192xf32> to vector<8x64xf32>
    %341 = vector.extract_strided_slice %331 {offsets = [0, 192], sizes = [8, 64], strides = [1, 1]} : vector<8x256xf32> to vector<8x64xf32>
    %342 = math.tanh %341 : vector<8x64xf32>
    %343 = arith.mulf %339, %298 : vector<8x64xf32>
    %344 = arith.mulf %338, %342 : vector<8x64xf32>
    %345 = arith.addf %343, %344 : vector<8x64xf32>
    %346 = math.tanh %345 : vector<8x64xf32>
    %347 = arith.mulf %340, %346 : vector<8x64xf32>
    %c6_207 = arith.constant 6 : index
    %c0_208 = arith.constant 0 : index
    %c0_209 = arith.constant 0 : index
    %348 = vector.load %arg15[%c6_207, %c0_208, %c0_209] : memref<8x8x32xf32, #tpu.memory_space<vmem>>, vector<1x8x32xf32>
    %349 = vector.shape_cast %348 : vector<1x8x32xf32> to vector<8x32xf32>
    %350 = vector.shape_cast %320 : vector<8x32xf32> to vector<1x8x32xf32>
    tpu.vector_store %arg15[%c6_207, %c0_208, %c0_209], %350 {strides = array<i32>} : memref<8x8x32xf32, #tpu.memory_space<vmem>>, vector<1x8x32xf32>,
    %c1_210 = arith.constant 1 : index
    %c0_211 = arith.constant 0 : index
    %c0_212 = arith.constant 0 : index
    %351 = vector.load %arg16[%c1_210, %c0_211, %c0_212] : memref<8x8x32xf32, #tpu.memory_space<vmem>>, vector<1x8x32xf32>
    %352 = vector.shape_cast %351 : vector<1x8x32xf32> to vector<8x32xf32>
    %353 = vector.shape_cast %325 : vector<8x32xf32> to vector<1x8x32xf32>
    tpu.vector_store %arg16[%c1_210, %c0_211, %c0_212], %353 {strides = array<i32>} : memref<8x8x32xf32, #tpu.memory_space<vmem>>, vector<1x8x32xf32>,
    %c7_213 = arith.constant 7 : index
    %c0_214 = arith.constant 0 : index
    %c0_215 = arith.constant 0 : index
    %354 = vector.load %arg0[%c7_213, %c0_214, %c0_215] : memref<8x8x32xf32, #tpu.memory_space<vmem>>, vector<1x8x32xf32>
    %355 = vector.shape_cast %354 : vector<1x8x32xf32> to vector<8x32xf32>
    %c7_216 = arith.constant 7 : index
    %c0_217 = arith.constant 0 : index
    %c0_218 = arith.constant 0 : index
    %356 = vector.load %arg1[%c7_216, %c0_217, %c0_218] : memref<8x8x32xf32, #tpu.memory_space<vmem>>, vector<1x8x32xf32>
    %357 = vector.shape_cast %356 : vector<1x8x32xf32> to vector<8x32xf32>
    %c7_219 = arith.constant 7 : index
    %c0_220 = arith.constant 0 : index
    %c0_221 = arith.constant 0 : index
    %358 = vector.load %arg13[%c7_219, %c0_220, %c0_221] : memref<8x8x64xf32, #tpu.memory_space<vmem>>, vector<1x8x64xf32>
    %359 = vector.shape_cast %358 : vector<1x8x64xf32> to vector<8x64xf32>
    %360 = arith.mulf %347, %359 : vector<8x64xf32>
    %c0_222 = arith.constant 0 : index
    %c0_223 = arith.constant 0 : index
    %361 = vector.load %arg6[%c0_222, %c0_223] : memref<64x288xf32, #tpu.memory_space<vmem>>, vector<64x288xf32>
    %cst_224 = arith.constant dense<0.000000e+00> : vector<8x288xf32>
    %362 = tpu.matmul %360, %361, %cst_224 {dimension_numbers = #tpu.dot_dimension_numbers<[1], [0], [0], [1], [0, 0, 1, 1], [], []>} : vector<8x64xf32>, vector<64x288xf32>, vector<8x288xf32> -> vector<8x288xf32>
    %363 = vector.extract_strided_slice %362 {offsets = [0, 256], sizes = [8, 32], strides = [1, 1]} : vector<8x288xf32> to vector<8x32xf32>
    %c0_225 = arith.constant 0 : index
    %c0_226 = arith.constant 0 : index
    %364 = vector.load %arg7[%c0_225, %c0_226] : memref<1x32xf32, #tpu.memory_space<vmem>>, vector<1x32xf32>
    %365 = vector.broadcast %364 : vector<1x32xf32> to vector<8x32xf32>
    %366 = arith.addf %363, %365 : vector<8x32xf32>
    %367 = arith.mulf %357, %355 : vector<8x32xf32>
    %cst_227 = arith.constant 1.000000e+00 : f32
    %368 = vector.broadcast %cst_227 : f32 to vector<8x32xf32>
    %369 = arith.subf %368, %357 : vector<8x32xf32>
    %370 = arith.mulf %369, %366 : vector<8x32xf32>
    %371 = arith.addf %367, %370 : vector<8x32xf32>
    %c7_228 = arith.constant 7 : index
    %c0_229 = arith.constant 0 : index
    %c0_230 = arith.constant 0 : index
    %372 = vector.load %arg15[%c7_228, %c0_229, %c0_230] : memref<8x8x32xf32, #tpu.memory_space<vmem>>, vector<1x8x32xf32>
    %373 = vector.shape_cast %372 : vector<1x8x32xf32> to vector<8x32xf32>
    %374 = vector.shape_cast %366 : vector<8x32xf32> to vector<1x8x32xf32>
    tpu.vector_store %arg15[%c7_228, %c0_229, %c0_230], %374 {strides = array<i32>} : memref<8x8x32xf32, #tpu.memory_space<vmem>>, vector<1x8x32xf32>,
    %c0_231 = arith.constant 0 : index
    %c0_232 = arith.constant 0 : index
    %c0_233 = arith.constant 0 : index
    %375 = vector.load %arg16[%c0_231, %c0_232, %c0_233] : memref<8x8x32xf32, #tpu.memory_space<vmem>>, vector<1x8x32xf32>
    %376 = vector.shape_cast %375 : vector<1x8x32xf32> to vector<8x32xf32>
    %377 = vector.shape_cast %371 : vector<8x32xf32> to vector<1x8x32xf32>
    tpu.vector_store %arg16[%c0_231, %c0_232, %c0_233], %377 {strides = array<i32>} : memref<8x8x32xf32, #tpu.memory_space<vmem>>, vector<1x8x32xf32>,
    %c0_234 = arith.constant 0 : index
    %c0_235 = arith.constant 0 : index
    %c0_236 = arith.constant 0 : index
    %378 = vector.load %arg0[%c0_234, %c0_235, %c0_236] : memref<8x8x32xf32, #tpu.memory_space<vmem>>, vector<8x8x32xf32>
    %379 = vector.shape_cast %378 : vector<8x8x32xf32> to vector<64x32xf32>
    %c0_237 = arith.constant 0 : index
    %c0_238 = arith.constant 0 : index
    %c0_239 = arith.constant 0 : index
    %380 = vector.load %arg1[%c0_237, %c0_238, %c0_239] : memref<8x8x32xf32, #tpu.memory_space<vmem>>, vector<8x8x32xf32>
    %381 = vector.shape_cast %380 : vector<8x8x32xf32> to vector<64x32xf32>
    %c0_240 = arith.constant 0 : index
    %c0_241 = arith.constant 0 : index
    %c0_242 = arith.constant 0 : index
    %382 = vector.load %arg15[%c0_240, %c0_241, %c0_242] : memref<8x8x32xf32, #tpu.memory_space<vmem>>, vector<8x8x32xf32>
    %383 = vector.shape_cast %382 : vector<8x8x32xf32> to vector<64x32xf32>
    %c0_243 = arith.constant 0 : index
    %c0_244 = arith.constant 0 : index
    %c0_245 = arith.constant 0 : index
    %384 = vector.load %arg16[%c0_243, %c0_244, %c0_245] : memref<8x8x32xf32, #tpu.memory_space<vmem>>, vector<8x8x32xf32>
    %385 = vector.shape_cast %384 : vector<8x8x32xf32> to vector<64x32xf32>
    %c0_246 = arith.constant 0 : index
    %c0_247 = arith.constant 0 : index
    %386 = vector.load %arg3[%c0_246, %c0_247] : memref<8x64xf32, #tpu.memory_space<vmem>>, vector<8x64xf32>
    %387 = arith.subf %379, %383 : vector<64x32xf32>
    %388 = math.absf %387 : vector<64x32xf32>
    %389 = arith.mulf %388, %381 : vector<64x32xf32>
    %cst_248 = arith.constant dense<0.000000e+00> : vector<8x32xf32>
    %390 = tpu.matmul %386, %389, %cst_248 {dimension_numbers = #tpu.dot_dimension_numbers<[1], [0], [0], [1], [0, 0, 1, 1], [], []>} : vector<8x64xf32>, vector<64x32xf32>, vector<8x32xf32> -> vector<8x32xf32>
    %cst_249 = arith.constant dense<0.000000e+00> : vector<8x32xf32>
    %391 = tpu.matmul %386, %381, %cst_249 {dimension_numbers = #tpu.dot_dimension_numbers<[1], [0], [0], [1], [0, 0, 1, 1], [], []>} : vector<8x64xf32>, vector<64x32xf32>, vector<8x32xf32> -> vector<8x32xf32>
    %392 = vector.extract_strided_slice %390 {offsets = [0, 0], sizes = [8, 16], strides = [1, 1]} : vector<8x32xf32> to vector<8x16xf32>
    %cst_250 = arith.constant dense<0.000000e+00> : vector<8xf32>
    %393 = vector.multi_reduction <add>, %392, %cst_250 [1] : vector<8x16xf32> to vector<8xf32>
    %394 = vector.shape_cast %393 : vector<8xf32> to vector<8x1xf32>
    %395 = vector.extract_strided_slice %390 {offsets = [0, 16], sizes = [8, 16], strides = [1, 1]} : vector<8x32xf32> to vector<8x16xf32>
    %cst_251 = arith.constant dense<0.000000e+00> : vector<8xf32>
    %396 = vector.multi_reduction <add>, %395, %cst_251 [1] : vector<8x16xf32> to vector<8xf32>
    %397 = vector.shape_cast %396 : vector<8xf32> to vector<8x1xf32>
    %398 = vector.extract_strided_slice %391 {offsets = [0, 0], sizes = [8, 16], strides = [1, 1]} : vector<8x32xf32> to vector<8x16xf32>
    %cst_252 = arith.constant dense<0.000000e+00> : vector<8xf32>
    %399 = vector.multi_reduction <add>, %398, %cst_252 [1] : vector<8x16xf32> to vector<8xf32>
    %400 = vector.shape_cast %399 : vector<8xf32> to vector<8x1xf32>
    %401 = vector.extract_strided_slice %391 {offsets = [0, 16], sizes = [8, 16], strides = [1, 1]} : vector<8x32xf32> to vector<8x16xf32>
    %cst_253 = arith.constant dense<0.000000e+00> : vector<8xf32>
    %402 = vector.multi_reduction <add>, %401, %cst_253 [1] : vector<8x16xf32> to vector<8xf32>
    %403 = vector.shape_cast %402 : vector<8xf32> to vector<8x1xf32>
    %cst_254 = arith.constant 9.99999974E-6 : f32
    %404 = vector.broadcast %cst_254 : f32 to vector<8x1xf32>
    %405 = arith.addf %400, %404 : vector<8x1xf32>
    %406 = arith.divf %394, %405 : vector<8x1xf32>
    %407 = vector.shape_cast %406 : vector<8x1xf32> to vector<1x8x1xf32>
    %cst_255 = arith.constant dense<0.000000e+00> : vector<1xf32>
    %408 = vector.multi_reduction <add>, %407, %cst_255 [1, 2] : vector<1x8x1xf32> to vector<1xf32>
    %409 = vector.shape_cast %408 : vector<1xf32> to vector<1x1x1xf32>
    %410 = vector.extract %409[0, 0, 0] : f32 from vector<1x1x1xf32>
    %411 = vector.broadcast %410 : f32 to vector<1x1xf32>
    %cst_256 = arith.constant 9.99999974E-6 : f32
    %412 = vector.broadcast %cst_256 : f32 to vector<8x1xf32>
    %413 = arith.addf %403, %412 : vector<8x1xf32>
    %414 = arith.divf %397, %413 : vector<8x1xf32>
    %415 = vector.shape_cast %414 : vector<8x1xf32> to vector<1x8x1xf32>
    %cst_257 = arith.constant dense<0.000000e+00> : vector<1xf32>
    %416 = vector.multi_reduction <add>, %415, %cst_257 [1, 2] : vector<1x8x1xf32> to vector<1xf32>
    %417 = vector.shape_cast %416 : vector<1xf32> to vector<1x1x1xf32>
    %418 = vector.extract %417[0, 0, 0] : f32 from vector<1x1x1xf32>
    %419 = vector.broadcast %418 : f32 to vector<1x1xf32>
    %420 = arith.mulf %381, %379 : vector<64x32xf32>
    %cst_258 = arith.constant 1.000000e+00 : f32
    %421 = vector.broadcast %cst_258 : f32 to vector<64x32xf32>
    %422 = arith.subf %421, %381 : vector<64x32xf32>
    %423 = arith.mulf %422, %383 : vector<64x32xf32>
    %424 = arith.addf %420, %423 : vector<64x32xf32>
    %425 = vector.extract_strided_slice %424 {offsets = [0, 0], sizes = [64, 16], strides = [1, 1]} : vector<64x32xf32> to vector<64x16xf32>
    %426 = vector.extract_strided_slice %385 {offsets = [0, 16], sizes = [64, 16], strides = [1, 1]} : vector<64x32xf32> to vector<64x16xf32>
    %427 = arith.addf %425, %426 : vector<64x16xf32>
    %cst_259 = arith.constant 5.000000e-01 : f32
    %428 = vector.broadcast %cst_259 : f32 to vector<64x16xf32>
    %429 = arith.mulf %428, %427 : vector<64x16xf32>
    %430 = vector.shape_cast %429 : vector<64x16xf32> to vector<8x8x16xf32>
    %c0_260 = arith.constant 0 : index
    %c0_261 = arith.constant 0 : index
    %c0_262 = arith.constant 0 : index
    %431 = vector.load %arg11[%c0_260, %c0_261, %c0_262] : memref<8x8x16xf32, #tpu.memory_space<vmem>>, vector<8x8x16xf32>
    tpu.vector_store %arg11[%c0_260, %c0_261, %c0_262], %430 {strides = array<i32>} : memref<8x8x16xf32, #tpu.memory_space<vmem>>, vector<8x8x16xf32>,
    %432 = arith.subf %425, %426 : vector<64x16xf32>
    %433 = arith.mulf %432, %432 : vector<64x16xf32>
    %434 = vector.shape_cast %433 : vector<64x16xf32> to vector<1x64x16xf32>
    %cst_263 = arith.constant dense<0.000000e+00> : vector<1xf32>
    %435 = vector.multi_reduction <add>, %434, %cst_263 [1, 2] : vector<1x64x16xf32> to vector<1xf32>
    %436 = vector.shape_cast %435 : vector<1xf32> to vector<1x1x1xf32>
    %437 = vector.extract %436[0, 0, 0] : f32 from vector<1x1x1xf32>
    %438 = vector.broadcast %437 : f32 to vector<1x1xf32>
    %cst_264 = arith.constant 9.765625E-4 : f32
    %439 = vector.broadcast %cst_264 : f32 to vector<1x1xf32>
    %440 = arith.mulf %438, %439 : vector<1x1xf32>
    %441 = arith.addf %411, %419 : vector<1x1xf32>
    %442 = arith.addf %441, %440 : vector<1x1xf32>
    %c0_265 = arith.constant 0 : index
    %c0_266 = arith.constant 0 : index
    %443 = vector.load %arg12[%c0_265, %c0_266] : memref<1x1xf32, #tpu.memory_space<vmem>>, vector<1x1xf32>
    tpu.vector_store %arg12[%c0_265, %c0_266], %442 {strides = array<i32>} : memref<1x1xf32, #tpu.memory_space<vmem>>, vector<1x1xf32>,
    return
  }
}

</mosaic_0001>

<bundles_post_ra>
// kernel: tpu_custom_call.1
= control target key start
LH: loop header
LB: loop body
LE: loop exit
PB: predicated region body
PF: predicated region fallthrough
CT: control target
= control target key end

     0   :  { %18 = vsyncpa [#allocation7], 0  ;;  %s4881_s0 = inlined_call_operand.hbm [shape: f32[8,8,32], index: 0, kind: input, shape index: {}]   ;;  %s4882_s1 = inlined_call_operand.hbm [shape: f32[8,8,32], index: 1, kind: input, shape index: {}]   ;;  %s4883_s2 = inlined_call_operand.hbm [shape: f32[8,8,32], index: 2, kind: input, shape index: {}]   ;;  %s4884_s3 = inlined_call_operand.hbm [shape: f32[8,64], index: 3, kind: input, shape index: {}]   ;;  %s4885_s4 = inlined_call_operand.hbm [shape: f32[32,64], index: 4, kind: input, shape index: {}]   ;;  %s4886_s5 = inlined_call_operand.vmem [shape: f32[1,64], index: 5, kind: input, shape index: {}]   ;;  %s4887_s6 = inlined_call_operand.hbm [shape: f32[64,288], index: 6, kind: input, shape index: {}]   ;;  %s4888_s7 = inlined_call_operand.vmem [shape: f32[1,32], index: 7, kind: input, shape index: {}]   ;;  %s4889_s8 = inlined_call_operand.hbm [shape: f32[32,256], index: 8, kind: input, shape index: {}]   ;;  %s4890_s9 = inlined_call_operand.hbm [shape: f32[32,256], index: 9, kind: input, shape index: {}]   ;;  %s4891_s10 = inlined_call_operand.vmem [shape: f32[1,256], index: 10, kind: input, shape index: {}]   ;;  %s4892_s11 = inlined_call_operand.hbm [shape: f32[8,8,16], index: 11, kind: output, shape index: {0}]   ;;  %s4893_s12 = inlined_call_operand.hbm [shape: f32[1,1], index: 12, kind: output, shape index: {1}]  }
   0x1   :  { %19 = vsyncpa [#allocation10], 0 }
   0x2   :  { %20 = vsyncpa [#allocation13], 0 }
   0x3   :  { %21 = vsyncpa [#allocation16], 0 }
   0x4   :  { %22 = vsyncpa [#allocation19], 0 }
   0x5   :  { %23 = vsyncpa [#allocation8], 0 }
   0x6   :  { %24 = vsyncpa [#allocation22], 0  ;;  %s3913_s21 = smov [#allocation9]   ;;  %s3914_s23 = smov [#allocation12]  }
   0x7   :  { %s42_s22 = sshll.u32 %s3913_s21, 4  ;;  %s67_s24 = sshll.u32 %s3914_s23, 4  ;;  %s43_s22 = int_to_ptr.vmem [resolvable:$true] %s42_s22  ;;  %s68_s24 = int_to_ptr.vmem [resolvable:$true] %s67_s24 }
   0x8   :  { %s3707_s25 = scalar_lea.vmem %s43_s22, 1024  ;;  %p3712_p1 = scmp.lt.s32.totalorder %s43_s22, %s43_s22 }
   0x9   :  { %p3708_p0 = scmp.ne.s32.totalorder %s43_s22, %s3707_s25  ;;  %p3713_p2 = scmp.lt.s32.totalorder %s3707_s25, %s3707_s25 }
   0xb   :  { %p3714_p3 = por %p3713_p2, %p3712_p1 }
   0xd   :  { %p3715_p4 = pnand %p3714_p3, %p3708_p0 }
   0xf   :  { %3718 = shalt.err (!%p3715_p4)
}
  0x10   :  { %s3915_s26 = smov 128   ;;  %s3916_s27 = smov 8  }
  0x11   :  { %48 = dma.hbm_to_vmem [thread:$0]  %s4882_s1, 1024, %s43_s22, [#allocation10], %s3915_s26, %s3915_s26, %s3916_s27  }
  0x12   :  { %s3727_s30 = scalar_lea.vmem %s68_s24, 128  ;;  %p3732_p6 = scmp.lt.s32.totalorder %s68_s24, %s68_s24 }
  0x13   :  { %p3728_p5 = scmp.ne.s32.totalorder %s68_s24, %s3727_s30  ;;  %p3733_p7 = scmp.lt.s32.totalorder %s3727_s30, %s3727_s30 }
  0x15   :  { %p3734_p8 = por %p3733_p7, %p3732_p6 }
  0x17   :  { %p3735_p9 = pnand %p3734_p8, %p3728_p5 }
  0x19   :  { %3738 = shalt.err (!%p3735_p9)
}
  0x1a   :  { %70 = dma.hbm_to_vmem [thread:$0]  %s4884_s3, 128, %s68_s24, [#allocation13]  }
  0x1b   :  { %s3917_s15 = smov [#allocation15]  }
  0x1c   :  { %s90_s16 = sshll.u32 %s3917_s15, 4  ;;  %s91_s16 = int_to_ptr.vmem [resolvable:$true] %s90_s16 }
  0x1d   :  { %s3747_s17 = scalar_lea.vmem %s91_s16, 3072  ;;  %p3752_p11 = scmp.lt.s32.totalorder %s91_s16, %s91_s16 }
  0x1e   :  { %p3748_p10 = scmp.ne.s32.totalorder %s91_s16, %s3747_s17  ;;  %p3753_p12 = scmp.lt.s32.totalorder %s3747_s17, %s3747_s17 }
  0x20   :  { %p3754_p13 = por %p3753_p12, %p3752_p11 }
  0x22   :  { %p3755_p0 = pnand %p3754_p13, %p3748_p10 }
  0x24   :  { %3758 = shalt.err (!%p3755_p0)
}
  0x25   :  { %s3918_s1 = smov 384   ;;  %s3919_s18 = smov 24  }
  0x26   :  { %96 = dma.hbm_to_vmem [thread:$0]  %s4887_s6, 3072, %s91_s16, [#allocation16], %s3918_s1, %s3918_s1, %s3919_s18  }
  0x27   :  { %s3920_s21 = smov [#allocation6]   ;;  %s3921_s3 = smov [#allocation11]  }
  0x28   :  { %s30_s22 = sshll.u32 %s3920_s21, 4  ;;  %s54_s23 = sshll.u32 %s3921_s3, 4  ;;  %s31_s22 = int_to_ptr.vmem [resolvable:$true] %s30_s22  ;;  %s55_s23 = int_to_ptr.vmem [resolvable:$true] %s54_s23 }
  0x29   :  { %s3767_s24 = scalar_lea.vmem %s31_s22, 1024  ;;  %p3772_p2 = scmp.lt.s32.totalorder %s31_s22, %s31_s22 }
  0x2a   :  { %p3768_p1 = scmp.ne.s32.totalorder %s31_s22, %s3767_s24  ;;  %p3773_p3 = scmp.lt.s32.totalorder %s3767_s24, %s3767_s24 }
  0x2c   :  { %p3774_p4 = por %p3773_p3, %p3772_p2 }
  0x2e   :  { %p3775_p5 = pnand %p3774_p4, %p3768_p1 }
  0x30   :  { %3778 = shalt.err (!%p3775_p5)
}
  0x31   :  { %36 = dma.hbm_to_vmem [thread:$0]  %s4881_s0, 1024, %s31_s22, [#allocation7], %s3915_s26, %s3915_s26, %s3916_s27  }
  0x32   :  { %s3787_s6 = scalar_lea.vmem %s55_s23, 1024  ;;  %p3792_p7 = scmp.lt.s32.totalorder %s55_s23, %s55_s23 }
  0x33   :  { %p3788_p6 = scmp.ne.s32.totalorder %s55_s23, %s3787_s6  ;;  %p3793_p8 = scmp.lt.s32.totalorder %s3787_s6, %s3787_s6 }
  0x35   :  { %p3794_p9 = por %p3793_p8, %p3792_p7 }
  0x37   :  { %p3795_p10 = pnand %p3794_p9, %p3788_p6 }
  0x39   :  { %3798 = shalt.err (!%p3795_p10)
}
  0x3a   :  { %60 = dma.hbm_to_vmem [thread:$0]  %s4883_s2, 1024, %s55_s23, [#allocation10], %s3915_s26, %s3915_s26, %s3916_s27  }
  0x3b   :  { %s3922_s13 = smov [#allocation14]   ;;  %s3923_s15 = smov [#allocation17]  }
  0x3c   :  { %s76_s14 = sshll.u32 %s3922_s13, 4  ;;  %s104_s0 = sshll.u32 %s3923_s15, 4  ;;  %s77_s14 = int_to_ptr.vmem [resolvable:$true] %s76_s14  ;;  %s105_s0 = int_to_ptr.vmem [resolvable:$true] %s104_s0 }
  0x3d   :  { %s3807_s16 = scalar_lea.vmem %s77_s14, 512  ;;  %p3812_p12 = scmp.lt.s32.totalorder %s77_s14, %s77_s14 }
  0x3e   :  { %p3808_p11 = scmp.ne.s32.totalorder %s77_s14, %s3807_s16  ;;  %p3813_p13 = scmp.lt.s32.totalorder %s3807_s16, %s3807_s16 }
  0x40   :  { %p3814_p0 = por %p3813_p13, %p3812_p12 }
  0x42   :  { %p3815_p1 = pnand %p3814_p0, %p3808_p11 }
  0x44   :  { %3818 = shalt.err (!%p3815_p1)
}
  0x45   :  { %82 = dma.hbm_to_vmem [thread:$0]  %s4885_s4, 512, %s77_s14, [#allocation13], %s3915_s26, %s3915_s26, %s3916_s27  }
  0x46   :  { %s3827_s2 = scalar_lea.vmem %s105_s0, 1024  ;;  %p3832_p3 = scmp.lt.s32.totalorder %s105_s0, %s105_s0 }
  0x47   :  { %p3828_p2 = scmp.ne.s32.totalorder %s105_s0, %s3827_s2  ;;  %p3833_p4 = scmp.lt.s32.totalorder %s3827_s2, %s3827_s2 }
  0x49   :  { %p3834_p5 = por %p3833_p4, %p3832_p3 }
  0x4b   :  { %p3835_p6 = pnand %p3834_p5, %p3828_p2 }
  0x4d   :  { %3838 = shalt.err (!%p3835_p6)
}
  0x4e   :  { %s3924_s18 = smov 256   ;;  %s3925_s19 = smov 16  }
  0x4f   :  { %110 = dma.hbm_to_vmem [thread:$0]  %s4889_s8, 1024, %s105_s0, [#allocation16], %s3924_s18, %s3924_s18, %s3925_s19  }
  0x50   :  { %s3926_s22 = smov [#allocation18]  }
  0x51   :  { %s116_s3 = sshll.u32 %s3926_s22, 4  ;;  %s117_s3 = int_to_ptr.vmem [resolvable:$true] %s116_s3 }
  0x52   :  { %s3847_s23 = scalar_lea.vmem %s117_s3, 1024  ;;  %p3852_p8 = scmp.lt.s32.totalorder %s117_s3, %s117_s3 }
  0x53   :  { %p3848_p7 = scmp.ne.s32.totalorder %s117_s3, %s3847_s23  ;;  %p3853_p9 = scmp.lt.s32.totalorder %s3847_s23, %s3847_s23 }
  0x55   :  { %p3854_p10 = por %p3853_p9, %p3852_p8 }
  0x57   :  { %p3855_p11 = pnand %p3854_p10, %p3848_p7 }
  0x59   :  { %3858 = shalt.err (!%p3855_p11)
}
  0x5a   :  { %122 = dma.hbm_to_vmem [thread:$0]  %s4890_s9, 1024, %s117_s3, [#allocation19], %s3924_s18, %s3924_s18, %s3925_s19  }
  0x5b   :  { %3899 = dma.done.wait [#allocation7], 1024  }
  0x5c   :  { %3900 = vsyncadd [#allocation7], 4294966272 }
  0x5d   :  { %3901 = dma.done.wait [#allocation10], 2048  }
  0x5e   :  { %3902 = vsyncadd [#allocation10], 4294965248 }
  0x5f   :  { %3903 = dma.done.wait [#allocation13], 640  }
  0x60   :  { %3904 = vsyncadd [#allocation13], 4294966656 }
  0x61   :  { %3905 = dma.done.wait [#allocation16], 4096  }
  0x62   :  { %3906 = vsyncadd [#allocation16], 4294963200 }
  0x63   :  { %3907 = dma.done.wait [#allocation19], 1024  }
  0x64   :  { %3908 = vsyncadd [#allocation19], 4294966272  ;;  %vm176_vm0 = vcmask 261120   ;;  %v168_v0 = vld [vmem:[#allocation14 + $0x18] sm:$0xff]  ;;  %v167_v1 = vld [vmem:[#allocation14 + $0x10] sm:$0xff]  ;;  %v4894_v14 = vmov 0.0   ;;  %v357_v50 = vlaneseq }
  0x65   :  { %3358 = vmatprep.subr.mxu0 %v168_v0  ;;  %v166_v2 = vld [vmem:[#allocation14 + $0x8] sm:$0xff]  ;;  %v149_v3 = vld [vmem:[#allocation11] sm:$0xff]  ;;  %v353_v5 = vld [vmem:[#allocation18 + $0x30] sm:$0xff]  ;;  %455 = vmatprep.mubr.f32.mxu1 %v4894_v14  ;;  %vm3928_vm1 = vmmov 0   ;;  %vm338_vm2 = vcmask 523264   ;;  %s3929_s6 = smov 64  }
  0x66   :  { %3359 = vmatpush3.msra.mxu0 %v168_v0  ;;  %3366 = vmatprep.mubr.msk.f32.mxu0 %vm176_vm0, %v149_v3  ;;  %v354_v4 = vld [vmem:[#allocation18 + $0x38] sm:$0xff]  ;;  %v352_v6 = vld [vmem:[#allocation18 + $0x28] sm:$0xff]  ;;  %v351_v7 = vld [vmem:[#allocation18 + $0x20] sm:$0xff]  ;;  %v358_v54 = vshrl.u32 %v357_v50, 7  ;;  %vm2974_vm3 = vcmask 130048   ;;  %vm2998_vm4 = vcmask 7168  }
  0x67   :  { %3360 = vmatprep.subr.mxu0 %v167_v1  ;;  %415 = vmatprep.subr.mxu1 %v354_v4  ;;  %v165_v8 = vld [vmem:[#allocation14] sm:$0xff]  ;;  %v350_v9 = vld [vmem:[#allocation18 + $0x18] sm:$0xff]  ;;  %v349_v11 = vld [vmem:[#allocation18 + $0x10] sm:$0xff]  ;;  %s3931_s13 = smov [#allocation20]  }
  0x68   :  { %3361 = vmatpush3.msra.mxu0 %v167_v1  ;;  %416 = vmatpush1.msra.mxu1 %v353_v5  ;;  %v150_v10 = vld [vmem:[#allocation11 + $0x8] sm:$0xff]  ;;  %v348_v12 = vld [vmem:[#allocation18 + $0x8] sm:$0xff]  ;;  %v4037_v15 = vld [vmem:[#allocation9] sm:$0xff]  ;;  %v359_v56 = vsub.s32 0, %v358_v54  ;;  %s3163_s14 = sshll.u32 %s3931_s13, 4  ;;  %s3164_s14 = int_to_ptr.vmem [resolvable:$true] %s3163_s14 }
  0x69   :  { %3362 = vmatprep.subr.mxu0 %v166_v2  ;;  %417 = vmatprep.subr.mxu1 %v352_v6  ;;  %v347_v13 = vld [vmem:[#allocation18] sm:$0xff]  ;;  %v4048_v17 = vld [vmem:[#allocation9 + $0x10] sm:$0xff]  ;;  %v160_v18 = vld [vmem:[#allocation9 + $0x18] sm:$0xff]  ;;  %s3859_s15 = scalar_lea.vmem %s3164_s14, 1024  ;;  %p3864_p13 = scmp.lt.s32.totalorder %s3164_s14, %s3164_s14 }
  0x6a   :  { %3363 = vmatpush3.msra.mxu0 %v166_v2  ;;  %418 = vmatpush1.msra.mxu1 %v351_v7  ;;  %v4043_v16 = vld [vmem:[#allocation9 + $0x8] sm:$0xff]  ;;  %v161_v19 = vld [vmem:[#allocation9 + $0x20] sm:$0xff]  ;;  %v4055_v20 = vld [vmem:[#allocation15 + $0xb0] sm:$0xff]  ;;  %p3860_p12 = scmp.ne.s32.totalorder %s3164_s14, %s3859_s15  ;;  %p3865_p0 = scmp.lt.s32.totalorder %s3859_s15, %s3859_s15 }
  0x6b   :  { %3364 = vmatprep.subr.mxu0 %v165_v8  ;;  %419 = vmatprep.subr.mxu1 %v350_v9  ;;  %v4059_v21 = vld [vmem:[#allocation15 + $0xb8] sm:$0xff]  ;;  %v151_v22 = vld [vmem:[#allocation11 + $0x10] sm:$0xff]  ;;  %v152_v24 = vld [vmem:[#allocation11 + $0x18] sm:$0xff] }
  0x6c   :  { %3365 = vmatpush3.msra.mxu0 %v165_v8  ;;  %420 = vmatpush1.msra.mxu1 %v349_v11  ;;  %v4061_v23 = vld [vmem:[#allocation15 + $0xa8] sm:$0xff]  ;;  %v4065_v25 = vld [vmem:[#allocation15 + $0x98] sm:$0xff]  ;;  %v4069_v26 = vld [vmem:[#allocation15 + $0xa0] sm:$0xff]  ;;  %p3866_p1 = por %p3865_p0, %p3864_p13 }
  0x6d   :  { %3367 = vmatmul.mubr.msk.f32.vlgmr.msra.gmra.mxu0 %vm176_vm0, %v150_v10  ;;  %421 = vmatprep.subr.mxu1 %v348_v12  ;;  %v4071_v27 = vld [vmem:[#allocation15 + $0x90] sm:$0xff]  ;;  %v162_v28 = vld [vmem:[#allocation9 + $0x28] sm:$0xff]  ;;  %v4079_v30 = vld [vmem:[#allocation15 + $0x88] sm:$0xff]  ;;  %v363_v12 = vsub.s32 1, %v358_v54 }
  0x6e   :  { %422 = vmatpush1.msra.mxu1 %v347_v13  ;;  %3378 = vmatprep.subr.mxu0 %v4894_v14  ;;  %v4075_v29 = vld [vmem:[#allocation15 + $0x80] sm:$0xff]  ;;  %v153_v31 = vld [vmem:[#allocation11 + $0x20] sm:$0xff]  ;;  %v4087_v34 = vld [vmem:[#allocation15 + $0x68] sm:$0xff]  ;;  %p3867_p2 = pnand %p3866_p1, %p3860_p12 }
  0x6f   :  { %3202 = vmatmul.mubr.msk.f32.vlgmr.msra.gmra.mxu1 %vm176_vm0, %v4037_v15  ;;  %567 = vmatprep.subr.mxu1 %v4055_v20  ;;  %v4083_v32 = vld [vmem:[#allocation15 + $0x78] sm:$0xff]  ;;  %v154_v33 = vld [vmem:[#allocation11 + $0x28] sm:$0xff]  ;;  %v4091_v35 = vld [vmem:[#allocation15 + $0x70] sm:$0xff] }
  0x70   :  { %461 = vmatprep.mubr.f32.mxu1 %v4894_v14  ;;  %3379 = vmatpush3.msra.mxu0 %v4059_v21  ;;  %v4095_v36 = vld [vmem:[#allocation15 + $0x60] sm:$0xff]  ;;  %v163_v37 = vld [vmem:[#allocation9 + $0x30] sm:$0xff]  ;;  %v4099_v38 = vld [vmem:[#allocation15 + $0x50] sm:$0xff] }
  0x71   :  { %3369 = vmatprep.mubr.msk.f32.mxu0 %vm176_vm0, %v151_v22  ;;  %568 = vmatpush1.msra.mxu1 %v4061_v23  ;;  %v4103_v39 = vld [vmem:[#allocation15 + $0x58] sm:$0xff]  ;;  %v155_v40 = vld [vmem:[#allocation11 + $0x30] sm:$0xff]  ;;  %v156_v42 = vld [vmem:[#allocation11 + $0x38] sm:$0xff] }
  0x72   :  { %3380 = vmatprep.subr.mxu0 %v4894_v14  ;;  %3370 = vmatmul.mubr.msk.f32.gmra.mxu0 %vm176_vm0, %v152_v24  ;;  %v4107_v41 = vld [vmem:[#allocation15 + $0x48] sm:$0xff]  ;;  %v4111_v43 = vld [vmem:[#allocation15 + $0x38] sm:$0xff]  ;;  %v4115_v44 = vld [vmem:[#allocation15 + $0x40] sm:$0xff] }
  0x73   :  { %3203 = vmatmul.mubr.msk.f32.gmra.mxu1 %vm176_vm0, %v4043_v16  ;;  %569 = vmatprep.subr.mxu1 %v4065_v25  ;;  %v4119_v45 = vld [vmem:[#allocation15 + $0x30] sm:$0xff]  ;;  %v4123_v47 = vld [vmem:[#allocation15 + $0x20] sm:$0xff]  ;;  %v4127_v48 = vld [vmem:[#allocation15 + $0x28] sm:$0xff] }
  0x74   :  { %467 = vmatprep.mubr.f32.mxu1 %v4894_v14  ;;  %3381 = vmatpush3.msra.mxu0 %v4069_v26  ;;  %v164_v46 = vld [vmem:[#allocation9 + $0x38] sm:$0xff]  ;;  %v4129_v49 = vld [vmem:[#allocation15 + $0x18] sm:$0xff]  ;;  %v4133_v51 = vld [vmem:[#allocation15 + $0x8] sm:$0xff] }
  0x75   :  { %570 = vmatpush1.msra.mxu1 %v4071_v27  ;;  %3382 = vmatprep.subr.mxu0 %v4894_v14  ;;  %v4137_v52 = vld [vmem:[#allocation15 + $0x10] sm:$0xff]  ;;  %v4139_v53 = vld [vmem:[#allocation15] sm:$0xff]  ;;  %v355_v55 = vld [vmem:[%s4891_s10] sm:$0x3] }
  0x76   :  { %571 = vmatprep.subr.mxu1 %v4075_v29  ;;  %3383 = vmatpush3.msra.mxu0 %v4079_v30  ;;  %v4153_v57 = vrot.slane %v355_v55, %v359_v56  ;;  %v4156_v58 = vld [vmem:[#allocation17 + $0x38] sm:$0xff] }
  0x77   :  { %3204 = vmatmul.mubr.msk.f32.gmra.mxu1 %vm176_vm0, %v4048_v17  ;;  %3372 = vmatprep.mubr.msk.f32.mxu0 %vm176_vm0, %v153_v31  ;;  %v4162_v59 = vld [vmem:[%s4886_s5] ss:$0 sm:$0xff] }
  0x78   :  { %473 = vmatprep.mubr.f32.mxu1 %v4894_v14  ;;  %572 = vmatpush1.msra.mxu1 %v4083_v32 }
  0x79   :  { %3384 = vmatprep.subr.mxu0 %v4894_v14  ;;  %3373 = vmatmul.mubr.msk.f32.gmra.mxu0 %vm176_vm0, %v154_v33 }
  0x7a   :  { %573 = vmatprep.subr.mxu1 %v4087_v34  ;;  %3385 = vmatpush3.msra.mxu0 %v4091_v35 }
  0x7b   :  { %3205 = vmatmul.mubr.msk.f32.gmra.mxu1 %vm176_vm0, %v160_v18  ;;  %3386 = vmatprep.subr.mxu0 %v4894_v14 }
  0x7c   :  { %479 = vmatprep.mubr.f32.mxu1 %v4894_v14  ;;  %574 = vmatpush1.msra.mxu1 %v4095_v36 }
  0x7d   :  { %575 = vmatprep.subr.mxu1 %v4099_v38  ;;  %3387 = vmatpush3.msra.mxu0 %v4103_v39 }
  0x7e   :  { %3375 = vmatprep.mubr.msk.f32.mxu0 %vm176_vm0, %v155_v40  ;;  %576 = vmatpush1.msra.mxu1 %v4107_v41 }
  0x7f   :  { %3206 = vmatmul.mubr.msk.f32.gmra.mxu1 %vm176_vm0, %v161_v19  ;;  %3388 = vmatprep.subr.mxu0 %v4894_v14  ;;  %v4193_v19 = vrot.slane %v355_v55, %v363_v12 }
  0x80   :  { %485 = vmatprep.mubr.f32.mxu1 %v4894_v14  ;;  %3376 = vmatmul.mubr.msk.f32.gmra.mxu0 %vm176_vm0, %v156_v42 }
  0x81   :  { %577 = vmatprep.subr.mxu1 %v4111_v43  ;;  %3389 = vmatpush3.msra.mxu0 %v4115_v44 }
  0x82   :  { %578 = vmatpush1.msra.mxu1 %v4119_v45  ;;  %3390 = vmatprep.subr.mxu0 %v4894_v14 }
  0x83   :  { %3207 = vmatmul.mubr.msk.f32.gmra.mxu1 %vm176_vm0, %v162_v28  ;;  %579 = vmatprep.subr.mxu1 %v4123_v47 }
  0x84   :  { %491 = vmatprep.mubr.f32.mxu1 %v4894_v14  ;;  %3391 = vmatpush3.msra.mxu0 %v4127_v48 }
  0x85   :  { %580 = vmatpush1.msra.mxu1 %v4129_v49  ;;  %3392 = vmatprep.subr.mxu0 %v4894_v14 }
  0x86   :  { %581 = vmatprep.subr.mxu1 %v4133_v51  ;;  %3393 = vmatpush3.msra.mxu0 %v4137_v52 }
  0x87   :  { %3208 = vmatmul.mubr.msk.f32.gmra.mxu1 %vm176_vm0, %v163_v37  ;;  %3394 = vmatprep.mubr.msk.f32.mxu0 %vm3928_vm1, %v4894_v14 }
  0x88   :  { %497 = vmatprep.mubr.f32.mxu1 %v4894_v14  ;;  %582 = vmatpush1.msra.mxu1 %v4139_v53 }
  0x89   :  { %873 = vmatprep.subr.mxu0 %v4055_v20  ;;  %739 = vmatprep.subr.mxu1 %v4156_v58 }
  0x8b   :  { %3209 = vmatmul.mubr.msk.f32.gmra.mxu1 %vm176_vm0, %v164_v46 }
  0x8c   :  { %615 = vmatprep.mubr.f32.mxu1 %v4894_v14 }
 0x12d   :  { %v3368_v60 = vpop.f32.mrf.mxu0 }
 0x12e   :  { %v273_v61 = vadd.f32 %v3368_v60, %v4162_v59 }
 0x12f   :  { %v267_v62 = vpop.f32.mrf.mxu0  ;;  %v457_v10 = vpop.f32.mrf.mxu1 }
 0x130   :  { %v307_v63 = vmax.f32 %v273_v61, 0.0  ;;  %v268_v0 = vadd.f32 %v4162_v59, %v267_v62  ;;  %v4189_v11 = vadd.f32 %v457_v10, %v4153_v57 }
 0x131   :  { %v4191_v13 = vpop.f32.mrf.mxu1 }
 0x132   :  { %v315_v1 = vsub.f32 0.0, %v307_v63  ;;  %v306_v2 = vmax.f32 %v268_v0, 0.0  ;;  %v3371_v61 = vpop.f32.mrf.mxu0 }
 0x133   :  { %v463_v18 = vpop.f32.mrf.mxu1  ;;  %v283_v63 = vadd.f32 %v3371_v61, %v4162_v59 }
 0x134   :  { %v324_v3 = vmul.f32 1.442695, %v315_v1  ;;  %v314_v4 = vsub.f32 0.0, %v306_v2  ;;  %v4196_v22 = vadd.f32 %v463_v18, %v4153_v57  ;;  %v277_v0 = vpop.f32.mrf.mxu0 }
 0x135   :  { %v465_v24 = vpop.f32.mrf.mxu1  ;;  %v309_v1 = vmax.f32 %v283_v63, 0.0  ;;  %v278_v2 = vadd.f32 %v4162_v59, %v277_v0 }
 0x136   :  { %3594 = vpow2.f32 %v324_v3  ;;  %v322_v5 = vmul.f32 1.442695, %v314_v4  ;;  %v4199_v28 = vadd.f32 %v465_v24, %v4193_v19 }
 0x137   :  { %v469_v31 = vpop.f32.mrf.mxu1 }
 0x138   :  { %3596 = vpow2.f32 %v322_v5  ;;  %v4202_v33 = vadd.f32 %v469_v31, %v4153_v57  ;;  %v317_v5 = vsub.f32 0.0, %v309_v1 }
 0x139   :  { %v471_v37 = vpop.f32.mrf.mxu1 }
 0x13a   :  { %v4205_v40 = vadd.f32 %v471_v37, %v4193_v19  ;;  %v328_v10 = vmul.f32 1.442695, %v317_v5 }
 0x13b   :  { %v475_v42 = vpop.f32.mrf.mxu1 }
 0x13c   :  { %v4208_v46 = vadd.f32 %v475_v42, %v4153_v57  ;;  %3598 = vpow2.f32 %v328_v10 }
 0x13d   :  { %v477_v50 = vpop.f32.mrf.mxu1 }
 0x13e   :  { %v4211_v54 = vadd.f32 %v477_v50, %v4193_v19 }
 0x13f   :  { %v481_v55 = vpop.f32.mrf.mxu1 }
 0x140   :  { %v4214_v56 = vadd.f32 %v481_v55, %v4153_v57 }
 0x141   :  { %v483_v60 = vpop.f32.mrf.mxu1 }
 0x142   :  { %v4217_v62 = vadd.f32 %v483_v60, %v4193_v19 }
 0x143   :  { %v3595_v6 = vpop.eup %3594  ;;  %v487_v3 = vpop.f32.mrf.mxu1 }
 0x144   :  { %340 = vst.msk [vmem:[#allocation2 + $0x8] sm:$0xff] %vm338_vm2, %v3595_v6  ;;  %v4222_v4 = vadd.f32 %v487_v3, %v4153_v57  ;;  %v308_v6 = vmax.f32 %v278_v2, 0.0  ;;  %v4235_v2 = vld [vmem:[#allocation17 + $0x30] sm:$0xff] }
 0x145   :  { %v3597_v7 = vpop.eup %3596 }
 0x146   :  { %339 = vst.msk [vmem:[#allocation2] sm:$0xff] %vm338_vm2, %v3597_v7  ;;  %v489_v7 = vpop.f32.mrf.mxu1  ;;  %v316_v12 = vsub.f32 0.0, %v308_v6 }
 0x148   :  { %v326_v31 = vmul.f32 1.442695, %v316_v12  ;;  %v493_v50 = vpop.f32.mrf.mxu1 }
 0x149   :  { %v4230_v55 = vadd.f32 %v493_v50, %v4153_v57  ;;  %v4241_v57 = vld [vmem:[#allocation17 + $0x20] sm:$0xff] }
 0x14a   :  { %3600 = vpow2.f32 %v326_v31  ;;  %v495_v63 = vpop.f32.mrf.mxu1  ;;  %v4245_v31 = vld [vmem:[#allocation17 + $0x18] sm:$0xff] }
 0x14b   :  { %v4233_v1 = vadd.f32 %v495_v63, %v4193_v19 }
 0x14d   :  { %v522_v8 = vld [vmem:[#allocation2] sm:$0xff] }
 0x14e   :  { %v523_v9 = vmul.f32 0.0, %v522_v8  ;;  %v3374_v8 = vpop.f32.mrf.mxu0 }
 0x14f   :  { %v293_v18 = vadd.f32 %v3374_v8, %v4162_v59  ;;  %v4239_v8 = vld [vmem:[#allocation17 + $0x28] sm:$0xff] }
 0x150   :  { %3210 = vmatmul.mubr.msk.f32.vlgmr.msra.gmra.mxu1 %vm338_vm2, %v523_v9  ;;  %3395 = vmatmul.mubr.msk.f32.vlgmr.msra.gmra.mxu0 %vm338_vm2, %v523_v9  ;;  %v4225_v9 = vadd.f32 %v489_v7, %v4193_v19  ;;  %v287_v24 = vpop.f32.mrf.mxu0 }
 0x151   :  { %779 = vmatprep.mubr.f32.mxu1 %v4894_v14  ;;  %874 = vmatpush1.msra.mxu0 %v4061_v23  ;;  %v311_v37 = vmax.f32 %v293_v18, 0.0  ;;  %v288_v42 = vadd.f32 %v4162_v59, %v287_v24  ;;  %v499_v24 = vpop.f32.mrf.mxu1 }
 0x152   :  { %875 = vmatprep.subr.mxu0 %v4065_v25  ;;  %921 = vmatprep.mubr.f32.mxu0 %v4894_v14  ;;  %v3377_v0 = vpop.f32.mrf.mxu0  ;;  %v520_v24 = vld [vmem:[#allocation6] sm:$0xff] }
 0x153   :  { %876 = vmatpush1.msra.mxu0 %v4071_v27  ;;  %v319_v60 = vsub.f32 0.0, %v311_v37  ;;  %v310_v61 = vmax.f32 %v288_v42, 0.0  ;;  %v303_v6 = vadd.f32 %v3377_v0, %v4162_v59  ;;  %740 = vmatpush1.msra.mxu1 %v4235_v2  ;;  %v4248_v37 = vld [vmem:[#allocation17 + $0x10] sm:$0xff] }
 0x154   :  { %877 = vmatprep.subr.mxu0 %v4075_v29  ;;  %v297_v7 = vpop.f32.mrf.mxu0  ;;  %741 = vmatprep.subr.mxu1 %v4239_v8 }
 0x155   :  { %878 = vmatpush1.msra.mxu0 %v4083_v32  ;;  %v332_v3 = vmul.f32 1.442695, %v319_v60  ;;  %v318_v5 = vsub.f32 0.0, %v310_v61  ;;  %v313_v12 = vmax.f32 %v303_v6, 0.0  ;;  %v298_v18 = vadd.f32 %v4162_v59, %v297_v7  ;;  %742 = vmatpush1.msra.mxu1 %v4241_v57  ;;  %v501_v60 = vpop.f32.mrf.mxu1  ;;  %v4251_v61 = vld [vmem:[#allocation17 + $0x8] sm:$0xff]  ;;  %v4254_v59 = vld [vmem:[#allocation17] sm:$0xff] }
 0x156   :  { %879 = vmatprep.subr.mxu0 %v4087_v34  ;;  %743 = vmatprep.subr.mxu1 %v4245_v31 }
 0x157   :  { %880 = vmatpush1.msra.mxu0 %v4095_v36  ;;  %3602 = vpow2.f32 %v332_v3  ;;  %v330_v10 = vmul.f32 1.442695, %v318_v5  ;;  %v321_v42 = vsub.f32 0.0, %v313_v12  ;;  %v312_v50 = vmax.f32 %v298_v18, 0.0  ;;  %744 = vmatpush1.msra.mxu1 %v4248_v37  ;;  %v3599_v5 = vpop.eup %3598 }
 0x158   :  { %881 = vmatprep.subr.mxu0 %v4099_v38  ;;  %745 = vmatprep.subr.mxu1 %v4251_v61  ;;  %342 = vst.msk [vmem:[#allocation2 + $0x18] sm:$0xff] %vm338_vm2, %v3599_v5  ;;  %v3601_v6 = vpop.eup %3600 }
 0x159   :  { %882 = vmatpush1.msra.mxu0 %v4107_v41  ;;  %3604 = vpow2.f32 %v330_v10  ;;  %v336_v63 = vmul.f32 1.442695, %v321_v42  ;;  %v320_v0 = vsub.f32 0.0, %v312_v50  ;;  %746 = vmatpush1.msra.mxu1 %v4254_v59  ;;  %341 = vst.msk [vmem:[#allocation2 + $0x10] sm:$0xff] %vm338_vm2, %v3601_v6  ;;  %v4268_v42 = vld [vmem:[%s4888_s7] ss:$0 sm:$0xff] }
 0x15a   :  { %883 = vmatprep.subr.mxu0 %v4111_v43  ;;  %3397 = vmatprep.subr.mxu1 %v4894_v14  ;;  %v701_v50 = vsub.f32 1.0, %v4037_v15 }
 0x15b   :  { %884 = vmatpush1.msra.mxu0 %v4119_v45  ;;  %3606 = vpow2.f32 %v336_v63  ;;  %v334_v3 = vmul.f32 1.442695, %v320_v0  ;;  %v700_v0 = vmul.f32 %v520_v24, %v4037_v15  ;;  %v460_v24 = vadd.f32 %v4191_v13, %v4193_v19 }
 0x15c   :  { %885 = vmatprep.subr.mxu0 %v4123_v47 }
 0x15d   :  { %886 = vmatpush1.msra.mxu0 %v4129_v49  ;;  %3608 = vpow2.f32 %v334_v3 }
 0x15e   :  { %887 = vmatprep.subr.mxu0 %v4133_v51 }
 0x15f   :  { %888 = vmatpush1.msra.mxu0 %v4139_v53 }
 0x160   :  { %1045 = vmatprep.subr.mxu0 %v4156_v58 }
 0x164   :  { %v3603_v7 = vpop.eup %3602 }
 0x165   :  { %344 = vst.msk [vmem:[#allocation2 + $0x28] sm:$0xff] %vm338_vm2, %v3603_v7 }
 0x166   :  { %v3605_v10 = vpop.eup %3604 }
 0x167   :  { %343 = vst.msk [vmem:[#allocation2 + $0x20] sm:$0xff] %vm338_vm2, %v3605_v10 }
 0x168   :  { %v3607_v12 = vpop.eup %3606 }
 0x169   :  { %346 = vst.msk [vmem:[#allocation2 + $0x38] sm:$0xff] %vm338_vm2, %v3607_v12 }
 0x16a   :  { %v3609_v18 = vpop.eup %3608 }
 0x16b   :  { %345 = vst.msk [vmem:[#allocation2 + $0x30] sm:$0xff] %vm338_vm2, %v3609_v18 }
 0x210   :  { %v688_v60 = vpop.f32.mrf.mxu0  ;;  %v617_v15 = vpop.f32.mrf.mxu1 }
 0x211   :  { %v699_v63 = vadd.f32 %v4268_v42, %v688_v60 }
 0x212   :  { %v3396_v3 = vpop.f32.mrf.mxu0  ;;  %v619_v7 = vpop.f32.mrf.mxu1 }
 0x213   :  { %v702_v5 = vmul.f32 %v701_v50, %v699_v63  ;;  %820 = vst.msk [vmem:[#allocation4] sm:$0xff] %vm176_vm0, %v699_v63 }
 0x215   :  { %v703_v6 = vadd.f32 %v702_v5, %v700_v0 }
 0x217   :  { %822 = vst.msk [vmem:[#allocation5 + $0x38] sm:$0xff] %vm176_vm0, %v703_v6  ;;  %3213 = vmatmul.mubr.msk.f32.vlgmr.msra.gmra.mxu1 %vm176_vm0, %v703_v6 }
 0x218   :  { %3398 = vmatpush3.msra.mxu1 %v4059_v21  ;;  %3413 = vmatprep.mubr.msk.f32.mxu1 %vm3928_vm1, %v4894_v14 }
 0x219   :  { %3399 = vmatprep.subr.mxu1 %v4894_v14 }
 0x21a   :  { %3400 = vmatpush3.msra.mxu1 %v4069_v26 }
 0x21b   :  { %3401 = vmatprep.subr.mxu1 %v4894_v14 }
 0x21c   :  { %3402 = vmatpush3.msra.mxu1 %v4079_v30 }
 0x21d   :  { %3403 = vmatprep.subr.mxu1 %v4894_v14 }
 0x21e   :  { %3404 = vmatpush3.msra.mxu1 %v4091_v35 }
 0x21f   :  { %3405 = vmatprep.subr.mxu1 %v4894_v14 }
 0x220   :  { %3406 = vmatpush3.msra.mxu1 %v4103_v39 }
 0x221   :  { %3407 = vmatprep.subr.mxu1 %v4894_v14 }
 0x222   :  { %3408 = vmatpush3.msra.mxu1 %v4115_v44 }
 0x223   :  { %3409 = vmatprep.subr.mxu1 %v4894_v14 }
 0x224   :  { %3410 = vmatpush3.msra.mxu1 %v4127_v48 }
 0x225   :  { %3411 = vmatprep.subr.mxu1 %v4894_v14 }
 0x226   :  { %3412 = vmatpush3.msra.mxu1 %v4137_v52 }
 0x227   :  { %1181 = vmatprep.subr.mxu1 %v4055_v20 }
 0x2d7   :  { %v781_v10 = vpop.f32.mrf.mxu1 }
 0x2d8   :  { %v782_v12 = vadd.f32 %v781_v10, %v617_v15 }
 0x2d9   :  { %v783_v18 = vpop.f32.mrf.mxu1 }
 0x2da   :  { %v788_v50 = vadd.f32 %v782_v12, %v4189_v11  ;;  %v784_v60 = vadd.f32 %v783_v18, %v619_v7 }
 0x2dc   :  { %v789_v63 = vadd.f32 %v784_v60, %v460_v24  ;;  %v3214_v3 = vmul.f32 -1.442695, %v788_v50 }
 0x2de   :  { %3610 = vtanh.f32 %v789_v63  ;;  %v3215_v12 = vmul.f32 -1.442695, %v789_v63  ;;  %v824_v63 = vld [vmem:[#allocation6 + $0x8] sm:$0xff] }
 0x2df   :  { %3612 = vpow2.f32 %v3214_v3  ;;  %v828_v3 = vld [vmem:[#allocation2 + $0x8] sm:$0xff] }
 0x2eb   :  { %v3611_v0 = vpop.eup %3610 }
 0x2ec   :  { %805 = vrot.lane.b32.xlu0 %v3611_v0, %s3929_s6  ;;  %v3613_v5 = vpop.eup %3612 }
 0x2ed   :  { %v796_v6 = vadd.f32 1.0, %v3613_v5 }
 0x2ef   :  { %3614 = vrcp.f32 %v796_v6  ;;  %v1007_v6 = vsub.f32 1.0, %v4043_v16 }
 0x2fc   :  { %v3615_v14 = vpop.eup %3614 }
 0x2fd   :  { %v803_v13 = vmul.f32 0.0, %v3615_v14 }
 0x35e   :  { %v806_v15 = vpop.permute.xlu0 %805 }
 0x35f   :  { %v808_v10 = vmul.f32 %v3615_v14, %v806_v15  ;;  %v4896_v14 = vmov 0.0  }
 0x361   :  { %810 = vrot.lane.b32.xlu0 %v808_v10, %s3929_s6 }
 0x3d3   :  { %v811_v19 = vpop.permute.xlu0 %810 }
 0x3d4   :  { %v4299_v11 = vadd.f32 %v811_v19, %v803_v13  ;;  %v1006_v13 = vmul.f32 %v824_v63, %v4043_v16 }
 0x3d6   :  { %3616 = vtanh.f32 %v4299_v11 }
 0x3d7   :  { %3618 = vpow2.f32 %v3215_v12 }
 0x3e3   :  { %v3617_v7 = vpop.eup %3616 }
 0x3e4   :  { %816 = vrot.lane.b32.xlu1 %v3617_v7, %s3929_s6  ;;  %v3619_v18 = vpop.eup %3618 }
 0x3e5   :  { %v797_v24 = vadd.f32 1.0, %v3619_v18 }
 0x3e7   :  { %3620 = vrcp.f32 %v797_v24 }
 0x3f4   :  { %v3621_v50 = vpop.eup %3620 }
 0x456   :  { %v817_v60 = vpop.permute.xlu1 %816 }
 0x457   :  { %v819_v0 = vmul.f32 %v3621_v50, %v817_v60 }
 0x459   :  { %v829_v5 = vmul.f32 %v828_v3, %v819_v0 }
 0x45b   :  { %3216 = vmatmul.mubr.msk.f32.vlgmr.msra.gmra.mxu0 %vm338_vm2, %v829_v5  ;;  %3414 = vmatmul.mubr.msk.f32.vlgmr.msra.gmra.mxu1 %vm338_vm2, %v829_v5 }
 0x45c   :  { %1046 = vmatpush1.msra.mxu0 %v4235_v2  ;;  %1085 = vmatprep.mubr.f32.mxu0 %v4896_v14 }
 0x45d   :  { %1047 = vmatprep.subr.mxu0 %v4239_v8  ;;  %1182 = vmatpush1.msra.mxu1 %v4061_v23 }
 0x45e   :  { %1048 = vmatpush1.msra.mxu0 %v4241_v57  ;;  %1183 = vmatprep.subr.mxu1 %v4065_v25 }
 0x45f   :  { %1049 = vmatprep.subr.mxu0 %v4245_v31  ;;  %1184 = vmatpush1.msra.mxu1 %v4071_v27 }
 0x460   :  { %1050 = vmatpush1.msra.mxu0 %v4248_v37  ;;  %1185 = vmatprep.subr.mxu1 %v4075_v29 }
 0x461   :  { %1051 = vmatprep.subr.mxu0 %v4251_v61  ;;  %1186 = vmatpush1.msra.mxu1 %v4083_v32 }
 0x462   :  { %1052 = vmatpush1.msra.mxu0 %v4254_v59  ;;  %1187 = vmatprep.subr.mxu1 %v4087_v34 }
 0x463   :  { %3416 = vmatprep.subr.mxu0 %v4896_v14  ;;  %1188 = vmatpush1.msra.mxu1 %v4095_v36 }
 0x464   :  { %1189 = vmatprep.subr.mxu1 %v4099_v38  ;;  %1229 = vmatprep.mubr.f32.mxu1 %v4896_v14 }
 0x465   :  { %1190 = vmatpush1.msra.mxu1 %v4107_v41 }
 0x466   :  { %1191 = vmatprep.subr.mxu1 %v4111_v43 }
 0x467   :  { %1192 = vmatpush1.msra.mxu1 %v4119_v45 }
 0x468   :  { %1193 = vmatprep.subr.mxu1 %v4123_v47 }
 0x469   :  { %1194 = vmatpush1.msra.mxu1 %v4129_v49 }
 0x46a   :  { %1195 = vmatprep.subr.mxu1 %v4133_v51 }
 0x46b   :  { %1196 = vmatpush1.msra.mxu1 %v4139_v53 }
 0x46c   :  { %1353 = vmatprep.subr.mxu1 %v4156_v58 }
 0x51b   :  { %v994_v15 = vpop.f32.mrf.mxu1  ;;  %v923_v16 = vpop.f32.mrf.mxu0 }
 0x51c   :  { %v1005_v10 = vadd.f32 %v4268_v42, %v994_v15 }
 0x51d   :  { %v3415_v19 = vpop.f32.mrf.mxu1  ;;  %v925_v18 = vpop.f32.mrf.mxu0 }
 0x51e   :  { %v1008_v7 = vmul.f32 %v1007_v6, %v1005_v10  ;;  %1128 = vst.msk [vmem:[#allocation4 + $0x8] sm:$0xff] %vm176_vm0, %v1005_v10 }
 0x520   :  { %v1009_v12 = vadd.f32 %v1008_v7, %v1006_v13 }
 0x522   :  { %1130 = vst.msk [vmem:[#allocation5 + $0x30] sm:$0xff] %vm176_vm0, %v1009_v12  ;;  %3219 = vmatmul.mubr.msk.f32.vlgmr.msra.gmra.mxu0 %vm176_vm0, %v1009_v12 }
 0x523   :  { %3417 = vmatpush3.msra.mxu0 %v4059_v21  ;;  %3432 = vmatprep.mubr.msk.f32.mxu0 %vm3928_vm1, %v4896_v14 }
 0x524   :  { %3418 = vmatprep.subr.mxu0 %v4896_v14 }
 0x525   :  { %3419 = vmatpush3.msra.mxu0 %v4069_v26 }
 0x526   :  { %3420 = vmatprep.subr.mxu0 %v4896_v14 }
 0x527   :  { %3421 = vmatpush3.msra.mxu0 %v4079_v30 }
 0x528   :  { %3422 = vmatprep.subr.mxu0 %v4896_v14 }
 0x529   :  { %3423 = vmatpush3.msra.mxu0 %v4091_v35 }
 0x52a   :  { %3424 = vmatprep.subr.mxu0 %v4896_v14 }
 0x52b   :  { %3425 = vmatpush3.msra.mxu0 %v4103_v39 }
 0x52c   :  { %3426 = vmatprep.subr.mxu0 %v4896_v14 }
 0x52d   :  { %3427 = vmatpush3.msra.mxu0 %v4115_v44 }
 0x52e   :  { %3428 = vmatprep.subr.mxu0 %v4896_v14 }
 0x52f   :  { %3429 = vmatpush3.msra.mxu0 %v4127_v48 }
 0x530   :  { %3430 = vmatprep.subr.mxu0 %v4896_v14 }
 0x531   :  { %3431 = vmatpush3.msra.mxu0 %v4137_v52 }
 0x532   :  { %1489 = vmatprep.subr.mxu0 %v4055_v20 }
 0x5e2   :  { %v1087_v24 = vpop.f32.mrf.mxu0 }
 0x5e3   :  { %v1088_v50 = vadd.f32 %v1087_v24, %v923_v16 }
 0x5e4   :  { %v1089_v60 = vpop.f32.mrf.mxu0 }
 0x5e5   :  { %v1095_v0 = vadd.f32 %v1088_v50, %v4196_v22  ;;  %v1090_v3 = vadd.f32 %v1089_v60, %v925_v18 }
 0x5e7   :  { %v1096_v5 = vadd.f32 %v1090_v3, %v4199_v28  ;;  %v3220_v6 = vmul.f32 -1.442695, %v1095_v0  ;;  %v1136_v3 = vld [vmem:[#allocation2 + $0x10] sm:$0xff] }
 0x5e9   :  { %3622 = vtanh.f32 %v1096_v5  ;;  %v3221_v16 = vmul.f32 -1.442695, %v1096_v5 }
 0x5ea   :  { %3624 = vpow2.f32 %v3220_v6 }
 0x5f6   :  { %v3623_v63 = vpop.eup %3622 }
 0x5f7   :  { %1112 = vrot.lane.b32.xlu1 %v3623_v63, %s3929_s6  ;;  %v3625_v15 = vpop.eup %3624 }
 0x5f8   :  { %v1103_v10 = vadd.f32 1.0, %v3625_v15 }
 0x5fa   :  { %3626 = vrcp.f32 %v1103_v10 }
 0x607   :  { %v3627_v20 = vpop.eup %3626 }
 0x608   :  { %v1110_v7 = vmul.f32 %v3627_v20, %v4299_v11 }
 0x669   :  { %v1113_v13 = vpop.permute.xlu1 %1112 }
 0x66a   :  { %v1115_v19 = vmul.f32 %v3627_v20, %v1113_v13 }
 0x66c   :  { %1117 = vrot.lane.b32.xlu0 %v1115_v19, %s3929_s6  ;;  %v1444_v19 = vld [vmem:[#allocation2 + $0x18] sm:$0xff] }
 0x6de   :  { %v1118_v22 = vpop.permute.xlu0 %1117 }
 0x6df   :  { %v4360_v12 = vadd.f32 %v1118_v22, %v1110_v7  ;;  %v4436_v22 = vld [vmem:[#allocation9 + $0x18] sm:$0xff] }
 0x6e1   :  { %3628 = vtanh.f32 %v4360_v12 }
 0x6e2   :  { %3630 = vpow2.f32 %v3221_v16 }
 0x6ee   :  { %v3629_v28 = vpop.eup %3628 }
 0x6ef   :  { %1123 = vrot.lane.b32.xlu1 %v3629_v28, %s3929_s6  ;;  %v3631_v18 = vpop.eup %3630  ;;  %v1623_v28 = vsub.f32 1.0, %v4436_v22 }
 0x6f0   :  { %v1104_v24 = vadd.f32 1.0, %v3631_v18 }
 0x6f2   :  { %3632 = vrcp.f32 %v1104_v24 }
 0x6ff   :  { %v3633_v50 = vpop.eup %3632 }
 0x761   :  { %v1124_v60 = vpop.permute.xlu1 %1123 }
 0x762   :  { %v1126_v0 = vmul.f32 %v3633_v50, %v1124_v60 }
 0x764   :  { %v1137_v63 = vmul.f32 %v1136_v3, %v1126_v0 }
 0x766   :  { %3222 = vmatmul.mubr.msk.f32.vlgmr.msra.gmra.mxu1 %vm338_vm2, %v1137_v63  ;;  %3433 = vmatmul.mubr.msk.f32.vlgmr.msra.gmra.mxu0 %vm338_vm2, %v1137_v63 }
 0x767   :  { %1354 = vmatpush1.msra.mxu1 %v4235_v2  ;;  %1393 = vmatprep.mubr.f32.mxu1 %v4896_v14 }
 0x768   :  { %1355 = vmatprep.subr.mxu1 %v4239_v8  ;;  %1490 = vmatpush1.msra.mxu0 %v4061_v23  ;;  %v1132_v23 = vld [vmem:[#allocation6 + $0x10] sm:$0xff] }
 0x769   :  { %1356 = vmatpush1.msra.mxu1 %v4241_v57  ;;  %1491 = vmatprep.subr.mxu0 %v4065_v25  ;;  %v1315_v25 = vsub.f32 1.0, %v4048_v17 }
 0x76a   :  { %1357 = vmatprep.subr.mxu1 %v4245_v31  ;;  %1492 = vmatpush1.msra.mxu0 %v4071_v27 }
 0x76b   :  { %1358 = vmatpush1.msra.mxu1 %v4248_v37  ;;  %1493 = vmatprep.subr.mxu0 %v4075_v29 }
 0x76c   :  { %1359 = vmatprep.subr.mxu1 %v4251_v61  ;;  %1494 = vmatpush1.msra.mxu0 %v4083_v32  ;;  %v1314_v32 = vmul.f32 %v1132_v23, %v4048_v17 }
 0x76d   :  { %1360 = vmatpush1.msra.mxu1 %v4254_v59  ;;  %1495 = vmatprep.subr.mxu0 %v4087_v34 }
 0x76e   :  { %3435 = vmatprep.subr.mxu1 %v4896_v14  ;;  %1496 = vmatpush1.msra.mxu0 %v4095_v36 }
 0x76f   :  { %1497 = vmatprep.subr.mxu0 %v4099_v38  ;;  %1537 = vmatprep.mubr.f32.mxu0 %v4896_v14 }
 0x770   :  { %1498 = vmatpush1.msra.mxu0 %v4107_v41 }
 0x771   :  { %1499 = vmatprep.subr.mxu0 %v4111_v43 }
 0x772   :  { %1500 = vmatpush1.msra.mxu0 %v4119_v45 }
 0x773   :  { %1501 = vmatprep.subr.mxu0 %v4123_v47 }
 0x774   :  { %1502 = vmatpush1.msra.mxu0 %v4129_v49 }
 0x775   :  { %1503 = vmatprep.subr.mxu0 %v4133_v51 }
 0x776   :  { %1504 = vmatpush1.msra.mxu0 %v4139_v53 }
 0x777   :  { %1661 = vmatprep.subr.mxu0 %v4156_v58 }
 0x826   :  { %v1302_v27 = vpop.f32.mrf.mxu0  ;;  %v1231_v17 = vpop.f32.mrf.mxu1 }
 0x827   :  { %v1313_v29 = vadd.f32 %v4268_v42, %v1302_v27 }
 0x828   :  { %v3434_v34 = vpop.f32.mrf.mxu0 }
 0x829   :  { %v1316_v36 = vmul.f32 %v1315_v25, %v1313_v29  ;;  %1436 = vst.msk [vmem:[#allocation4 + $0x10] sm:$0xff] %vm176_vm0, %v1313_v29 }
 0x82b   :  { %v1317_v38 = vadd.f32 %v1316_v36, %v1314_v32 }
 0x82d   :  { %1438 = vst.msk [vmem:[#allocation5 + $0x28] sm:$0xff] %vm176_vm0, %v1317_v38  ;;  %3225 = vmatmul.mubr.msk.f32.vlgmr.msra.gmra.mxu1 %vm176_vm0, %v1317_v38 }
 0x82e   :  { %3436 = vmatpush3.msra.mxu1 %v4059_v21  ;;  %3451 = vmatprep.mubr.msk.f32.mxu1 %vm3928_vm1, %v4896_v14  ;;  %v1233_v21 = vpop.f32.mrf.mxu1 }
 0x82f   :  { %3437 = vmatprep.subr.mxu1 %v4896_v14 }
 0x830   :  { %3438 = vmatpush3.msra.mxu1 %v4069_v26 }
 0x831   :  { %3439 = vmatprep.subr.mxu1 %v4896_v14 }
 0x832   :  { %3440 = vmatpush3.msra.mxu1 %v4079_v30 }
 0x833   :  { %3441 = vmatprep.subr.mxu1 %v4896_v14 }
 0x834   :  { %3442 = vmatpush3.msra.mxu1 %v4091_v35 }
 0x835   :  { %3443 = vmatprep.subr.mxu1 %v4896_v14 }
 0x836   :  { %3444 = vmatpush3.msra.mxu1 %v4103_v39 }
 0x837   :  { %3445 = vmatprep.subr.mxu1 %v4896_v14 }
 0x838   :  { %3446 = vmatpush3.msra.mxu1 %v4115_v44 }
 0x839   :  { %3447 = vmatprep.subr.mxu1 %v4896_v14 }
 0x83a   :  { %3448 = vmatpush3.msra.mxu1 %v4127_v48 }
 0x83b   :  { %3449 = vmatprep.subr.mxu1 %v4896_v14 }
 0x83c   :  { %3450 = vmatpush3.msra.mxu1 %v4137_v52 }
 0x8ed   :  { %v1395_v26 = vpop.f32.mrf.mxu1 }
 0x8ee   :  { %v1396_v30 = vadd.f32 %v1395_v26, %v1231_v17 }
 0x8ef   :  { %v1397_v35 = vpop.f32.mrf.mxu1 }
 0x8f0   :  { %v1403_v41 = vadd.f32 %v1396_v30, %v4202_v33  ;;  %v1398_v39 = vadd.f32 %v1397_v35, %v1233_v21 }
 0x8f2   :  { %v1404_v43 = vadd.f32 %v1398_v39, %v4205_v40  ;;  %v3226_v45 = vmul.f32 -1.442695, %v1403_v41 }
 0x8f4   :  { %3634 = vtanh.f32 %v1404_v43  ;;  %v3227_v5 = vmul.f32 -1.442695, %v1404_v43  ;;  %v4460_v43 = vld [vmem:[#allocation15 + $0xa8] sm:$0xff] }
 0x8f5   :  { %3636 = vpow2.f32 %v3226_v45  ;;  %v4468_v45 = vld [vmem:[#allocation15 + $0x90] sm:$0xff] }
 0x901   :  { %v3635_v44 = vpop.eup %3634 }
 0x902   :  { %1420 = vrot.lane.b32.xlu0 %v3635_v44, %s3929_s6  ;;  %v3637_v47 = vpop.eup %3636  ;;  %v4466_v44 = vld [vmem:[#allocation15 + $0x98] sm:$0xff] }
 0x903   :  { %v1411_v48 = vadd.f32 1.0, %v3637_v47  ;;  %v4470_v47 = vld [vmem:[#allocation15 + $0xa0] sm:$0xff] }
 0x905   :  { %3638 = vrcp.f32 %v1411_v48  ;;  %v4474_v48 = vld [vmem:[#allocation15 + $0x80] sm:$0xff] }
 0x912   :  { %v3639_v49 = vpop.eup %3638 }
 0x913   :  { %v1418_v53 = vmul.f32 %v3639_v49, %v4360_v12  ;;  %v1440_v12 = vld [vmem:[#allocation6 + $0x18] sm:$0xff] }
 0x914   :  { %v1622_v24 = vmul.f32 %v4436_v22, %v1440_v12  ;;  %v4522_v12 = vld [vmem:[#allocation15 + $0x20] sm:$0xff] }
 0x974   :  { %v1421_v51 = vpop.permute.xlu0 %1420 }
 0x975   :  { %v1423_v52 = vmul.f32 %v3639_v49, %v1421_v51  ;;  %v4476_v49 = vld [vmem:[#allocation15 + $0x88] sm:$0xff]  ;;  %v4480_v51 = vld [vmem:[#allocation15 + $0x78] sm:$0xff] }
 0x977   :  { %1425 = vrot.lane.b32.xlu1 %v1423_v52, %s3929_s6  ;;  %v4484_v52 = vld [vmem:[#allocation15 + $0x68] sm:$0xff] }
 0x9e9   :  { %v1426_v33 = vpop.permute.xlu1 %1425 }
 0x9ea   :  { %v4420_v11 = vadd.f32 %v1426_v33, %v1418_v53  ;;  %v4486_v53 = vld [vmem:[#allocation15 + $0x70] sm:$0xff]  ;;  %v4490_v33 = vld [vmem:[#allocation15 + $0x60] sm:$0xff] }
 0x9ec   :  { %3640 = vtanh.f32 %v4420_v11 }
 0x9ed   :  { %3642 = vpow2.f32 %v3227_v5  ;;  %v4496_v5 = vld [vmem:[#allocation15 + $0x58] sm:$0xff] }
 0x9f9   :  { %v3641_v40 = vpop.eup %3640 }
 0x9fa   :  { %1431 = vrot.lane.b32.xlu0 %v3641_v40, %s3929_s6  ;;  %v3643_v6 = vpop.eup %3642  ;;  %v4494_v40 = vld [vmem:[#allocation15 + $0x50] sm:$0xff] }
 0x9fb   :  { %v1412_v15 = vadd.f32 1.0, %v3643_v6  ;;  %v4500_v6 = vld [vmem:[#allocation15 + $0x48] sm:$0xff] }
 0x9fd   :  { %3644 = vrcp.f32 %v1412_v15  ;;  %v4504_v15 = vld [vmem:[#allocation15 + $0x38] sm:$0xff] }
 0xa0a   :  { %v3645_v10 = vpop.eup %3644 }
 0xa6c   :  { %v1432_v20 = vpop.permute.xlu0 %1431 }
 0xa6d   :  { %v1434_v13 = vmul.f32 %v3645_v10, %v1432_v20  ;;  %v4506_v10 = vld [vmem:[#allocation15 + $0x40] sm:$0xff]  ;;  %v4510_v20 = vld [vmem:[#allocation15 + $0x30] sm:$0xff] }
 0xa6f   :  { %v1445_v7 = vmul.f32 %v1444_v19, %v1434_v13 }
 0xa71   :  { %3228 = vmatmul.mubr.msk.f32.vlgmr.msra.gmra.mxu0 %vm338_vm2, %v1445_v7  ;;  %3452 = vmatmul.mubr.msk.f32.vlgmr.msra.gmra.mxu1 %vm338_vm2, %v1445_v7 }
 0xa72   :  { %1662 = vmatpush1.msra.mxu0 %v4235_v2  ;;  %1701 = vmatprep.mubr.f32.mxu0 %v4896_v14 }
 0xa73   :  { %1663 = vmatprep.subr.mxu0 %v4239_v8  ;;  %1845 = vmatprep.mubr.f32.mxu1 %v4896_v14 }
 0xa74   :  { %1664 = vmatpush1.msra.mxu0 %v4241_v57 }
 0xa75   :  { %1665 = vmatprep.subr.mxu0 %v4245_v31 }
 0xa76   :  { %1666 = vmatpush1.msra.mxu0 %v4248_v37 }
 0xa77   :  { %1667 = vmatprep.subr.mxu0 %v4251_v61 }
 0xa78   :  { %1668 = vmatpush1.msra.mxu0 %v4254_v59 }
 0xa79   :  { %3454 = vmatprep.subr.mxu0 %v4896_v14 }
 0xb31   :  { %v1610_v16 = vpop.f32.mrf.mxu1  ;;  %v1539_v23 = vpop.f32.mrf.mxu0 }
 0xb32   :  { %v1621_v18 = vadd.f32 %v4268_v42, %v1610_v16  ;;  %v4527_v16 = vld [vmem:[#allocation15 + $0x28] sm:$0xff] }
 0xb33   :  { %v3453_v50 = vpop.f32.mrf.mxu1  ;;  %v1541_v25 = vpop.f32.mrf.mxu0 }
 0xb34   :  { %v1624_v60 = vmul.f32 %v1623_v28, %v1621_v18  ;;  %1744 = vst.msk [vmem:[#allocation4 + $0x18] sm:$0xff] %vm176_vm0, %v1621_v18  ;;  %v4531_v18 = vld [vmem:[#allocation15 + $0x8] sm:$0xff] }
 0xb36   :  { %v1625_v0 = vadd.f32 %v1624_v60, %v1622_v24  ;;  %v4537_v24 = vld [vmem:[#allocation15 + $0x10] sm:$0xff] }
 0xb38   :  { %1746 = vst.msk [vmem:[#allocation5 + $0x20] sm:$0xff] %vm176_vm0, %v1625_v0  ;;  %3231 = vmatmul.mubr.msk.f32.vlgmr.msra.gmra.mxu0 %vm176_vm0, %v1625_v0 }
 0xb39   :  { %3470 = vmatprep.mubr.msk.f32.mxu0 %vm3928_vm1, %v4896_v14 }
 0xb3b   :  { %v4446_v3 = vld [vmem:[#allocation4 + $0x18] sm:$0xff] }
 0xb3c   :  { %v4449_v63 = vmul.f32 %v4446_v3, %v1623_v28  ;;  %v4525_v28 = vld [vmem:[#allocation15 + $0x18] sm:$0xff] }
 0xbf8   :  { %v1703_v27 = vpop.f32.mrf.mxu0 }
 0xbf9   :  { %v1704_v29 = vadd.f32 %v1703_v27, %v1539_v23 }
 0xbfa   :  { %v1705_v32 = vpop.f32.mrf.mxu0 }
 0xbfb   :  { %v1711_v34 = vadd.f32 %v1704_v29, %v4208_v46  ;;  %v1706_v36 = vadd.f32 %v1705_v32, %v1541_v25  ;;  %v4458_v46 = vld [vmem:[#allocation15 + $0xb0] sm:$0xff]  ;;  %v1752_v32 = vld [vmem:[#allocation2 + $0x20] sm:$0xff] }
 0xbfc   :  { %1797 = vmatprep.subr.mxu1 %v4458_v46 }
 0xbfd   :  { %v4453_v38 = vadd.f32 %v1706_v36, %v4211_v54  ;;  %v3232_v21 = vmul.f32 -1.442695, %v1711_v34  ;;  %v4462_v54 = vld [vmem:[#allocation15 + $0xb8] sm:$0xff]  ;;  %1798 = vmatpush1.msra.mxu1 %v4460_v43 }
 0xbfe   :  { %3455 = vmatpush3.msra.mxu0 %v4462_v54  ;;  %1799 = vmatprep.subr.mxu1 %v4466_v44 }
 0xbff   :  { %3646 = vtanh.f32 %v4453_v38  ;;  %3456 = vmatprep.subr.mxu0 %v4896_v14  ;;  %1800 = vmatpush1.msra.mxu1 %v4468_v45  ;;  %v3233_v60 = vmul.f32 -1.442695, %v4453_v38 }
 0xc00   :  { %3648 = vpow2.f32 %v3232_v21  ;;  %3457 = vmatpush3.msra.mxu0 %v4470_v47  ;;  %1801 = vmatprep.subr.mxu1 %v4474_v48 }
 0xc01   :  { %3458 = vmatprep.subr.mxu0 %v4896_v14  ;;  %1802 = vmatpush1.msra.mxu1 %v4480_v51 }
 0xc02   :  { %3459 = vmatpush3.msra.mxu0 %v4476_v49  ;;  %1803 = vmatprep.subr.mxu1 %v4484_v52 }
 0xc03   :  { %3460 = vmatprep.subr.mxu0 %v4896_v14  ;;  %1804 = vmatpush1.msra.mxu1 %v4490_v33 }
 0xc04   :  { %3461 = vmatpush3.msra.mxu0 %v4486_v53  ;;  %1805 = vmatprep.subr.mxu1 %v4494_v40 }
 0xc05   :  { %3462 = vmatprep.subr.mxu0 %v4896_v14  ;;  %1806 = vmatpush1.msra.mxu1 %v4500_v6 }
 0xc06   :  { %3463 = vmatpush3.msra.mxu0 %v4496_v5  ;;  %1807 = vmatprep.subr.mxu1 %v4504_v15 }
 0xc07   :  { %3464 = vmatprep.subr.mxu0 %v4896_v14  ;;  %1808 = vmatpush1.msra.mxu1 %v4510_v20 }
 0xc08   :  { %3465 = vmatpush3.msra.mxu0 %v4506_v10  ;;  %1809 = vmatprep.subr.mxu1 %v4522_v12 }
 0xc09   :  { %3466 = vmatprep.subr.mxu0 %v4896_v14  ;;  %1810 = vmatpush1.msra.mxu1 %v4525_v28 }
 0xc0a   :  { %3467 = vmatpush3.msra.mxu0 %v4527_v16  ;;  %1811 = vmatprep.subr.mxu1 %v4531_v18 }
 0xc0b   :  { %3468 = vmatprep.subr.mxu0 %v4896_v14 }
 0xc0c   :  { %v3647_v17 = vpop.eup %3646  ;;  %3469 = vmatpush3.msra.mxu0 %v4537_v24 }
 0xc0d   :  { %1728 = vrot.lane.b32.xlu1 %v3647_v17, %s3929_s6  ;;  %v3649_v26 = vpop.eup %3648  ;;  %2105 = vmatprep.subr.mxu0 %v4458_v46 }
 0xc0e   :  { %v1719_v30 = vadd.f32 1.0, %v3649_v26 }
 0xc10   :  { %3650 = vrcp.f32 %v1719_v30 }
 0xc1d   :  { %v3651_v35 = vpop.eup %3650 }
 0xc1e   :  { %v1726_v13 = vmul.f32 %v3651_v35, %v4420_v11  ;;  %v4535_v11 = vld [vmem:[#allocation15] sm:$0xff] }
 0xc1f   :  { %1812 = vmatpush1.msra.mxu1 %v4535_v11 }
 0xc20   :  { %1969 = vmatprep.subr.mxu1 %v4156_v58  ;;  %v4572_v58 = vld [vmem:[#allocation9 + $0x20] sm:$0xff] }
 0xc7f   :  { %v1729_v41 = vpop.permute.xlu1 %1728 }
 0xc80   :  { %v1731_v39 = vmul.f32 %v3651_v35, %v1729_v41 }
 0xc82   :  { %1733 = vrot.lane.b32.xlu0 %v1731_v39, %s3929_s6 }
 0xcf4   :  { %v1734_v19 = vpop.permute.xlu0 %1733 }
 0xcf5   :  { %v4519_v7 = vadd.f32 %v1734_v19, %v1726_v13 }
 0xcf7   :  { %3652 = vtanh.f32 %v4519_v7 }
 0xcf8   :  { %3654 = vpow2.f32 %v3233_v60 }
 0xd04   :  { %v3653_v50 = vpop.eup %3652 }
 0xd05   :  { %1739 = vrot.lane.b32.xlu1 %v3653_v50, %s3929_s6  ;;  %v3655_v0 = vpop.eup %3654 }
 0xd06   :  { %v1720_v23 = vadd.f32 1.0, %v3655_v0 }
 0xd08   :  { %3656 = vrcp.f32 %v1720_v23 }
 0xd15   :  { %v3657_v25 = vpop.eup %3656 }
 0xd77   :  { %v1740_v27 = vpop.permute.xlu1 %1739 }
 0xd78   :  { %v1742_v29 = vmul.f32 %v3657_v25, %v1740_v27 }
 0xd7a   :  { %v1753_v34 = vmul.f32 %v1752_v32, %v1742_v29 }
 0xd7c   :  { %3234 = vmatmul.mubr.msk.f32.vlgmr.msra.gmra.mxu1 %vm338_vm2, %v1753_v34  ;;  %3471 = vmatmul.mubr.msk.f32.vlgmr.msra.gmra.mxu0 %vm338_vm2, %v1753_v34 }
 0xd7d   :  { %1970 = vmatpush1.msra.mxu1 %v4235_v2  ;;  %2009 = vmatprep.mubr.f32.mxu1 %v4896_v14  ;;  %v4574_v2 = vld [vmem:[#allocation6 + $0x20] sm:$0xff] }
 0xd7e   :  { %1971 = vmatprep.subr.mxu1 %v4239_v8  ;;  %2106 = vmatpush1.msra.mxu0 %v4460_v43  ;;  %v1931_v8 = vsub.f32 1.0, %v4572_v58 }
 0xd7f   :  { %1972 = vmatpush1.msra.mxu1 %v4241_v57  ;;  %2107 = vmatprep.subr.mxu0 %v4466_v44 }
 0xd80   :  { %1973 = vmatprep.subr.mxu1 %v4245_v31  ;;  %2108 = vmatpush1.msra.mxu0 %v4468_v45 }
 0xd81   :  { %1974 = vmatpush1.msra.mxu1 %v4248_v37  ;;  %2109 = vmatprep.subr.mxu0 %v4474_v48  ;;  %v1930_v37 = vmul.f32 %v4572_v58, %v4574_v2 }
 0xd82   :  { %1975 = vmatprep.subr.mxu1 %v4251_v61  ;;  %2110 = vmatpush1.msra.mxu0 %v4480_v51 }
 0xd83   :  { %1976 = vmatpush1.msra.mxu1 %v4254_v59  ;;  %2111 = vmatprep.subr.mxu0 %v4484_v52 }
 0xd84   :  { %3473 = vmatprep.subr.mxu1 %v4896_v14  ;;  %2112 = vmatpush1.msra.mxu0 %v4490_v33 }
 0xd85   :  { %2113 = vmatprep.subr.mxu0 %v4494_v40  ;;  %2153 = vmatprep.mubr.f32.mxu0 %v4896_v14 }
 0xd86   :  { %2114 = vmatpush1.msra.mxu0 %v4500_v6 }
 0xd87   :  { %2115 = vmatprep.subr.mxu0 %v4504_v15 }
 0xd88   :  { %2116 = vmatpush1.msra.mxu0 %v4510_v20 }
 0xd89   :  { %2117 = vmatprep.subr.mxu0 %v4522_v12 }
 0xd8a   :  { %2118 = vmatpush1.msra.mxu0 %v4525_v28 }
 0xd8b   :  { %2119 = vmatprep.subr.mxu0 %v4531_v18 }
 0xd8c   :  { %2120 = vmatpush1.msra.mxu0 %v4535_v11 }
 0xe3c   :  { %v1918_v57 = vpop.f32.mrf.mxu0  ;;  %v1847_v21 = vpop.f32.mrf.mxu1 }
 0xe3d   :  { %v1929_v31 = vadd.f32 %v4268_v42, %v1918_v57 }
 0xe3e   :  { %v3472_v61 = vpop.f32.mrf.mxu0  ;;  %v1849_v26 = vpop.f32.mrf.mxu1 }
 0xe3f   :  { %v1932_v59 = vmul.f32 %v1931_v8, %v1929_v31  ;;  %2052 = vst.msk [vmem:[#allocation4 + $0x20] sm:$0xff] %vm176_vm0, %v1929_v31 }
 0xe41   :  { %v1933_v36 = vadd.f32 %v1932_v59, %v1930_v37 }
 0xe43   :  { %2054 = vst.msk [vmem:[#allocation5 + $0x18] sm:$0xff] %vm176_vm0, %v1933_v36  ;;  %3237 = vmatmul.mubr.msk.f32.vlgmr.msra.gmra.mxu1 %vm176_vm0, %v1933_v36  ;;  %v2060_v36 = vld [vmem:[#allocation2 + $0x28] sm:$0xff] }
 0xe44   :  { %3474 = vmatpush3.msra.mxu1 %v4462_v54  ;;  %3489 = vmatprep.mubr.msk.f32.mxu1 %vm3928_vm1, %v4896_v14 }
 0xe45   :  { %3475 = vmatprep.subr.mxu1 %v4896_v14 }
 0xe46   :  { %3476 = vmatpush3.msra.mxu1 %v4470_v47  ;;  %v4588_v42 = vld [vmem:[#allocation4 + $0x20] sm:$0xff] }
 0xe47   :  { %3477 = vmatprep.subr.mxu1 %v4896_v14  ;;  %v3044_v38 = vmul.f32 %v4588_v42, %v1931_v8 }
 0xe48   :  { %3478 = vmatpush3.msra.mxu1 %v4476_v49 }
 0xe49   :  { %3479 = vmatprep.subr.mxu1 %v4896_v14  ;;  %v4594_v17 = vadd.f32 %v3044_v38, %v1930_v37 }
 0xe4a   :  { %3480 = vmatpush3.msra.mxu1 %v4486_v53 }
 0xe4b   :  { %3481 = vmatprep.subr.mxu1 %v4896_v14 }
 0xe4c   :  { %3482 = vmatpush3.msra.mxu1 %v4496_v5 }
 0xe4d   :  { %3483 = vmatprep.subr.mxu1 %v4896_v14 }
 0xe4e   :  { %3484 = vmatpush3.msra.mxu1 %v4506_v10 }
 0xe4f   :  { %3485 = vmatprep.subr.mxu1 %v4896_v14 }
 0xe50   :  { %3486 = vmatpush3.msra.mxu1 %v4527_v16 }
 0xe51   :  { %3487 = vmatprep.subr.mxu1 %v4896_v14 }
 0xe52   :  { %3488 = vmatpush3.msra.mxu1 %v4537_v24 }
 0xe53   :  { %2413 = vmatprep.subr.mxu1 %v4458_v46 }
 0xf03   :  { %v2011_v30 = vpop.f32.mrf.mxu1 }
 0xf04   :  { %v2012_v35 = vadd.f32 %v2011_v30, %v1847_v21 }
 0xf05   :  { %v2013_v41 = vpop.f32.mrf.mxu1 }
 0xf06   :  { %v2019_v39 = vadd.f32 %v2012_v35, %v4214_v56  ;;  %v2014_v13 = vadd.f32 %v2013_v41, %v1849_v26 }
 0xf08   :  { %v2020_v19 = vadd.f32 %v2014_v13, %v4217_v62  ;;  %v3238_v60 = vmul.f32 -1.442695, %v2019_v39  ;;  %v2249_v62 = vld [vmem:[#allocation17 + $0x38] sm:$0xff] }
 0xf09   :  { %2277 = vmatprep.subr.mxu0 %v2249_v62 }
 0xf0a   :  { %3658 = vtanh.f32 %v2020_v19  ;;  %v3239_v8 = vmul.f32 -1.442695, %v2020_v19 }
 0xf0b   :  { %3660 = vpow2.f32 %v3238_v60 }
 0xf17   :  { %v3659_v50 = vpop.eup %3658 }
 0xf18   :  { %2036 = vrot.lane.b32.xlu0 %v3659_v50, %s3929_s6  ;;  %v3661_v0 = vpop.eup %3660 }
 0xf19   :  { %v2027_v23 = vadd.f32 1.0, %v3661_v0 }
 0xf1b   :  { %3662 = vrcp.f32 %v2027_v23 }
 0xf28   :  { %v3663_v46 = vpop.eup %3662 }
 0xf29   :  { %v2034_v29 = vmul.f32 %v3663_v46, %v4519_v7 }
 0xf8a   :  { %v2037_v25 = vpop.permute.xlu0 %2036 }
 0xf8b   :  { %v2039_v27 = vmul.f32 %v3663_v46, %v2037_v25 }
 0xf8d   :  { %2041 = vrot.lane.b32.xlu1 %v2039_v27, %s3929_s6 }
 0xfff   :  { %v2042_v56 = vpop.permute.xlu1 %2041 }
0x1000   :  { %v4611_v32 = vadd.f32 %v2042_v56, %v2034_v29 }
0x1002   :  { %3664 = vtanh.f32 %v4611_v32 }
0x1003   :  { %3666 = vpow2.f32 %v3239_v8 }
0x100f   :  { %v3665_v34 = vpop.eup %3664 }
0x1010   :  { %2047 = vrot.lane.b32.xlu0 %v3665_v34, %s3929_s6  ;;  %v3667_v57 = vpop.eup %3666 }
0x1011   :  { %v2028_v31 = vadd.f32 1.0, %v3667_v57 }
0x1013   :  { %3668 = vrcp.f32 %v2028_v31 }
0x1020   :  { %v3669_v37 = vpop.eup %3668 }
0x1082   :  { %v2048_v61 = vpop.permute.xlu0 %2047 }
0x1083   :  { %v2050_v59 = vmul.f32 %v3669_v37, %v2048_v61 }
0x1085   :  { %v2061_v7 = vmul.f32 %v2060_v36, %v2050_v59 }
0x1087   :  { %3240 = vmatmul.mubr.msk.f32.vlgmr.msra.gmra.mxu0 %vm338_vm2, %v2061_v7  ;;  %3490 = vmatmul.mubr.msk.f32.vlgmr.msra.gmra.mxu1 %vm338_vm2, %v2061_v7 }
0x1088   :  { %2317 = vmatprep.mubr.f32.mxu0 %v4896_v14  ;;  %2414 = vmatpush1.msra.mxu1 %v4460_v43  ;;  %v4634_v43 = vld [vmem:[#allocation17 + $0x30] sm:$0xff] }
0x1089   :  { %2415 = vmatprep.subr.mxu1 %v4466_v44  ;;  %2461 = vmatprep.mubr.f32.mxu1 %v4896_v14  ;;  %v4637_v44 = vld [vmem:[#allocation17 + $0x28] sm:$0xff] }
0x108a   :  { %2416 = vmatpush1.msra.mxu1 %v4468_v45  ;;  %2278 = vmatpush1.msra.mxu0 %v4634_v43  ;;  %v4639_v45 = vld [vmem:[#allocation17 + $0x20] sm:$0xff] }
0x108b   :  { %2417 = vmatprep.subr.mxu1 %v4474_v48  ;;  %2279 = vmatprep.subr.mxu0 %v4637_v44  ;;  %v4642_v48 = vld [vmem:[#allocation17 + $0x18] sm:$0xff] }
0x108c   :  { %2418 = vmatpush1.msra.mxu1 %v4480_v51  ;;  %2280 = vmatpush1.msra.mxu0 %v4639_v45  ;;  %v4645_v51 = vld [vmem:[#allocation17 + $0x10] sm:$0xff] }
0x108d   :  { %2419 = vmatprep.subr.mxu1 %v4484_v52  ;;  %2281 = vmatprep.subr.mxu0 %v4642_v48  ;;  %v4648_v52 = vld [vmem:[#allocation17 + $0x8] sm:$0xff] }
0x108e   :  { %2420 = vmatpush1.msra.mxu1 %v4490_v33  ;;  %2282 = vmatpush1.msra.mxu0 %v4645_v51  ;;  %v4651_v33 = vld [vmem:[#allocation17] sm:$0xff] }
0x108f   :  { %2421 = vmatprep.subr.mxu1 %v4494_v40  ;;  %2283 = vmatprep.subr.mxu0 %v4648_v52  ;;  %v4656_v40 = vld [vmem:[#allocation9 + $0x28] sm:$0xff] }
0x1090   :  { %2422 = vmatpush1.msra.mxu1 %v4500_v6  ;;  %2284 = vmatpush1.msra.mxu0 %v4651_v33  ;;  %v4658_v6 = vld [vmem:[#allocation6 + $0x28] sm:$0xff] }
0x1091   :  { %2423 = vmatprep.subr.mxu1 %v4504_v15  ;;  %3492 = vmatprep.subr.mxu0 %v4896_v14  ;;  %v4663_v15 = vld [vmem:[%s4888_s7] ss:$0 sm:$0xff]  ;;  %s3930_s7 = smov 112  }
0x1092   :  { %2424 = vmatpush1.msra.mxu1 %v4510_v20  ;;  %v2239_v20 = vsub.f32 1.0, %v4656_v40 }
0x1093   :  { %2425 = vmatprep.subr.mxu1 %v4522_v12 }
0x1094   :  { %2426 = vmatpush1.msra.mxu1 %v4525_v28 }
0x1095   :  { %2427 = vmatprep.subr.mxu1 %v4531_v18  ;;  %v2238_v18 = vmul.f32 %v4656_v40, %v4658_v6 }
0x1096   :  { %2428 = vmatpush1.msra.mxu1 %v4535_v11 }
0x1097   :  { %2585 = vmatprep.subr.mxu1 %v2249_v62 }
0x1147   :  { %v2226_v12 = vpop.f32.mrf.mxu1  ;;  %v2155_v41 = vpop.f32.mrf.mxu0 }
0x1148   :  { %v2237_v28 = vadd.f32 %v4663_v15, %v2226_v12 }
0x1149   :  { %v3491_v11 = vpop.f32.mrf.mxu1  ;;  %v2157_v39 = vpop.f32.mrf.mxu0 }
0x114a   :  { %v2240_v38 = vmul.f32 %v2239_v20, %v2237_v28  ;;  %2360 = vst.msk [vmem:[#allocation4 + $0x28] sm:$0xff] %vm176_vm0, %v2237_v28 }
0x114c   :  { %v2241_v21 = vadd.f32 %v2240_v38, %v2238_v18 }
0x114e   :  { %2362 = vst.msk [vmem:[#allocation5 + $0x10] sm:$0xff] %vm176_vm0, %v2241_v21  ;;  %3243 = vmatmul.mubr.msk.f32.vlgmr.msra.gmra.mxu0 %vm176_vm0, %v2241_v21 }
0x114f   :  { %3493 = vmatpush3.msra.mxu0 %v4462_v54  ;;  %3508 = vmatprep.mubr.msk.f32.mxu0 %vm3928_vm1, %v4896_v14 }
0x1150   :  { %3494 = vmatprep.subr.mxu0 %v4896_v14 }
0x1151   :  { %3495 = vmatpush3.msra.mxu0 %v4470_v47  ;;  %v4677_v26 = vld [vmem:[#allocation4 + $0x28] sm:$0xff] }
0x1152   :  { %3496 = vmatprep.subr.mxu0 %v4896_v14  ;;  %v3045_v30 = vmul.f32 %v4677_v26, %v2239_v20  ;;  %v2368_v20 = vld [vmem:[#allocation2 + $0x30] sm:$0xff] }
0x1153   :  { %3497 = vmatpush3.msra.mxu0 %v4476_v49 }
0x1154   :  { %3498 = vmatprep.subr.mxu0 %v4896_v14  ;;  %v4683_v35 = vadd.f32 %v3045_v30, %v2238_v18 }
0x1155   :  { %3499 = vmatpush3.msra.mxu0 %v4486_v53 }
0x1156   :  { %3500 = vmatprep.subr.mxu0 %v4896_v14 }
0x1157   :  { %3501 = vmatpush3.msra.mxu0 %v4496_v5 }
0x1158   :  { %3502 = vmatprep.subr.mxu0 %v4896_v14 }
0x1159   :  { %3503 = vmatpush3.msra.mxu0 %v4506_v10 }
0x115a   :  { %3504 = vmatprep.subr.mxu0 %v4896_v14 }
0x115b   :  { %3505 = vmatpush3.msra.mxu0 %v4527_v16 }
0x115c   :  { %3506 = vmatprep.subr.mxu0 %v4896_v14 }
0x115d   :  { %3507 = vmatpush3.msra.mxu0 %v4537_v24 }
0x115e   :  { %3511 = vmatprep.subr.mxu0 %v4896_v14 }
0x120e   :  { %v2319_v13 = vpop.f32.mrf.mxu0 }
0x120f   :  { %v2320_v19 = vadd.f32 %v2319_v13, %v2155_v41 }
0x1210   :  { %v2321_v50 = vpop.f32.mrf.mxu0 }
0x1211   :  { %v2327_v60 = vadd.f32 %v2320_v19, %v4222_v4  ;;  %v2322_v0 = vadd.f32 %v2321_v50, %v2157_v39 }
0x1213   :  { %v2328_v23 = vadd.f32 %v2322_v0, %v4225_v9  ;;  %v3244_v25 = vmul.f32 -1.442695, %v2327_v60 }
0x1215   :  { %3670 = vtanh.f32 %v2328_v23  ;;  %v3245_v31 = vmul.f32 -1.442695, %v2328_v23 }
0x1216   :  { %3672 = vpow2.f32 %v3244_v25 }
0x1222   :  { %v3671_v46 = vpop.eup %3670 }
0x1223   :  { %2344 = vrot.lane.b32.xlu1 %v3671_v46, %s3929_s6  ;;  %v3673_v27 = vpop.eup %3672 }
0x1224   :  { %v2335_v29 = vadd.f32 1.0, %v3673_v27 }
0x1226   :  { %3674 = vrcp.f32 %v2335_v29 }
0x1233   :  { %v3675_v56 = vpop.eup %3674 }
0x1234   :  { %v2342_v8 = vmul.f32 %v3675_v56, %v4611_v32 }
0x1295   :  { %v2345_v62 = vpop.permute.xlu1 %2344 }
0x1296   :  { %v2347_v34 = vmul.f32 %v3675_v56, %v2345_v62  ;;  %v2676_v62 = vld [vmem:[#allocation2 + $0x38] sm:$0xff] }
0x1298   :  { %2349 = vrot.lane.b32.xlu0 %v2347_v34, %s3929_s6 }
0x130a   :  { %v2350_v4 = vpop.permute.xlu0 %2349 }
0x130b   :  { %v4700_v57 = vadd.f32 %v2350_v4, %v2342_v8  ;;  %v2789_v8 = vld [vmem:[#allocation9 + $0x38] sm:$0xff]  ;;  %v4769_v4 = vld [vmem:[#allocation9 + $0x10] sm:$0xff] }
0x130d   :  { %3676 = vtanh.f32 %v4700_v57 }
0x130e   :  { %3678 = vpow2.f32 %v3245_v31  ;;  %v4779_v31 = vld [vmem:[#allocation9] sm:$0xff] }
0x131a   :  { %v3677_v9 = vpop.eup %3676 }
0x131b   :  { %2355 = vrot.lane.b32.xlu1 %v3677_v9, %s3929_s6  ;;  %v3679_v37 = vpop.eup %3678  ;;  %v4776_v9 = vld [vmem:[#allocation12] sm:$0xff] }
0x131c   :  { %v2336_v61 = vadd.f32 1.0, %v3679_v37  ;;  %v2672_v37 = vld [vmem:[#allocation6 + $0x38] sm:$0xff] }
0x131e   :  { %3680 = vrcp.f32 %v2336_v61  ;;  %v3039_v61 = vsub.f32 1.0, %v2789_v8 }
0x132b   :  { %v3681_v59 = vpop.eup %3680 }
0x138d   :  { %v2356_v36 = vpop.permute.xlu1 %2355 }
0x138e   :  { %v2358_v7 = vmul.f32 %v3681_v59, %v2356_v36 }
0x1390   :  { %v2369_v12 = vmul.f32 %v2368_v20, %v2358_v7  ;;  %v2767_v7 = vmul.f32 %v2789_v8, %v2672_v37 }
0x1392   :  { %3246 = vmatmul.mubr.msk.f32.vlgmr.msra.gmra.mxu1 %vm338_vm2, %v2369_v12  ;;  %3509 = vmatmul.mubr.msk.f32.vlgmr.msra.gmra.mxu0 %vm338_vm2, %v2369_v12 }
0x1393   :  { %2586 = vmatpush1.msra.mxu1 %v4634_v43  ;;  %2625 = vmatprep.mubr.f32.mxu1 %v4896_v14 }
0x1394   :  { %2587 = vmatprep.subr.mxu1 %v4637_v44  ;;  %3512 = vmatpush3.msra.mxu0 %v4462_v54  ;;  %v4733_v54 = vld [vmem:[#allocation9 + $0x30] sm:$0xff] }
0x1395   :  { %2588 = vmatpush1.msra.mxu1 %v4639_v45  ;;  %3513 = vmatprep.subr.mxu0 %v4896_v14 }
0x1396   :  { %2589 = vmatprep.subr.mxu1 %v4642_v48  ;;  %3514 = vmatpush3.msra.mxu0 %v4470_v47  ;;  %v4735_v47 = vld [vmem:[#allocation6 + $0x30] sm:$0xff] }
0x1397   :  { %2590 = vmatpush1.msra.mxu1 %v4645_v51  ;;  %3515 = vmatprep.subr.mxu0 %v4896_v14 }
0x1398   :  { %2591 = vmatprep.subr.mxu1 %v4648_v52  ;;  %3516 = vmatpush3.msra.mxu0 %v4476_v49  ;;  %v2547_v49 = vsub.f32 1.0, %v4733_v54 }
0x1399   :  { %2592 = vmatpush1.msra.mxu1 %v4651_v33  ;;  %3517 = vmatprep.subr.mxu0 %v4896_v14 }
0x139a   :  { %3518 = vmatpush3.msra.mxu0 %v4486_v53  ;;  %3527 = vmatprep.mubr.msk.f32.mxu0 %vm3928_vm1, %v4896_v14 }
0x139b   :  { %3519 = vmatprep.subr.mxu0 %v4896_v14  ;;  %3530 = vmatprep.subr.mxu1 %v4896_v14 }
0x139c   :  { %3520 = vmatpush3.msra.mxu0 %v4496_v5 }
0x139d   :  { %3521 = vmatprep.subr.mxu0 %v4896_v14 }
0x139e   :  { %3522 = vmatpush3.msra.mxu0 %v4506_v10  ;;  %v2546_v10 = vmul.f32 %v4733_v54, %v4735_v47 }
0x139f   :  { %3523 = vmatprep.subr.mxu0 %v4896_v14 }
0x13a0   :  { %3524 = vmatpush3.msra.mxu0 %v4527_v16 }
0x13a1   :  { %3525 = vmatprep.subr.mxu0 %v4896_v14 }
0x13a2   :  { %3526 = vmatpush3.msra.mxu0 %v4537_v24 }
0x13a3   :  { %3549 = vmatprep.subr.mxu0 %v4896_v14 }
0x1452   :  { %v2534_v53 = vpop.f32.mrf.mxu0  ;;  %v2463_v48 = vpop.f32.mrf.mxu1 }
0x1453   :  { %v2545_v5 = vadd.f32 %v4663_v15, %v2534_v53 }
0x1454   :  { %v3510_v32 = vpop.f32.mrf.mxu0  ;;  %v2465_v51 = vpop.f32.mrf.mxu1 }
0x1455   :  { %v2548_v16 = vmul.f32 %v2547_v49, %v2545_v5  ;;  %2668 = vst.msk [vmem:[#allocation4 + $0x30] sm:$0xff] %vm176_vm0, %v2545_v5  ;;  %v2812_v32 = vsub.f32 %v4658_v6, %v4677_v26  ;;  %v2791_v6 = vld [vmem:[#allocation4 + $0x8] sm:$0xff] }
0x1457   :  { %v2549_v43 = vadd.f32 %v2548_v16, %v2546_v10 }
0x1459   :  { %2670 = vst.msk [vmem:[#allocation5 + $0x8] sm:$0xff] %vm176_vm0, %v2549_v43  ;;  %3249 = vmatmul.mubr.msk.f32.vlgmr.msra.gmra.mxu1 %vm176_vm0, %v2549_v43  ;;  %v4791_v43 = vld [vmem:[#allocation6 + $0x18] sm:$0xff] }
0x145a   :  { %3546 = vmatprep.mubr.msk.f32.mxu1 %vm3928_vm1, %v4896_v14 }
0x145c   :  { %v4746_v24 = vld [vmem:[#allocation4 + $0x30] sm:$0xff] }
0x145d   :  { %v3046_v44 = vmul.f32 %v4746_v24, %v2547_v49  ;;  %v2813_v53 = vsub.f32 %v4735_v47, %v4746_v24  ;;  %v2810_v47 = vsub.f32 %v4791_v43, %v4446_v3 }
0x145f   :  { %v4749_v45 = vadd.f32 %v3046_v44, %v2546_v10  ;;  %v2821_v44 = vand.u32 2147483647, %v2813_v53 }
0x1461   :  { %v2829_v26 = vmul.f32 %v2821_v44, %v4733_v54  ;;  %v2801_v44 = vld [vmem:[#allocation5 + $0x18] sm:$0xff] }
0x1519   :  { %v2627_v52 = vpop.f32.mrf.mxu1 }
0x151a   :  { %v2628_v33 = vadd.f32 %v2627_v52, %v2463_v48  ;;  %v2811_v48 = vsub.f32 %v4574_v2, %v4588_v42  ;;  %v2776_v52 = vld [vmem:[#allocation6 + $0x10] sm:$0xff]  ;;  %v4802_v42 = vld [vmem:[#allocation6] sm:$0xff] }
0x151b   :  { %v2629_v28 = vpop.f32.mrf.mxu1 }
0x151c   :  { %v2635_v18 = vadd.f32 %v2628_v33, %v4230_v55  ;;  %v2630_v11 = vadd.f32 %v2629_v28, %v2465_v51  ;;  %v2792_v33 = vld [vmem:[#allocation4 + $0x10] sm:$0xff] }
0x151d   :  { %v2809_v2 = vsub.f32 %v2776_v52, %v2792_v33 }
0x151e   :  { %v2636_v38 = vadd.f32 %v2630_v11, %v4233_v1  ;;  %v3250_v30 = vmul.f32 -1.442695, %v2635_v18  ;;  %v2820_v18 = vand.u32 2147483647, %v2812_v32  ;;  %v2775_v11 = vld [vmem:[#allocation6 + $0x8] sm:$0xff] }
0x1520   :  { %3682 = vtanh.f32 %v2636_v38  ;;  %v3251_v23 = vmul.f32 -1.442695, %v2636_v38  ;;  %v2819_v38 = vand.u32 2147483647, %v2811_v48  ;;  %v2828_v3 = vmul.f32 %v2820_v18, %v4656_v40  ;;  %v2803_v48 = vld [vmem:[#allocation5 + $0x28] sm:$0xff] }
0x1521   :  { %3684 = vpow2.f32 %v3250_v30 }
0x152d   :  { %v3683_v21 = vpop.eup %3682 }
0x152e   :  { %2652 = vrot.lane.b32.xlu0 %v3683_v21, %s3929_s6  ;;  %v3685_v41 = vpop.eup %3684  ;;  %v4804_v21 = vld [vmem:[#allocation4] sm:$0xff] }
0x152f   :  { %v2643_v39 = vadd.f32 1.0, %v3685_v41  ;;  %v2818_v41 = vand.u32 2147483647, %v2810_v47  ;;  %v2804_v47 = vld [vmem:[#allocation5 + $0x30] sm:$0xff] }
0x1531   :  { %3686 = vrcp.f32 %v2643_v39  ;;  %v2808_v39 = vsub.f32 %v2775_v11, %v2791_v6 }
0x153e   :  { %v3687_v13 = vpop.eup %3686 }
0x153f   :  { %v2650_v60 = vmul.f32 %v3687_v13, %v4700_v57  ;;  %v4773_v57 = vld [vmem:[#allocation9 + $0x8] sm:$0xff] }
0x15a0   :  { %v2653_v19 = vpop.permute.xlu0 %2652 }
0x15a1   :  { %v2655_v50 = vmul.f32 %v3687_v13, %v2653_v19  ;;  %v2827_v13 = vmul.f32 %v2819_v38, %v4572_v58  ;;  %v2807_v19 = vsub.f32 %v4802_v42, %v4804_v21  ;;  %v3698_v38 = vld [vmem:[#allocation9 + $0x18] sm:$0xff] }
0x15a3   :  { %2657 = vrot.lane.b32.xlu1 %v2655_v50, %s3929_s6  ;;  %v2826_v50 = vmul.f32 %v2818_v41, %v4436_v22 }
0x1615   :  { %v2658_v55 = vpop.permute.xlu1 %2657 }
0x1616   :  { %v2660_v0 = vadd.f32 %v2658_v55, %v2650_v60  ;;  %v2816_v60 = vand.u32 2147483647, %v2808_v39  ;;  %v2815_v55 = vand.u32 2147483647, %v2807_v19 }
0x1618   :  { %3688 = vtanh.f32 %v2660_v0  ;;  %v2823_v0 = vmul.f32 %v2815_v55, %v4779_v31 }
0x1619   :  { %3690 = vpow2.f32 %v3251_v23  ;;  %v2800_v23 = vld [vmem:[#allocation5 + $0x10] sm:$0xff] }
0x1625   :  { %v3689_v1 = vpop.eup %3688 }
0x1626   :  { %2663 = vrot.lane.b32.xlu0 %v3689_v1, %s3929_s6  ;;  %v3691_v46 = vpop.eup %3690  ;;  %v2799_v1 = vld [vmem:[#allocation5 + $0x8] sm:$0xff] }
0x1627   :  { %v2644_v25 = vadd.f32 1.0, %v3691_v46  ;;  %v2802_v46 = vld [vmem:[#allocation5 + $0x20] sm:$0xff] }
0x1629   :  { %3692 = vrcp.f32 %v2644_v25 }
0x1636   :  { %v3693_v27 = vpop.eup %3692 }
0x1698   :  { %v2664_v29 = vpop.permute.xlu0 %2663 }
0x1699   :  { %v2666_v56 = vmul.f32 %v3693_v27, %v2664_v29  ;;  %v3034_v27 = vsub.f32 1.0, %v4769_v4  ;;  %v3025_v29 = vmul.f32 %v4773_v57, %v2775_v11  ;;  %v3024_v11 = vmul.f32 %v4779_v31, %v4802_v42 }
0x169b   :  { %v2677_v34 = vmul.f32 %v2676_v62, %v2666_v56 }
0x169d   :  { %3528 = vmatmul.mubr.msk.f32.vlgmr.msra.gmra.mxu0 %vm338_vm2, %v2677_v34 }
0x169e   :  { %3550 = vmatpush3.msra.mxu0 %v2789_v8  ;;  %3565 = vmatprep.mubr.msk.f32.mxu0 %vm3928_vm1, %v4896_v14 }
0x169f   :  { %3551 = vmatprep.subr.mxu0 %v4896_v14 }
0x16a0   :  { %3552 = vmatpush3.msra.mxu0 %v4733_v54  ;;  %v2817_v54 = vand.u32 2147483647, %v2809_v2  ;;  %v3027_v2 = vmul.f32 %v3698_v38, %v4791_v43 }
0x16a1   :  { %3553 = vmatprep.subr.mxu0 %v4896_v14 }
0x16a2   :  { %3554 = vmatpush3.msra.mxu0 %v4656_v40  ;;  %v2825_v40 = vmul.f32 %v2817_v54, %v4769_v4  ;;  %v3051_v54 = vadd.f32 %v4449_v63, %v3027_v2 }
0x16a3   :  { %3555 = vmatprep.subr.mxu0 %v4896_v14 }
0x16a4   :  { %3556 = vmatpush3.msra.mxu0 %v4572_v58  ;;  %v2824_v58 = vmul.f32 %v2816_v60, %v4773_v57 }
0x16a5   :  { %3557 = vmatprep.subr.mxu0 %v4896_v14 }
0x16a6   :  { %3558 = vmatpush3.msra.mxu0 %v4436_v22 }
0x16a7   :  { %3559 = vmatprep.subr.mxu0 %v4896_v14 }
0x16a8   :  { %3560 = vmatpush3.msra.mxu0 %v4769_v4 }
0x16a9   :  { %3561 = vmatprep.subr.mxu0 %v4896_v14 }
0x16aa   :  { %3562 = vmatpush3.msra.mxu0 %v4773_v57 }
0x16ab   :  { %3563 = vmatprep.subr.mxu0 %v4896_v14 }
0x16ac   :  { %3564 = vmatpush3.msra.mxu0 %v4779_v31 }
0x16ad   :  { %3566 = vmatmul.mubr.msk.f32.vlgmr.msra.gmra.mxu0 %vm338_vm2, %v4776_v9 }
0x175d   :  { %v2755_v59 = vpop.f32.mrf.mxu0 }
0x175e   :  { %v2766_v36 = vadd.f32 %v4663_v15, %v2755_v59 }
0x175f   :  { %v3529_v20 = vpop.f32.mrf.mxu0 }
0x1760   :  { %v2769_v12 = vmul.f32 %v3039_v61, %v2766_v36  ;;  %2772 = vst.msk [vmem:[#allocation4 + $0x38] sm:$0xff] %vm176_vm0, %v2766_v36 }
0x1762   :  { %v2770_v49 = vadd.f32 %v2769_v12, %v2767_v7 }
0x1764   :  { %2773 = vst.msk [vmem:[#allocation5] sm:$0xff] %vm176_vm0, %v2770_v49 }
0x1767   :  { %v2797_v5 = vld [vmem:[#allocation4 + $0x38] sm:$0xff] }
0x1768   :  { %v2814_v10 = vsub.f32 %v2672_v37, %v2797_v5  ;;  %v3047_v16 = vmul.f32 %v3039_v61, %v2797_v5 }
0x176a   :  { %v2822_v15 = vand.u32 2147483647, %v2814_v10  ;;  %v4795_v51 = vadd.f32 %v3047_v16, %v2767_v7 }
0x176c   :  { %v2830_v28 = vmul.f32 %v2822_v15, %v2789_v8  ;;  %v3026_v8 = vmul.f32 %v4769_v4, %v2776_v52  ;;  %v2798_v15 = vld [vmem:[#allocation5] sm:$0xff] }
0x176d   :  { %v2970_v24 = vpop.f32.mrf.mxu0 }
0x176e   :  { %2989 = vrot.lane.b32.xlu1 %v2970_v24, %s3930_s7  ;;  %3531 = vmatpush3.msra.mxu1 %v2830_v28  ;;  %v2985_v22 = vsel %vm2974_vm3, %v2970_v24, 0.0  ;;  %v3032_v24 = vsub.f32 1.0, %v4779_v31 }
0x176f   :  { %3532 = vmatprep.subr.mxu1 %v4896_v14  ;;  %v3567_v30 = vpop.f32.mrf.mxu0 }
0x1770   :  { %3533 = vmatpush3.msra.mxu1 %v2829_v26 }
0x1771   :  { %3534 = vmatprep.subr.mxu1 %v4896_v14 }
0x1772   :  { %3535 = vmatpush3.msra.mxu1 %v2828_v3 }
0x1773   :  { %3536 = vmatprep.subr.mxu1 %v4896_v14 }
0x1774   :  { %3537 = vmatpush3.msra.mxu1 %v2827_v13 }
0x1775   :  { %3538 = vmatprep.subr.mxu1 %v4896_v14 }
0x1776   :  { %3539 = vmatpush3.msra.mxu1 %v2826_v50 }
0x1777   :  { %3540 = vmatprep.subr.mxu1 %v4896_v14 }
0x1778   :  { %3541 = vmatpush3.msra.mxu1 %v2825_v40 }
0x1779   :  { %3542 = vmatprep.subr.mxu1 %v4896_v14 }
0x177a   :  { %3543 = vmatpush3.msra.mxu1 %v2824_v58 }
0x177b   :  { %3544 = vmatprep.subr.mxu1 %v4896_v14  ;;  %v3033_v14 = vsub.f32 1.0, %v4773_v57 }
0x177c   :  { %3545 = vmatpush3.msra.mxu1 %v2823_v0 }
0x177d   :  { %3547 = vmatmul.mubr.msk.f32.vlgmr.msra.gmra.mxu1 %vm338_vm2, %v4776_v9  ;;  %v3041_v56 = vmul.f32 %v3033_v14, %v2791_v6  ;;  %v3042_v9 = vmul.f32 %v3034_v27, %v2792_v33  ;;  %v2805_v33 = vld [vmem:[#allocation5 + $0x38] sm:$0xff]  ;;  %v3040_v6 = vmul.f32 %v3032_v24, %v4804_v21 }
0x177f   :  { %v3049_v34 = vadd.f32 %v3041_v56, %v3025_v29  ;;  %v3050_v7 = vadd.f32 %v3042_v9, %v3026_v8  ;;  %v3048_v30 = vadd.f32 %v3040_v6, %v3024_v11 }
0x1792   :  { %2986 = vadd.xlane.f32.xlu1 %v2985_v22 }
0x17a3   :  { %3066 = vrot.lane.b32.xlu1 %v2799_v1, %s3930_s7 }
0x17a7   :  { %3068 = vrot.lane.b32.xlu1 %v2800_v23, %s3930_s7 }
0x17ab   :  { %3072 = vrot.lane.b32.xlu1 %v2802_v46, %s3930_s7 }
0x17e0   :  { %v2990_v25 = vpop.permute.xlu1 %2989 }
0x17e1   :  { %v2992_v16 = vsel %vm2974_vm3, %v2990_v25, 0.0 }
0x181b   :  { %v4829_v62 = vpop.xlane.xlu1 %2986 }
0x181f   :  { %v3067_v37 = vpop.permute.xlu1 %3066 }
0x1820   :  { %v3089_v61 = vadd.f32 %v3067_v37, %v3049_v34  ;;  %v3113_v59 = vsub.f32 %v3049_v34, %v3067_v37 }
0x1822   :  { %v3097_v36 = vmul.f32 0.5, %v3089_v61  ;;  %v3121_v41 = vmul.f32 %v3113_v59, %v3113_v59  ;;  %v2995_v61 = vadd.f32 1e-05, %v4829_v62 }
0x1823   :  { %v3069_v20 = vpop.permute.xlu1 %3068 }
0x1824   :  { %3105 = vst.msk [vmem:[#allocation20 + $0x8] sm:$0xff] %vm2974_vm3, %v3097_v36  ;;  %v3090_v12 = vadd.f32 %v3069_v20, %v3050_v7  ;;  %v3114_v49 = vsub.f32 %v3050_v7, %v3069_v20  ;;  %v3129_v31 = vsel %vm2974_vm3, %v3121_v41, 0.0  ;;  %3694 = vrcp.f32 %v2995_v61 }
0x1826   :  { %v3098_v53 = vmul.f32 0.5, %v3090_v12  ;;  %v3122_v19 = vmul.f32 %v3114_v49, %v3114_v49 }
0x1827   :  { %v3073_v5 = vpop.permute.xlu1 %3072 }
0x1828   :  { %3106 = vst.msk [vmem:[#allocation20 + $0x10] sm:$0xff] %vm2974_vm3, %v3098_v53  ;;  %v3092_v57 = vadd.f32 %v3073_v5, %v4594_v17  ;;  %v3116_v50 = vsub.f32 %v4594_v17, %v3073_v5  ;;  %v3131_v0 = vsel %vm2974_vm3, %v3122_v19, 0.0 }
0x182a   :  { %v3100_v10 = vmul.f32 0.5, %v3092_v57  ;;  %v3124_v22 = vmul.f32 %v3116_v50, %v3116_v50 }
0x182c   :  { %3108 = vst.msk [vmem:[#allocation20 + $0x20] sm:$0xff] %vm2974_vm3, %v3100_v10  ;;  %v3135_v29 = vsel %vm2974_vm3, %v3124_v22, 0.0 }
0x1831   :  { %v3695_v59 = vpop.eup %3694 }
0x183d   :  { %v2900_v4 = vpop.f32.mrf.mxu1 }
0x183e   :  { %2979 = vrot.lane.b32.xlu0 %v2900_v4, %s3930_s7  ;;  %v2975_v52 = vsel %vm2974_vm3, %v2900_v4, 0.0 }
0x183f   :  { %v3548_v32 = vpop.f32.mrf.mxu1 }
0x185d   :  { %2993 = vadd.xlane.f32.xlu0 %v2992_v16 }
0x1873   :  { %3064 = vrot.lane.b32.xlu0 %v2798_v15, %s3930_s7 }
0x1877   :  { %3070 = vrot.lane.b32.xlu0 %v2801_v44, %s3930_s7 }
0x187b   :  { %3074 = vrot.lane.b32.xlu0 %v2803_v48, %s3930_s7 }
0x189a   :  { %2976 = vadd.xlane.f32.xlu0 %v2975_v52 }
0x18b0   :  { %v2980_v28 = vpop.permute.xlu0 %2979  ;;  %3078 = vrot.lane.b32.xlu0 %v2805_v33, %s3930_s7 }
0x18b1   :  { %v2982_v18 = vsel %vm2974_vm3, %v2980_v28, 0.0 }
0x18b2   :  { %2983 = vadd.xlane.f32.xlu1 %v2982_v18 }
0x18c3   :  { %3076 = vrot.lane.b32.xlu1 %v2804_v47, %s3930_s7 }
0x18e6   :  { %v2994_v26 = vpop.xlane.xlu0 %2993 }
0x18e7   :  { %v3010_v49 = vadd.f32 1e-05, %v2994_v26 }
0x18e9   :  { %3696 = vrcp.f32 %v3010_v49 }
0x18ea   :  { %v3065_v3 = vpop.permute.xlu0 %3064 }
0x18eb   :  { %v3088_v39 = vadd.f32 %v3065_v3, %v3048_v30  ;;  %v3112_v13 = vsub.f32 %v3048_v30, %v3065_v3 }
0x18ed   :  { %v3096_v60 = vmul.f32 0.5, %v3088_v39  ;;  %v3120_v40 = vmul.f32 %v3112_v13, %v3112_v13 }
0x18ee   :  { %v3071_v55 = vpop.permute.xlu0 %3070 }
0x18ef   :  { %3104 = vst.msk [vmem:[#allocation20] sm:$0xff] %vm2974_vm3, %v3096_v60  ;;  %v3128_v42 = vsel %vm2974_vm3, %v3120_v40, 0.0  ;;  %v3091_v43 = vadd.f32 %v3071_v55, %v3051_v54  ;;  %v3115_v21 = vsub.f32 %v3051_v54, %v3071_v55 }
0x18f0   :  { %v3130_v58 = vadd.f32 %v3129_v31, %v3128_v42 }
0x18f1   :  { %v3099_v1 = vmul.f32 0.5, %v3091_v43  ;;  %v3123_v63 = vmul.f32 %v3115_v21, %v3115_v21 }
0x18f2   :  { %v3132_v23 = vadd.f32 %v3131_v0, %v3130_v58  ;;  %v3075_v46 = vpop.permute.xlu0 %3074 }
0x18f3   :  { %3107 = vst.msk [vmem:[#allocation20 + $0x18] sm:$0xff] %vm2974_vm3, %v3099_v1  ;;  %v3133_v17 = vsel %vm2974_vm3, %v3123_v63, 0.0  ;;  %v3093_v25 = vadd.f32 %v3075_v46, %v4683_v35  ;;  %v3117_v14 = vsub.f32 %v4683_v35, %v3075_v46 }
0x18f4   :  { %v3134_v27 = vadd.f32 %v3133_v17, %v3132_v23 }
0x18f5   :  { %v3101_v56 = vmul.f32 0.5, %v3093_v25  ;;  %v3125_v34 = vmul.f32 %v3117_v14, %v3117_v14 }
0x18f6   :  { %v3136_v8 = vadd.f32 %v3135_v29, %v3134_v27  ;;  %v3697_v5 = vpop.eup %3696 }
0x18f7   :  { %3109 = vst.msk [vmem:[#allocation20 + $0x28] sm:$0xff] %vm2974_vm3, %v3101_v56  ;;  %v3137_v9 = vsel %vm2974_vm3, %v3125_v34, 0.0 }
0x18f8   :  { %v3138_v37 = vadd.f32 %v3137_v9, %v3136_v8 }
0x1923   :  { %v2977_v36 = vpop.xlane.xlu0 %2976 }
0x1924   :  { %v2997_v7 = vmul.f32 %v3695_v59, %v2977_v36 }
0x1926   :  { %v2999_v20 = vsel %vm2998_vm4, %v2997_v7, 0.0 }
0x1927   :  { %v3079_v35 = vpop.permute.xlu0 %3078  ;;  %3000 = vadd.xlane.f32.xlu1 %v2999_v20 }
0x1928   :  { %v3095_v12 = vadd.f32 %v3079_v35, %v4795_v51  ;;  %v3119_v62 = vsub.f32 %v4795_v51, %v3079_v35 }
0x192a   :  { %v3103_v53 = vmul.f32 0.5, %v3095_v12  ;;  %v3127_v44 = vmul.f32 %v3119_v62, %v3119_v62 }
0x192c   :  { %3111 = vst.msk [vmem:[#allocation20 + $0x38] sm:$0xff] %vm2974_vm3, %v3103_v53  ;;  %v3141_v18 = vsel %vm2974_vm3, %v3127_v44, 0.0 }
0x193b   :  { %v2984_v57 = vpop.xlane.xlu1 %2983 }
0x193c   :  { %v3012_v10 = vmul.f32 %v3697_v5, %v2984_v57 }
0x193e   :  { %v3013_v4 = vsel %vm2998_vm4, %v3012_v10, 0.0 }
0x193f   :  { %3014 = vadd.xlane.f32.xlu0 %v3013_v4  ;;  %v3077_v32 = vpop.permute.xlu1 %3076 }
0x1940   :  { %v3094_v16 = vadd.f32 %v3077_v32, %v4749_v45  ;;  %v3118_v15 = vsub.f32 %v4749_v45, %v3077_v32 }
0x1942   :  { %v3102_v48 = vmul.f32 0.5, %v3094_v16  ;;  %v3126_v52 = vmul.f32 %v3118_v15, %v3118_v15 }
0x1944   :  { %3110 = vst.msk [vmem:[#allocation20 + $0x30] sm:$0xff] %vm2974_vm3, %v3102_v48  ;;  %v3139_v33 = vsel %vm2974_vm3, %v3126_v52, 0.0 }
0x1945   :  { %v3140_v28 = vadd.f32 %v3139_v33, %v3138_v37 }
0x1947   :  { %v3142_v47 = vadd.f32 %v3141_v18, %v3140_v28 }
0x1949   :  { %3143 = vadd.xlane.f32.xlu0 %v3142_v47 }
0x194a   :  { %3870 = shalt.err (!%p3867_p2)
}
0x194b   :  { %3169 = dma.vmem_to_hbm [thread:$0]  %s3164_s14, 1024, %s4892_s11, [#allocation8], %s3915_s26, %s3915_s26, %s3916_s27   ;;  %vm3156_vm5 = vcmask 0  }
0x194c   :  { %s3932_s17 = smov [#allocation21]  }
0x194d   :  { %s3176_s1 = sshll.u32 %s3932_s17, 4  ;;  %s3177_s1 = int_to_ptr.vmem [resolvable:$true] %s3176_s1 }
0x194e   :  { %s3879_s2 = scalar_lea.vmem %s3177_s1, 16  ;;  %s3883_s18 = scalar_lea.vmem %s3177_s1, 32 }
0x194f   :  { %p3880_p3 = scmp.ne.s32.totalorder %s3177_s1, %s3879_s2  ;;  %p3884_p4 = scmp.lt.s32.totalorder %s3177_s1, %s3177_s1 }
0x1950   :  { %p3885_p5 = scmp.lt.s32.totalorder %s3883_s18, %s3879_s2 }
0x1952   :  { %p3886_p6 = por %p3885_p5, %p3884_p4 }
0x1954   :  { %p3887_p7 = pnand %p3886_p6, %p3880_p3 }
0x19b0   :  { %v3001_v45 = vpop.xlane.xlu1 %3000 }
0x19b1   :  { %v3002_v51 = vrot.slane %v3001_v45, 4 }
0x19b3   :  { %v3003_v24 = vadd.f32 %v3002_v51, %v3001_v45 }
0x19b5   :  { %v3004_v11 = vrot.slane %v3003_v24, 2 }
0x19b7   :  { %v3005_v6 = vadd.f32 %v3004_v11, %v3003_v24 }
0x19b9   :  { %v3006_v26 = vrot.slane %v3005_v6, 1 }
0x19bb   :  { %v3007_v38 = vadd.f32 %v3006_v26, %v3005_v6 }
0x19bd   :  { %3568 = vpush %v3007_v38 }
0x19c8   :  { %v3015_v2 = vpop.xlane.xlu0 %3014 }
0x19c9   :  { %v3016_v30 = vrot.slane %v3015_v2, 4 }
0x19cb   :  { %v3017_v3 = vadd.f32 %v3016_v30, %v3015_v2 }
0x19cd   :  { %v3018_v41 = vrot.slane %v3017_v3, 2 }
0x19cf   :  { %v3019_v39 = vadd.f32 %v3018_v41, %v3017_v3 }
0x19d1   :  { %v3020_v13 = vrot.slane %v3019_v39, 1 }
0x19d2   :  { %v3144_v54 = vpop.xlane.xlu0 %3143 }
0x19d3   :  { %v3145_v19 = vrot.slane %v3144_v54, 4  ;;  %v3021_v50 = vadd.f32 %v3020_v13, %v3019_v39 }
0x19d5   :  { %v3146_v60 = vadd.f32 %v3145_v19, %v3144_v54  ;;  %3570 = vpush %v3021_v50 }
0x19d7   :  { %v3147_v40 = vrot.slane %v3146_v60, 2 }
0x19d9   :  { %v3148_v55 = vadd.f32 %v3147_v40, %v3146_v60 }
0x19db   :  { %v3149_v31 = vrot.slane %v3148_v55, 1 }
0x19dd   :  { %v3150_v42 = vadd.f32 %v3149_v31, %v3148_v55 }
0x19df   :  { %3572 = vpush %v3150_v42 }
0x19ee   :  { %s3569_s11 = spop %3568 }
0x19ef   :  { %v3009_v21 = vstv %s3569_s11 }
0x1a06   :  { %s3571_s26 = spop %3570 }
0x1a07   :  { %v3023_v43 = vstv %s3571_s26 }
0x1a08   :  { %v3154_v0 = vadd.f32 %v3023_v43, %v3009_v21 }
0x1a10   :  { %s3573_s27 = spop %3572 }
0x1a11   :  { %v3152_v58 = vstv %s3573_s27 }
0x1a12   :  { %v3153_v22 = vmul.f32 0.0009765625, %v3152_v58 }
0x1a14   :  { %v3155_v1 = vadd.f32 %v3154_v0, %v3153_v22 }
0x1a16   :  { %3157 = vst.msk [vmem:[#allocation21] sm:$0x1] %vm3156_vm5, %v3155_v1 }
0x1a17   :  { %3890 = shalt.err (!%p3887_p7)
}
0x1a18   :  { %3179 = dma.vmem_to_hbm [thread:$0]  %s3177_s1, 16, %s4893_s12, [#allocation22]  }
0x1a19   :  { %3909 = dma.done.wait [#allocation8], 1024  }
0x1a1a   :  { %3910 = vsyncadd [#allocation8], 4294966272 }
0x1a1b   :  { %3911 = dma.done.wait [#allocation22], 16  }
0x1a1c   :  { %3912 = vsyncadd [#allocation22], 4294967280 }
0x1a1d   :  { %3186 = vsyncpa [#allocation7], 1 }
0x1a1e   :  { %3187 = vsyncpa [#allocation10], 1 }
0x1a1f   :  { %3188 = vsyncpa [#allocation13], 1 }
0x1a20   :  { %3189 = vsyncpa [#allocation16], 1 }
0x1a21   :  { %3190 = vsyncpa [#allocation19], 1 }
0x1a22   :  { %3191 = vsyncpa [#allocation8], 1 }
0x1a23   :  { %3192 = vsyncpa [#allocation22], 1 }

</bundles_post_ra>
